<compile_context>
chip_gen: v5e
topology: v5e:2x2
jax: 0.10.0
libtpu: 0.0.40
codegen_flags: <defaults>
</compile_context>

<pallas_src>
import math

import jax
import jax.numpy as jnp
import numpy as np
from jax.experimental import pallas as pl
from jax.experimental.pallas import tpu as pltpu

SQRT2 = math.sqrt(2.0)
INV_SQRT2 = 1.0 / SQRT2
LN_EPS = 1e-6


# ---------------------------------------------------------------------------
# In-kernel helpers
# ---------------------------------------------------------------------------
def _layer_norm(x, gamma, beta, eps=LN_EPS):
    """PyTorch-module LayerNorm: mean over last dim, unbiased std, /(std+eps)."""
    n = x.shape[-1]
    mean = jnp.mean(x, axis=-1, keepdims=True)
    centered = x - mean
    var = jnp.sum(centered * centered, axis=-1, keepdims=True) * (1.0 / (n - 1))
    std = jnp.sqrt(var)
    # Per-row reciprocal ([TM, 1]) + broadcast multiply instead of a full-tile divide.
    inv = 1.0 / (std + eps)
    return gamma * (centered * inv) + beta


def transformer_layer_kernel(
    h1_ref, h2_ref,            # [TM, E] activation row tiles
    wvo_ref,                   # [E, E] fused value_proj @ final_linear (pre-transposed)
    w1_ref, w2_ref,            # [E, F], [F, E] FFN weights (pre-transposed)
    vece_ref,                  # [8, E] packed: bvo, g1, be1, bf2, g2, be2, pad, pad
    vecf_ref,                  # [8, F] packed: bf1 in row 0
    out_ref,                   # [TM, E]
):
    h1 = h1_ref[...]
    h2 = h2_ref[...]

    vece = vece_ref[...]
    bvo = vece[0:1, :]
    g1  = vece[1:2, :]
    be1 = vece[2:3, :]
    bf2 = vece[3:4, :]
    g2  = vece[4:5, :]
    be2 = vece[5:6, :]
    bf1 = vecf_ref[0:1, :]

    # --- multi-headed self-attention -----------------------------------------
    # With 2-D inputs the per-head sequence length is 1, so softmax == 1.0 and
    # the attention output is exactly final_linear(value_proj(hidden2)); the two
    # affine maps are pre-fused offline into (wvo, bvo) -> single MXU pass.
    attn = jnp.dot(h2, wvo_ref[...], preferred_element_type=jnp.float32) + bvo

    # dropout_1 (inference: identity) + residual + LayerNorm 1
    inter = _layer_norm(attn + h1, g1, be1)

    # --- position-wise feed forward with exact GELU ---------------------------
    ff = jnp.dot(inter, w1_ref[...], preferred_element_type=jnp.float32) + bf1
    ff = ff * 0.5 * (1.0 + jax.lax.erf(ff * INV_SQRT2))
    ff = jnp.dot(ff, w2_ref[...], preferred_element_type=jnp.float32) + bf2

    # dropout_2 (inference: identity) + residual + LayerNorm 2
    out_ref[...] = _layer_norm(ff + inter, g2, be2)


# ---------------------------------------------------------------------------
# Wrapper
# ---------------------------------------------------------------------------
def transformer_layer(h1, h2, params, *, tm=128):
    B, E = h1.shape
    F = params["w1"].shape[1]
    tm = min(tm, B)
    assert B % tm == 0, "choose batch as a multiple of the row tile"
    grid = (pl.cdiv(B, tm),)

    row_spec = pl.BlockSpec((tm, E), lambda i: (i, 0))

    def resident(shape):
        # Same block index every grid step -> stays VMEM-resident, no re-DMA.
        return pl.BlockSpec(shape, lambda i: (0, 0))

    return pl.pallas_call(
        transformer_layer_kernel,
        out_shape=jax.ShapeDtypeStruct((B, E), jnp.float32),
        grid_spec=pltpu.PrefetchScalarGridSpec(
            num_scalar_prefetch=0,
            grid=grid,
            in_specs=[
                row_spec, row_spec,                       # h1, h2
                resident((E, E)),                         # wvo (fused attention)
                resident((E, F)), resident((F, E)),       # w1, w2
                resident((8, E)), resident((8, F)),       # packed vectors
            ],
            out_specs=row_spec,
        ),
        compiler_params=pltpu.CompilerParams(
            dimension_semantics=("parallel",),            # megacore-shardable on v7x
        ),
    )(h1, h2, params["wvo"], params["w1"], params["w2"],
      params["vec_e"], params["vec_f"])


# ---------------------------------------------------------------------------
# Pure-JAX reference mirroring the PyTorch forward (eval mode, unfused weights)
# ---------------------------------------------------------------------------
def _layer_norm_ref(x, gamma, beta, eps=LN_EPS):
    mean = jnp.mean(x, axis=-1, keepdims=True)
    std = jnp.sqrt(jnp.var(x, axis=-1, keepdims=True, ddof=1))
    return gamma * (x - mean) / (std + eps) + beta


def reference(h1, h2, params):
    v = h2 @ params["wv"] + params["bv"]
    attn = v @ params["wo"] + params["bo"]
    inter = _layer_norm_ref(attn + h1, params["g1"], params["be1"])
    ff = inter @ params["w1"] + params["bf1"]
    ff = ff * 0.5 * (1.0 + jax.lax.erf(ff / SQRT2))
    ff = ff @ params["w2"] + params["bf2"]
    return _layer_norm_ref(ff + inter, params["g2"], params["be2"])


# ---------------------------------------------------------------------------
# Parameter init (PyTorch nn.Linear-style uniform init) + one-time weight prep
# ---------------------------------------------------------------------------
def init_params(key, emb_size, heads_num, feedforward_size):
    assert emb_size % heads_num == 0
    ks = jax.random.split(key, 12)

    def lin(kw, kb, fan_in, fan_out):
        bound = 1.0 / math.sqrt(fan_in)
        w = jax.random.uniform(kw, (fan_out, fan_in), jnp.float32, -bound, bound)
        b = jax.random.uniform(kb, (fan_out,), jnp.float32, -bound, bound)
        return w.T, b  # kernel wants [in, out] weights

    # Query / key projections exist in the module but cannot affect the output
    # (softmax over a length-1 axis == 1.0); generated only for parameter parity.
    _wq, _bq = lin(ks[0], ks[1], emb_size, emb_size)
    _wk, _bk = lin(ks[2], ks[3], emb_size, emb_size)
    wv, bv = lin(ks[4], ks[5], emb_size, emb_size)
    wo, bo = lin(ks[6], ks[7], emb_size, emb_size)
    w1, bf1 = lin(ks[8], ks[9], emb_size, feedforward_size)
    w2, bf2 = lin(ks[10], ks[11], feedforward_size, emb_size)

    g = jnp.ones((emb_size,), jnp.float32)     # LayerNorm gamma init
    be = jnp.zeros((emb_size,), jnp.float32)   # LayerNorm beta init

    # One-time offline fusion of the two back-to-back attention affine maps
    # (exact algebraic identity, done once in f32 outside the kernel).
    wvo = jnp.dot(wv, wo, preferred_element_type=jnp.float32)
    bvo = jnp.dot(bv, wo, preferred_element_type=jnp.float32) + bo

    # Pack all the tiny per-feature vectors into sublane-aligned arrays
    # (one DMA each instead of ~7 padded (8,128)-tile DMAs).
    vec_e = jnp.stack(
        [bvo, g, be, bf2, g, be, jnp.zeros_like(bvo), jnp.zeros_like(bvo)], axis=0
    )  # [8, E] rows: bvo, g1, be1, bf2, g2, be2, pad, pad
    vec_f = jnp.zeros((8, feedforward_size), jnp.float32).at[0].set(bf1)  # [8, F]

    return {
        "wvo": wvo, "w1": w1, "w2": w2,
        "vec_e": vec_e, "vec_f": vec_f,
        # unfused copies for the pure-JAX reference
        "wv": wv, "wo": wo,
        "bv": bv, "bo": bo, "bf1": bf1, "bf2": bf2,
        "g1": g, "be1": be, "g2": g, "be2": be,
    }


# ---------------------------------------------------------------------------
if __name__ == "__main__":
    # Lane/sublane-friendly sizes (E, F multiples of 128; batch a multiple of
    # the 128-row tile) so vregs and the MXU are fully utilized on v5e/v6e/v7x.
    emb_size, heads_num, feedforward_size, dropout = 128, 4, 256, 0.1
    batch = 256

    key = jax.random.PRNGKey(0)
    k1, k2, kp = jax.random.split(key, 3)
    hidden1 = jax.random.normal(k1, (batch, emb_size), jnp.float32)
    hidden2 = jax.random.normal(k2, (batch, emb_size), jnp.float32)
    params = init_params(kp, emb_size, heads_num, feedforward_size)

    out = jax.block_until_ready(transformer_layer(hidden1, hidden2, params))
    ref = jax.block_until_ready(reference(hidden1, hidden2, params))

    # Tolerance covers MXU default-precision differences between the Mosaic
    # in-kernel f32 matmuls / fused attention weight and the XLA reference dots.
    np.testing.assert_allclose(np.asarray(out), np.asarray(ref), rtol=2e-3, atol=2e-3)

    print("KERNEL_OK")
</pallas_src>

<mosaic_0001>
module attributes {stable_mosaic.version = 11 : i64} {
  func.func @transformer_layer_kernel(%arg0: i32, %arg1: memref<128x128xf32, #tpu.memory_space<vmem>>, %arg2: memref<128x128xf32, #tpu.memory_space<vmem>>, %arg3: memref<128x128xf32, #tpu.memory_space<vmem>>, %arg4: memref<128x256xf32, #tpu.memory_space<vmem>>, %arg5: memref<256x128xf32, #tpu.memory_space<vmem>>, %arg6: memref<8x128xf32, #tpu.memory_space<vmem>>, %arg7: memref<8x256xf32, #tpu.memory_space<vmem>>, %arg8: memref<128x128xf32, #tpu.memory_space<vmem>>) attributes {dimension_semantics = [#tpu.dimension_semantics<parallel>], iteration_bounds = array<i64: 2>, scalar_prefetch = 0 : i64, scratch_operands = 0 : i64, tpu.core_type = #tpu.core_type<tc>, window_params = [{transform_indices = @transform_0, window_bounds = array<i64: 128, 128>}, {transform_indices = @transform_1, window_bounds = array<i64: 128, 128>}, {pipeline_mode = #tpu.pipeline_mode<synchronous>, transform_indices = @transform_2, window_bounds = array<i64: 128, 128>}, {pipeline_mode = #tpu.pipeline_mode<synchronous>, transform_indices = @transform_3, window_bounds = array<i64: 128, 256>}, {pipeline_mode = #tpu.pipeline_mode<synchronous>, transform_indices = @transform_4, window_bounds = array<i64: 256, 128>}, {pipeline_mode = #tpu.pipeline_mode<synchronous>, transform_indices = @transform_5, window_bounds = array<i64: 8, 128>}, {pipeline_mode = #tpu.pipeline_mode<synchronous>, transform_indices = @transform_6, window_bounds = array<i64: 8, 256>}, {transform_indices = @transform_7, window_bounds = array<i64: 128, 128>}]} {
    %c0 = arith.constant 0 : index
    %c0_0 = arith.constant 0 : index
    %0 = vector.load %arg1[%c0, %c0_0] : memref<128x128xf32, #tpu.memory_space<vmem>>, vector<128x128xf32>
    %c0_1 = arith.constant 0 : index
    %c0_2 = arith.constant 0 : index
    %1 = vector.load %arg2[%c0_1, %c0_2] : memref<128x128xf32, #tpu.memory_space<vmem>>, vector<128x128xf32>
    %c0_3 = arith.constant 0 : index
    %c0_4 = arith.constant 0 : index
    %2 = vector.load %arg6[%c0_3, %c0_4] : memref<8x128xf32, #tpu.memory_space<vmem>>, vector<8x128xf32>
    %3 = vector.extract_strided_slice %2 {offsets = [0, 0], sizes = [1, 128], strides = [1, 1]} : vector<8x128xf32> to vector<1x128xf32>
    %4 = vector.extract_strided_slice %2 {offsets = [1, 0], sizes = [1, 128], strides = [1, 1]} : vector<8x128xf32> to vector<1x128xf32>
    %5 = vector.extract_strided_slice %2 {offsets = [2, 0], sizes = [1, 128], strides = [1, 1]} : vector<8x128xf32> to vector<1x128xf32>
    %6 = vector.extract_strided_slice %2 {offsets = [3, 0], sizes = [1, 128], strides = [1, 1]} : vector<8x128xf32> to vector<1x128xf32>
    %7 = vector.extract_strided_slice %2 {offsets = [4, 0], sizes = [1, 128], strides = [1, 1]} : vector<8x128xf32> to vector<1x128xf32>
    %8 = vector.extract_strided_slice %2 {offsets = [5, 0], sizes = [1, 128], strides = [1, 1]} : vector<8x128xf32> to vector<1x128xf32>
    %c0_5 = arith.constant 0 : index
    %c0_6 = arith.constant 0 : index
    %9 = vector.load %arg7[%c0_5, %c0_6] : memref<8x256xf32, #tpu.memory_space<vmem>>, vector<1x256xf32>
    %c0_7 = arith.constant 0 : index
    %c0_8 = arith.constant 0 : index
    %10 = vector.load %arg3[%c0_7, %c0_8] : memref<128x128xf32, #tpu.memory_space<vmem>>, vector<128x128xf32>
    %cst = arith.constant dense<0.000000e+00> : vector<128x128xf32>
    %11 = tpu.matmul %1, %10, %cst {dimension_numbers = #tpu.dot_dimension_numbers<[1], [0], [0], [1], [0, 0, 1, 1], [], []>} : vector<128x128xf32>, vector<128x128xf32>, vector<128x128xf32> -> vector<128x128xf32>
    %12 = vector.broadcast %3 : vector<1x128xf32> to vector<128x128xf32>
    %13 = arith.addf %11, %12 : vector<128x128xf32>
    %14 = arith.addf %13, %0 : vector<128x128xf32>
    %cst_9 = arith.constant dense<0.000000e+00> : vector<128xf32>
    %15 = vector.multi_reduction <add>, %14, %cst_9 [1] : vector<128x128xf32> to vector<128xf32>
    %16 = vector.shape_cast %15 : vector<128xf32> to vector<128x1xf32>
    %cst_10 = arith.constant 1.280000e+02 : f32
    %17 = vector.broadcast %cst_10 : f32 to vector<128x1xf32>
    %18 = arith.divf %16, %17 : vector<128x1xf32>
    %19 = vector.broadcast %18 : vector<128x1xf32> to vector<128x128xf32>
    %20 = arith.subf %14, %19 : vector<128x128xf32>
    %21 = arith.mulf %20, %20 : vector<128x128xf32>
    %cst_11 = arith.constant dense<0.000000e+00> : vector<128xf32>
    %22 = vector.multi_reduction <add>, %21, %cst_11 [1] : vector<128x128xf32> to vector<128xf32>
    %23 = vector.shape_cast %22 : vector<128xf32> to vector<128x1xf32>
    %cst_12 = arith.constant 0.00787401571 : f32
    %24 = vector.broadcast %cst_12 : f32 to vector<128x1xf32>
    %25 = arith.mulf %23, %24 : vector<128x1xf32>
    %26 = math.sqrt %25 : vector<128x1xf32>
    %cst_13 = arith.constant 9.99999997E-7 : f32
    %27 = vector.broadcast %cst_13 : f32 to vector<128x1xf32>
    %28 = arith.addf %26, %27 : vector<128x1xf32>
    %cst_14 = arith.constant 1.000000e+00 : f32
    %29 = vector.broadcast %cst_14 : f32 to vector<128x1xf32>
    %30 = arith.divf %29, %28 : vector<128x1xf32>
    %31 = vector.broadcast %30 : vector<128x1xf32> to vector<128x128xf32>
    %32 = arith.mulf %20, %31 : vector<128x128xf32>
    %33 = vector.broadcast %4 : vector<1x128xf32> to vector<128x128xf32>
    %34 = arith.mulf %33, %32 : vector<128x128xf32>
    %35 = vector.broadcast %5 : vector<1x128xf32> to vector<128x128xf32>
    %36 = arith.addf %34, %35 : vector<128x128xf32>
    %c0_15 = arith.constant 0 : index
    %c0_16 = arith.constant 0 : index
    %37 = vector.load %arg4[%c0_15, %c0_16] : memref<128x256xf32, #tpu.memory_space<vmem>>, vector<128x256xf32>
    %cst_17 = arith.constant dense<0.000000e+00> : vector<128x256xf32>
    %38 = tpu.matmul %36, %37, %cst_17 {dimension_numbers = #tpu.dot_dimension_numbers<[1], [0], [0], [1], [0, 0, 1, 1], [], []>} : vector<128x128xf32>, vector<128x256xf32>, vector<128x256xf32> -> vector<128x256xf32>
    %39 = vector.broadcast %9 : vector<1x256xf32> to vector<128x256xf32>
    %40 = arith.addf %38, %39 : vector<128x256xf32>
    %cst_18 = arith.constant 5.000000e-01 : f32
    %41 = vector.broadcast %cst_18 : f32 to vector<128x256xf32>
    %42 = arith.mulf %40, %41 : vector<128x256xf32>
    %cst_19 = arith.constant 0.707106769 : f32
    %43 = vector.broadcast %cst_19 : f32 to vector<128x256xf32>
    %44 = arith.mulf %40, %43 : vector<128x256xf32>
    %45 = math.erf %44 : vector<128x256xf32>
    %cst_20 = arith.constant 1.000000e+00 : f32
    %46 = vector.broadcast %cst_20 : f32 to vector<128x256xf32>
    %47 = arith.addf %46, %45 : vector<128x256xf32>
    %48 = arith.mulf %42, %47 : vector<128x256xf32>
    %c0_21 = arith.constant 0 : index
    %c0_22 = arith.constant 0 : index
    %49 = vector.load %arg5[%c0_21, %c0_22] : memref<256x128xf32, #tpu.memory_space<vmem>>, vector<256x128xf32>
    %cst_23 = arith.constant dense<0.000000e+00> : vector<128x128xf32>
    %50 = tpu.matmul %48, %49, %cst_23 {dimension_numbers = #tpu.dot_dimension_numbers<[1], [0], [0], [1], [0, 0, 1, 1], [], []>} : vector<128x256xf32>, vector<256x128xf32>, vector<128x128xf32> -> vector<128x128xf32>
    %51 = vector.broadcast %6 : vector<1x128xf32> to vector<128x128xf32>
    %52 = arith.addf %50, %51 : vector<128x128xf32>
    %53 = arith.addf %52, %36 : vector<128x128xf32>
    %cst_24 = arith.constant dense<0.000000e+00> : vector<128xf32>
    %54 = vector.multi_reduction <add>, %53, %cst_24 [1] : vector<128x128xf32> to vector<128xf32>
    %55 = vector.shape_cast %54 : vector<128xf32> to vector<128x1xf32>
    %cst_25 = arith.constant 1.280000e+02 : f32
    %56 = vector.broadcast %cst_25 : f32 to vector<128x1xf32>
    %57 = arith.divf %55, %56 : vector<128x1xf32>
    %58 = vector.broadcast %57 : vector<128x1xf32> to vector<128x128xf32>
    %59 = arith.subf %53, %58 : vector<128x128xf32>
    %60 = arith.mulf %59, %59 : vector<128x128xf32>
    %cst_26 = arith.constant dense<0.000000e+00> : vector<128xf32>
    %61 = vector.multi_reduction <add>, %60, %cst_26 [1] : vector<128x128xf32> to vector<128xf32>
    %62 = vector.shape_cast %61 : vector<128xf32> to vector<128x1xf32>
    %cst_27 = arith.constant 0.00787401571 : f32
    %63 = vector.broadcast %cst_27 : f32 to vector<128x1xf32>
    %64 = arith.mulf %62, %63 : vector<128x1xf32>
    %65 = math.sqrt %64 : vector<128x1xf32>
    %cst_28 = arith.constant 9.99999997E-7 : f32
    %66 = vector.broadcast %cst_28 : f32 to vector<128x1xf32>
    %67 = arith.addf %65, %66 : vector<128x1xf32>
    %cst_29 = arith.constant 1.000000e+00 : f32
    %68 = vector.broadcast %cst_29 : f32 to vector<128x1xf32>
    %69 = arith.divf %68, %67 : vector<128x1xf32>
    %70 = vector.broadcast %69 : vector<128x1xf32> to vector<128x128xf32>
    %71 = arith.mulf %59, %70 : vector<128x128xf32>
    %72 = vector.broadcast %7 : vector<1x128xf32> to vector<128x128xf32>
    %73 = arith.mulf %72, %71 : vector<128x128xf32>
    %74 = vector.broadcast %8 : vector<1x128xf32> to vector<128x128xf32>
    %75 = arith.addf %73, %74 : vector<128x128xf32>
    %c0_30 = arith.constant 0 : index
    %c0_31 = arith.constant 0 : index
    %76 = vector.load %arg8[%c0_30, %c0_31] : memref<128x128xf32, #tpu.memory_space<vmem>>, vector<128x128xf32>
    tpu.vector_store %arg8[%c0_30, %c0_31], %75 {strides = array<i32>} : memref<128x128xf32, #tpu.memory_space<vmem>>, vector<128x128xf32>,
    return
  }
  func.func @transform_0(%arg0: i32) -> (i32, i32) {
    %c0_i32 = arith.constant 0 : i32
    %c0_i32_0 = arith.constant 0 : i32
    return %arg0, %c0_i32 : i32, i32
  }
  func.func @transform_1(%arg0: i32) -> (i32, i32) {
    %c0_i32 = arith.constant 0 : i32
    %c0_i32_0 = arith.constant 0 : i32
    return %arg0, %c0_i32 : i32, i32
  }
  func.func @transform_2(%arg0: i32) -> (i32, i32) {
    %c0_i32 = arith.constant 0 : i32
    %c0_i32_0 = arith.constant 0 : i32
    %c0_i32_1 = arith.constant 0 : i32
    return %c0_i32, %c0_i32_0 : i32, i32
  }
  func.func @transform_3(%arg0: i32) -> (i32, i32) {
    %c0_i32 = arith.constant 0 : i32
    %c0_i32_0 = arith.constant 0 : i32
    %c0_i32_1 = arith.constant 0 : i32
    return %c0_i32, %c0_i32_0 : i32, i32
  }
  func.func @transform_4(%arg0: i32) -> (i32, i32) {
    %c0_i32 = arith.constant 0 : i32
    %c0_i32_0 = arith.constant 0 : i32
    %c0_i32_1 = arith.constant 0 : i32
    return %c0_i32, %c0_i32_0 : i32, i32
  }
  func.func @transform_5(%arg0: i32) -> (i32, i32) {
    %c0_i32 = arith.constant 0 : i32
    %c0_i32_0 = arith.constant 0 : i32
    %c0_i32_1 = arith.constant 0 : i32
    return %c0_i32, %c0_i32_0 : i32, i32
  }
  func.func @transform_6(%arg0: i32) -> (i32, i32) {
    %c0_i32 = arith.constant 0 : i32
    %c0_i32_0 = arith.constant 0 : i32
    %c0_i32_1 = arith.constant 0 : i32
    return %c0_i32, %c0_i32_0 : i32, i32
  }
  func.func @transform_7(%arg0: i32) -> (i32, i32) {
    %c0_i32 = arith.constant 0 : i32
    %c0_i32_0 = arith.constant 0 : i32
    return %arg0, %c0_i32 : i32, i32
  }
}

</mosaic_0001>

<bundles_post_ra>
// kernel: tpu_custom_call.1
= control target key start
LH: loop header
LB: loop body
LE: loop exit
PB: predicated region body
PF: predicated region fallthrough
CT: control target
= control target key end

     0   :  { %s7132_s0 = inlined_call_operand.hbm [shape: f32[256,128], index: 0, kind: input, shape index: {}]   ;;  %s7133_s1 = inlined_call_operand.hbm [shape: f32[256,128], index: 1, kind: input, shape index: {}]   ;;  %s7134_s2 = inlined_call_operand.hbm [shape: f32[128,128], index: 2, kind: input, shape index: {}]   ;;  %s7135_s3 = inlined_call_operand.hbm [shape: f32[128,256], index: 3, kind: input, shape index: {}]   ;;  %s7136_s4 = inlined_call_operand.hbm [shape: f32[256,128], index: 4, kind: input, shape index: {}]   ;;  %s7137_s5 = inlined_call_operand.hbm [shape: f32[8,128], index: 5, kind: input, shape index: {}]   ;;  %s7138_s6 = inlined_call_operand.hbm [shape: f32[8,256], index: 6, kind: input, shape index: {}]   ;;  %s7139_s7 = inlined_call_operand.hbm [shape: f32[256,128], index: 7, kind: output, shape index: {}]  }
   0x1   :  { %7177 = sst [smem:[#allocation47_spill]] %s7132_s0 }
   0x2   :  { %7178 = sst [smem:[#allocation48_spill]] %s7134_s2 }
   0x3   :  { %7179 = sst [smem:[#allocation49_spill]] %s7135_s3 }
   0x4   :  { %7180 = sst [smem:[#allocation50_spill]] %s7136_s4 }
   0x5   :  { %7181 = sst [smem:[#allocation51_spill]] %s7137_s5 }
   0x6   :  { %12 = vsyncpa [#allocation3], 0 }
   0x7   :  { %14 = vsyncpa [#allocation3 + $0x1], 0 }
   0x8   :  { %15 = vsyncpa [#allocation6], 0 }
   0x9   :  { %17 = vsyncpa [#allocation6 + $0x1], 0 }
   0xa   :  { %18 = vsyncpa [#allocation9], 0 }
   0xb   :  { %19 = vsyncpa [#allocation12], 0 }
   0xc   :  { %20 = vsyncpa [#allocation4], 0 }
   0xd   :  { %22 = vsyncpa [#allocation4 + $0x1], 0  ;;  %s4504_s24 = smov 0   ;;  %s4506_s25 = smov 0  }
   0xe   :  { %s4508_s26 = smov 0   ;;  %s4510_s27 = smov 0  }
   0xf LB: > { %s7182_s2 = sld [smem:[#allocation48_spill]]  ;;  %s4528_s8 = sadd.s32 4294967295, %s4450_s27   ;;  %s4450_s27 = sphi %s4510_s27, %s7328_s27   ;;  %s4446_s26 = sphi %s4508_s26, %s7327_s26   ;;  %s4442_s25 = sphi %s4506_s25, %s7326_s25   ;;  %s4438_s24 = sphi %s4504_s24, %s7325_s24  }
  0x10   : > { %p3743_p0 = scmp.ge.s32.totalorder %s4450_s27, 1  ;;  %p49_p1 = scmp.eq.s32.totalorder %s4528_s8, 0 }
  0x11   : > { %p216_p2 = scmp.lt.s32.totalorder %s4450_s27, 3  ;;  %s4452_s10 = smov [#allocation7]  }
  0x12   : > { %s229_s11 = sshll.u32 %s4452_s10, 4  ;;  %s7184_s3 = sld [smem:[#allocation49_spill]]  ;;  %s230_s11 = int_to_ptr.vmem [resolvable:$true] %s229_s11 }
  0x13   : > { %p4533_p3 = pnand %p3743_p0, %p216_p2  ;;  %s4453_s16 = smov [#allocation8]  }
  0x14   : > { %s243_s17 = sshll.u32 %s4453_s16, 4  ;;  %s7140_s18 = smov 128   ;;  %s244_s17 = int_to_ptr.vmem [resolvable:$true] %s243_s17 }
  0x15   : > { %s227_s30 = sshll.u32 %s7182_s2, 4  ;;  %p3879_p4 = pneg %p4533_p3  ;;  %s228_s30 = int_to_ptr.hbm [resolvable:$true] %s227_s30 }
  0x16   : > { %s7142_s19 = smov 8   ;;  %s4456_s20 = smov 256  }
  0x17   : > { %p4545_p6 = pnand %p3879_p4, %p49_p1  ;;  %s4457_s21 = smov 16  }
  0x18   : > { %s241_s14 = sshll.u32 %s7184_s3, 4  ;;  %s7186_s5 = sld [smem:[#allocation51_spill]]  ;;  %s242_s14 = int_to_ptr.hbm [resolvable:$true] %s241_s14 }
  0x19   : > { %3882 = dma.hbm_to_vmem [thread:$0]  (!%p4545_p6), %s228_s30, 2048, %s230_s11, [#allocation6], %s7140_s18, %s7140_s18, %s7142_s19  }
  0x1a   : > { %3885 = dma.hbm_to_vmem [thread:$0]  (!%p4545_p6), %s242_s14, 4096, %s244_s17, [#allocation9], %s4456_s20, %s4456_s20, %s4457_s21  }
  0x1b   : > { %s4458_s29 = smov [#allocation11]   ;;  %s7187_s4 = sld [smem:[#allocation50_spill]] }
  0x1c   : > { %s272_s10 = sshll.u32 %s4458_s29, 4  ;;  %s4459_s11 = smov [#allocation10]   ;;  %s273_s10 = int_to_ptr.vmem [resolvable:$true] %s272_s10 }
  0x1d   : > { %s257_s14 = sshll.u32 %s4459_s11, 4  ;;  %s282_s20 = sshll.u32 %s7138_s6, 4  ;;  %s258_s14 = int_to_ptr.vmem [resolvable:$true] %s257_s14  ;;  %s283_s20 = int_to_ptr.hbm [resolvable:$true] %s282_s20 }
  0x1e   : > { %s270_s28 = sshll.u32 %s7186_s5, 4  ;;  %s4460_s21 = smov [#allocation13]   ;;  %s271_s28 = int_to_ptr.hbm [resolvable:$true] %s270_s28 }
  0x1f   : > { %3891 = dma.hbm_to_vmem [thread:$0]  (!%p4545_p6), %s271_s28, 128, %s273_s10, [#allocation12]  }
  0x20   : > { %s284_s22 = sshll.u32 %s4460_s21, 4  ;;  %s3742_s23 = sadd.s32 4294967294, %s4450_s27   ;;  %s285_s22 = int_to_ptr.vmem [resolvable:$true] %s284_s22 }
  0x21   : > { %s255_s30 = sshll.u32 %s7187_s4, 4  ;;  %s4576_s28 = sadd.s32 1, %s4450_s27   ;;  %s256_s30 = int_to_ptr.hbm [resolvable:$true] %s255_s30 }
  0x22   : > { %3888 = dma.hbm_to_vmem [thread:$0]  (!%p4545_p6), %s256_s30, 4096, %s258_s14, [#allocation9], %s7140_s18, %s7140_s18, %s7142_s19  }
  0x23   : > { %3894 = dma.hbm_to_vmem [thread:$0]  (!%p4545_p6), %s283_s20, 256, %s285_s22, [#allocation12]  }
  0x24   : > { %s35_s29 = sadd.s32 1, %s4446_s26  ;;  %s32_s10 = ssub.s32 %s4450_s27, %s4576_s28 }
  0x25   : > { %p42_p7 = scmp.ne.s32.totalorder %s4446_s26, %s4442_s25  ;;  %p33_p8 = scmp.eq.s32.totalorder %s32_s10, 0 }
  0x26   : > { %p43_p9 = scmp.eq.s32.totalorder %s4450_s27, 0  ;;  %p48_p10 = scmp.ne.s32.totalorder %s4442_s25, %s4438_s24 }
  0x27   : > { %p203_p11 = scmp.eq.s32.totalorder %s4528_s8, 1  ;;  %p209_p2 = scmp.eq.s32.totalorder %s3742_s23, 1 }
  0x28   : > { %s4588_s12 = scalar_select %p33_p8, %s4446_s26, %s35_s29  }
  0x29   : > { %p4590_p12 = por %p43_p9, %p42_p7  ;;  %p4596_p13 = por %p49_p1, %p48_p10 }
  0x2a   : > { %p4600_p0 = por %p203_p11, %p42_p7  ;;  %p3911_p4 = scmp.lt.s32.totalorder %s4450_s27, 2 }
  0x2b   : > { %s295_s11 = sand.u32 1, %s4446_s26   ;;  %p4606_p6 = por %p209_p2, %p48_p10 }
  0x2c   : > { %s3750_s16 = sshll.u32 %s295_s11, 7  ;;  %s3802_s17 = sshll.u32 %s4450_s27, 7 }
  0x2d   : > { %s7192_s0 = sld [smem:[#allocation47_spill]]  ;;  %s299_s10 = scalar_lea.vmem [#allocation2], %s3750_s16 }
  0x2e   : > { %s307_s18 = sshll.u32 %s299_s10, 4  ;;  %p4616_p7 = pnand %p3911_p4, %p4590_p12  ;;  %s308_s18 = int_to_ptr.vmem [resolvable:$true] %s307_s18 }
  0x2f   : > { %s326_s3 = scalar_lea.hbm %s7133_s1, %s3802_s17  ;;  %s321_s4 = scalar_lea.vmem [#allocation5], %s3750_s16 }
  0x30   : > { %s4623_s5 = sshll.u32 %s321_s4, 4  ;;  %s327_s20 = sshll.u32 %s326_s3, 4  ;;  %s328_s20 = int_to_ptr.hbm [resolvable:$true] %s327_s20  ;;  %s330_s5 = int_to_ptr.vmem [resolvable:$true] %s4623_s5 }
  0x31   : > { %s296_s21 = scalar_lea.sflag [#allocation3], %s295_s11  ;;  %p4312_p9 = pneg %p4616_p7 }
  0x33   : > { %s304_s22 = scalar_lea.hbm %s7192_s0, %s3802_s17  ;;  %s4315_s19 = scalar_lea.hbm %s7192_s0, 256 }
  0x34   : > { %s305_s29 = sshll.u32 %s304_s22, 4  ;;  %s306_s29 = int_to_ptr.hbm [resolvable:$true] %s305_s29 }
  0x35   : > { %s4308_s22 = sshra.s32 %s306_s29, 4  ;;  %s4309_s22 = int_to_ptr.hbm [resolvable:$true] %s4308_s22 }
  0x36   : > { %s4310_s10 = scalar_lea.hbm %s4309_s22, 128  ;;  %p4316_p12 = scmp.lt.s32.totalorder %s4309_s22, %s7192_s0 }
  0x37   : > { %p4311_p8 = scmp.ne.s32.totalorder %s4309_s22, %s4310_s10  ;;  %p4317_p2 = scmp.lt.s32.totalorder %s4315_s19, %s4310_s10 }
  0x39   : > { %p4313_p10 = pnand %p4312_p9, %p4311_p8  ;;  %p4318_p4 = por %p4317_p2, %p4316_p12 }
  0x3b   : > { %p4314_p11 = pneg %p4313_p10 }
  0x3d   : > { %p4319_p5 = pnand %p4318_p4, %p4314_p11 }
  0x3f   : > { %4322 = shalt.err (!%p4319_p5)
}
  0x40   : > { %s7194_s3 = smov 8   ;;  %s7195_s4 = smov 128  }
  0x41   : > { %3898 = dma.hbm_to_vmem [thread:$0]  (!%p4616_p7), %s306_s29, 2048, %s308_s18, %s296_s21, %s7195_s4, %s7195_s4, %s7194_s3  }
  0x42   : > { %s317_s11 = sand.u32 1, %s4450_s27   ;;  %s4338_s2 = sshra.s32 %s328_s20, 4  ;;  %s4339_s2 = int_to_ptr.hbm [resolvable:$true] %s4338_s2 }
  0x43   : > { %s318_s13 = scalar_lea.sflag [#allocation6], %s317_s11  ;;  %s4340_s22 = scalar_lea.hbm %s4339_s2, 128 }
  0x44   : > { %p4341_p8 = scmp.ne.s32.totalorder %s4339_s2, %s4340_s22  ;;  %s4345_s17 = scalar_lea.hbm %s7133_s1, 256 }
  0x45   : > { %p4346_p11 = scmp.lt.s32.totalorder %s4339_s2, %s7133_s1  ;;  %p4347_p12 = scmp.lt.s32.totalorder %s4345_s17, %s4340_s22 }
  0x46   : > { %p4343_p5 = pnand %p4341_p8, %p4312_p9 }
  0x47   : > { %p4348_p2 = por %p4347_p12, %p4346_p11 }
  0x48   : > { %p4344_p10 = pneg %p4343_p5 }
  0x4a   : > { %p4349_p4 = pnand %p4348_p2, %p4344_p10 }
  0x4c   : > { %4352 = shalt.err (!%p4349_p4)
}
  0x4d   : > { %3901 = dma.hbm_to_vmem [thread:$0]  (!%p4616_p7), %s328_s20, 2048, %s330_s5, %s318_s13, %s7195_s4, %s7195_s4, %s7194_s3  }
  0x4e   : > { %341 = sbr.rel (%p4533_p3) target bundleno = 1509 (0x5e5), region = 48 }
  0x53   : > { %s4660_s18 = sand.u32 1, %s4442_s25  }
  0x54   : > { %s4663_s0 = sshll.u32 %s4660_s18, 7  ;;  %s344_s29 = scalar_lea.sflag [#allocation3], %s4660_s18 }
  0x55   : > { %s4667_s21 = scalar_lea.vmem [#allocation2], %s4663_s0 }
  0x56   : > { %4413 = dma.done.wait (%p4596_p13), %s344_s29, 2048  }
  0x57   : > { %4415 = vsyncadd (%p4596_p13), %s344_s29, 4294965248  ;;  %s353_s5 = sand.u32 1, %s4528_s8   ;;  %s4675_s23 = scalar_lea.vmem [#allocation5], %s4663_s0 }
  0x58   : > { %s354_s9 = scalar_lea.sflag [#allocation6], %s353_s5 }
  0x59   : > { %4417 = dma.done.wait (%p4596_p13), %s354_s9, 2048  }
  0x5a   : > { %4419 = vsyncadd (%p4596_p13), %s354_s9, 4294965248 }
  0x5b   : > { %4421 = dma.done.wait (%p49_p1), [#allocation6], 2048  }
  0x5c   : > { %4423 = vsyncadd (%p49_p1), [#allocation6], 4294965248 }
  0x5d   : > { %4425 = dma.done.wait (%p49_p1), [#allocation9], 8192  }
  0x5e   : > { %4427 = vsyncadd (%p49_p1), [#allocation9], 4294959104 }
  0x5f   : > { %4429 = dma.done.wait (%p49_p1), [#allocation12], 384  }
  0x60   : > { %4431 = vsyncadd (%p49_p1), [#allocation12], 4294966912  ;;  %v471_v0 = vld [vmem:[#allocation7 + $0x78] sm:$0xff]  ;;  %v470_v1 = vld [vmem:[#allocation7 + $0x70] sm:$0xff]  ;;  %v4461_v60 = vmov 128.0   ;;  %s6820_s15 = scalar_lea.vmem [#allocation14], %s4663_s0 }
  0x61   : > { %473 = vmatpush.msra.mxu0 %v471_v0  ;;  %3805 = vmatpush.msra.mxu1 %v471_v0  ;;  %v469_v2 = vld [vmem:[#allocation7 + $0x68] sm:$0xff]  ;;  %v468_v3 = vld [vmem:[#allocation7 + $0x60] sm:$0xff]  ;;  %v467_v4 = vld [vmem:[#allocation7 + $0x58] sm:$0xff]  ;;  %3962 = vrcp.f32 %v4461_v60  ;;  %s3804_s20 = sshll.u32 %s4528_s8, 7  ;;  %s3596_s13 = sshll.u32 %s6820_s15, 4  ;;  %s3597_s13 = int_to_ptr.vmem [resolvable:$true] %s3596_s13 }
  0x62   : > { %3806 = vmatpush.msra.mxu2 %v471_v0  ;;  %3807 = vmatpush.msra.mxu3 %v471_v0  ;;  %v466_v5 = vld [vmem:[#allocation7 + $0x50] sm:$0xff]  ;;  %v465_v6 = vld [vmem:[#allocation7 + $0x48] sm:$0xff]  ;;  %v464_v7 = vld [vmem:[#allocation7 + $0x40] sm:$0xff]  ;;  %s3595_s11 = scalar_lea.hbm %s7139_s7, %s3804_s20  ;;  %s3584_s8 = scalar_lea.sflag [#allocation4], %s4660_s18 }
  0x63   : > { %474 = vmatpush.msra.mxu0 %v470_v1  ;;  %3808 = vmatpush.msra.mxu1 %v470_v1  ;;  %v463_v8 = vld [vmem:[#allocation7 + $0x38] sm:$0xff]  ;;  %v462_v9 = vld [vmem:[#allocation7 + $0x30] sm:$0xff]  ;;  %v461_v10 = vld [vmem:[#allocation7 + $0x28] sm:$0xff]  ;;  %s3598_s2 = sshll.u32 %s3595_s11, 4  ;;  %s4388_s16 = scalar_lea.hbm %s7139_s7, 256  ;;  %s3599_s2 = int_to_ptr.hbm [resolvable:$true] %s3598_s2 }
  0x64   : > { %3809 = vmatpush.msra.mxu2 %v470_v1  ;;  %3810 = vmatpush.msra.mxu3 %v470_v1  ;;  %v460_v11 = vld [vmem:[#allocation7 + $0x20] sm:$0xff]  ;;  %v459_v12 = vld [vmem:[#allocation7 + $0x18] sm:$0xff]  ;;  %v458_v13 = vld [vmem:[#allocation7 + $0x10] sm:$0xff]  ;;  %s4382_s22 = sshra.s32 %s3599_s2, 4  ;;  %s4383_s22 = int_to_ptr.hbm [resolvable:$true] %s4382_s22 }
  0x65   : > { %475 = vmatpush.msra.mxu0 %v469_v2  ;;  %3811 = vmatpush.msra.mxu1 %v469_v2  ;;  %v457_v14 = vld [vmem:[#allocation7 + $0x8] sm:$0xff]  ;;  %v456_v15 = vld [vmem:[#allocation7] sm:$0xff]  ;;  %v440_v21 = vld [vmem:[%s4675_s23 + $0x10] sm:$0xff]  ;;  %s4384_s10 = scalar_lea.hbm %s4383_s22, 128  ;;  %p4389_p7 = scmp.lt.s32.totalorder %s4383_s22, %s7139_s7 }
  0x66   : > { %3812 = vmatpush.msra.mxu2 %v469_v2  ;;  %3813 = vmatpush.msra.mxu3 %v469_v2  ;;  %v438_v16 = vld [vmem:[%s4675_s23] sm:$0xff]  ;;  %v439_v19 = vld [vmem:[%s4675_s23 + $0x8] sm:$0xff]  ;;  %v444_v22 = vld [vmem:[%s4675_s23 + $0x30] sm:$0xff]  ;;  %p4385_p1 = scmp.ne.s32.totalorder %s4383_s22, %s4384_s10  ;;  %p4390_p9 = scmp.lt.s32.totalorder %s4388_s16, %s4384_s10 }
  0x67   : > { %476 = vmatpush.msra.mxu0 %v468_v3  ;;  %3814 = vmatpush.msra.mxu1 %v468_v3  ;;  %v442_v17 = vld [vmem:[%s4675_s23 + $0x20] sm:$0xff]  ;;  %v443_v20 = vld [vmem:[%s4675_s23 + $0x28] sm:$0xff]  ;;  %v441_v23 = vld [vmem:[%s4675_s23 + $0x18] sm:$0xff]  ;;  %v3963_v62 = vpop.eup %3962 }
  0x68   : > { %3815 = vmatpush.msra.mxu2 %v468_v3  ;;  %3816 = vmatpush.msra.mxu3 %v468_v3  ;;  %v446_v18 = vld [vmem:[%s4675_s23 + $0x40] sm:$0xff]  ;;  %v445_v24 = vld [vmem:[%s4675_s23 + $0x38] sm:$0xff]  ;;  %v447_v25 = vld [vmem:[%s4675_s23 + $0x48] sm:$0xff]  ;;  %v587_v63 = vmul.f32 128.0, %v3963_v62  ;;  %vm591_vm0 = vweird.f32 %v3963_v62  ;;  %p4386_p3 = pnand %p4385_p1, %p4600_p0  ;;  %p4391_p8 = por %p4390_p9, %p4389_p7 }
  0x69   : > { %477 = vmatpush.msra.mxu0 %v467_v4  ;;  %3817 = vmatpush.msra.mxu1 %v467_v4  ;;  %v448_v26 = vld [vmem:[%s4675_s23 + $0x50] sm:$0xff]  ;;  %v449_v27 = vld [vmem:[%s4675_s23 + $0x58] sm:$0xff]  ;;  %v4705_v28 = vld [vmem:[#allocation11] sm:$0xff] }
  0x6a   : > { %3818 = vmatpush.msra.mxu2 %v467_v4  ;;  %3819 = vmatpush.msra.mxu3 %v467_v4  ;;  %v4708_v29 = vperm.slane %v4705_v28, 0  ;;  %v450_v30 = vld [vmem:[%s4675_s23 + $0x60] sm:$0xff]  ;;  %v451_v39 = vld [vmem:[%s4675_s23 + $0x68] sm:$0xff]  ;;  %v424_v49 = vld [vmem:[%s4667_s21 + $0x10] sm:$0xff]  ;;  %v588_v1 = vsub.f32 1.0, %v587_v63  ;;  %p4387_p13 = pneg %p4386_p3 }
  0x6b   : > { %478 = vmatpush.msra.mxu0 %v466_v5  ;;  %3820 = vmatpush.msra.mxu1 %v466_v5  ;;  %v426_v33 = vld [vmem:[%s4667_s21 + $0x20] sm:$0xff]  ;;  %v427_v42 = vld [vmem:[%s4667_s21 + $0x28] sm:$0xff]  ;;  %v425_v53 = vld [vmem:[%s4667_s21 + $0x18] sm:$0xff] }
  0x6c   : > { %3821 = vmatpush.msra.mxu2 %v466_v5  ;;  %3822 = vmatpush.msra.mxu3 %v466_v5  ;;  %v422_v34 = vld [vmem:[%s4667_s21] sm:$0xff]  ;;  %v423_v43 = vld [vmem:[%s4667_s21 + $0x8] sm:$0xff]  ;;  %v428_v58 = vld [vmem:[%s4667_s21 + $0x30] sm:$0xff]  ;;  %v589_v2 = vmul.f32 %v3963_v62, %v588_v1  ;;  %p4392_p5 = pnand %p4391_p8, %p4387_p13 }
  0x6d   : > { %479 = vmatpush.msra.mxu0 %v465_v6  ;;  %3823 = vmatpush.msra.mxu1 %v465_v6  ;;  %v452_v61 = vld [vmem:[%s4675_s23 + $0x70] sm:$0xff]  ;;  %v453_v0 = vld [vmem:[%s4675_s23 + $0x78] sm:$0xff] }
  0x6e   : > { %3824 = vmatpush.msra.mxu2 %v465_v6  ;;  %3825 = vmatpush.msra.mxu3 %v465_v6  ;;  %v590_v3 = vadd.f32 %v3963_v62, %v589_v2  ;;  %v1218_v1 = vld [vmem:[#allocation8 + $0xf8] sm:$0xff]  ;;  %v1216_v2 = vld [vmem:[#allocation8 + $0xe8] sm:$0xff] }
  0x6f   : > { %480 = vmatpush.msra.mxu0 %v464_v7  ;;  %3826 = vmatpush.msra.mxu1 %v464_v7 }
  0x70   : > { %3827 = vmatpush.msra.mxu2 %v464_v7  ;;  %3828 = vmatpush.msra.mxu3 %v464_v7  ;;  %v4737_v4 = vsel %vm591_vm0, %v3963_v62, %v590_v3  ;;  %v435_v62 = vld [vmem:[%s4667_s21 + $0x68] sm:$0xff]  ;;  %v1213_v3 = vld [vmem:[#allocation8 + $0xd0] sm:$0xff] }
  0x71   : > { %481 = vmatpush.msra.mxu0 %v463_v8  ;;  %3829 = vmatpush.msra.mxu1 %v463_v8  ;;  %7196 = vst [vmem:[#allocation21_spill] sm:$0xff] %v4737_v4 }
  0x72   : > { %3830 = vmatpush.msra.mxu2 %v463_v8  ;;  %3831 = vmatpush.msra.mxu3 %v463_v8 }
  0x73   : > { %482 = vmatpush.msra.mxu0 %v462_v9  ;;  %3832 = vmatpush.msra.mxu1 %v462_v9 }
  0x74   : > { %3833 = vmatpush.msra.mxu2 %v462_v9  ;;  %3834 = vmatpush.msra.mxu3 %v462_v9 }
  0x75   : > { %483 = vmatpush.msra.mxu0 %v461_v10  ;;  %3835 = vmatpush.msra.mxu1 %v461_v10 }
  0x76   : > { %3836 = vmatpush.msra.mxu2 %v461_v10  ;;  %3837 = vmatpush.msra.mxu3 %v461_v10 }
  0x77   : > { %484 = vmatpush.msra.mxu0 %v460_v11  ;;  %3838 = vmatpush.msra.mxu1 %v460_v11 }
  0x78   : > { %3839 = vmatpush.msra.mxu2 %v460_v11  ;;  %3840 = vmatpush.msra.mxu3 %v460_v11 }
  0x79   : > { %485 = vmatpush.msra.mxu0 %v459_v12  ;;  %3841 = vmatpush.msra.mxu1 %v459_v12 }
  0x7a   : > { %3842 = vmatpush.msra.mxu2 %v459_v12  ;;  %3843 = vmatpush.msra.mxu3 %v459_v12 }
  0x7b   : > { %486 = vmatpush.msra.mxu0 %v458_v13  ;;  %3844 = vmatpush.msra.mxu1 %v458_v13 }
  0x7c   : > { %3845 = vmatpush.msra.mxu2 %v458_v13  ;;  %3846 = vmatpush.msra.mxu3 %v458_v13  ;;  %v429_v13 = vld [vmem:[%s4667_s21 + $0x38] sm:$0xff] }
  0x7d   : > { %487 = vmatpush.msra.mxu0 %v457_v14  ;;  %3847 = vmatpush.msra.mxu1 %v457_v14 }
  0x7e   : > { %3848 = vmatpush.msra.mxu2 %v457_v14  ;;  %3849 = vmatpush.msra.mxu3 %v457_v14 }
  0x7f   : > { %488 = vmatpush.msra.mxu0 %v456_v15  ;;  %3850 = vmatpush.msra.mxu1 %v456_v15 }
  0x80   : > { %489 = vmatmul.f32.vlgmr.msra.gmra.mxu0 %v438_v16  ;;  %501 = vmatmul.f32.vlgmr.msra.gmra.mxu1 %v442_v17 }
  0x81   : > { %3851 = vmatpush.msra.mxu2 %v456_v15  ;;  %3852 = vmatpush.msra.mxu3 %v456_v15 }
  0x82   : > { %513 = vmatmul.f32.vlgmr.msra.gmra.mxu2 %v446_v18  ;;  %525 = vmatmul.f32.vlgmr.msra.gmra.mxu3 %v450_v30 }
  0x83   : > { %1289 = vmatpush.msrb.mxu2 %v1218_v1 }
  0x85   : > { %1290 = vmatpush.msrb.mxu2 %v1216_v2  ;;  %v1187_v2 = vld [vmem:[#allocation8] sm:$0xff] }
  0x88   : > { %492 = vmatmul.f32.gmra.mxu0 %v439_v19  ;;  %504 = vmatmul.f32.gmra.mxu1 %v443_v20 }
  0x8a   : > { %516 = vmatmul.f32.gmra.mxu2 %v447_v25  ;;  %528 = vmatmul.f32.gmra.mxu3 %v451_v39 }
  0x90   : > { %495 = vmatmul.f32.gmra.mxu0 %v440_v21  ;;  %507 = vmatmul.f32.gmra.mxu1 %v444_v22  ;;  %v430_v22 = vld [vmem:[%s4667_s21 + $0x40] sm:$0xff] }
  0x92   : > { %519 = vmatmul.f32.gmra.mxu2 %v448_v26  ;;  %531 = vmatmul.f32.gmra.mxu3 %v452_v61 }
  0x98   : > { %498 = vmatmul.f32.gmra.mxu0 %v441_v23  ;;  %510 = vmatmul.f32.gmra.mxu1 %v445_v24 }
  0x9a   : > { %522 = vmatmul.f32.gmra.mxu2 %v449_v27  ;;  %534 = vmatmul.f32.gmra.mxu3 %v453_v0  ;;  %v1217_v0 = vld [vmem:[#allocation8 + $0xf0] sm:$0xff] }
  0x9b   : > { %1224 = vmatpush.msrb.mxu1 %v1217_v0 }
  0xfd   : > { %v490_v31 = vpop.f32.mrf.mxu0  ;;  %v502_v32 = vpop.f32.mrf.mxu1 }
  0xfe   : > { %v491_v35 = vadd.f32 %v490_v31, %v4708_v29  ;;  %v503_v36 = vadd.f32 %v502_v32, %v4708_v29 }
 0x100   : > { %v4715_v37 = vadd.f32 %v503_v36, %v426_v33  ;;  %v538_v38 = vadd.f32 %v491_v35, %v422_v34  ;;  %v431_v33 = vld [vmem:[%s4667_s21 + $0x48] sm:$0xff] }
 0x102   : > { %562 = vadd.xlane.f32.xlu2 %v4715_v37  ;;  %554 = vadd.xlane.f32.xlu0 %v538_v38 }
 0x105   : > { %v493_v40 = vpop.f32.mrf.mxu0  ;;  %v505_v41 = vpop.f32.mrf.mxu1 }
 0x106   : > { %v494_v44 = vadd.f32 %v493_v40, %v4708_v29  ;;  %v506_v45 = vadd.f32 %v505_v41, %v4708_v29  ;;  %v514_v5 = vpop.f32.mrf.mxu2 }
 0x107   : > { %v515_v19 = vadd.f32 %v514_v5, %v4708_v29  ;;  %v1214_v5 = vld [vmem:[#allocation8 + $0xd8] sm:$0xff] }
 0x108   : > { %v4723_v46 = vadd.f32 %v506_v45, %v427_v42  ;;  %v539_v47 = vadd.f32 %v494_v44, %v423_v43  ;;  %v432_v45 = vld [vmem:[%s4667_s21 + $0x50] sm:$0xff]  ;;  %1291 = vmatpush.msrb.mxu2 %v1214_v5 }
 0x109   : > { %v4759_v25 = vadd.f32 %v515_v19, %v430_v22  ;;  %v1203_v19 = vld [vmem:[#allocation8 + $0x80] sm:$0xff]  ;;  %v1202_v22 = vld [vmem:[#allocation8 + $0x78] sm:$0xff] }
 0x10a   : > { %564 = vadd.xlane.f32.xlu2 %v4723_v46  ;;  %556 = vadd.xlane.f32.xlu0 %v539_v47 }
 0x10d   : > { %v496_v48 = vpop.f32.mrf.mxu0  ;;  %v508_v55 = vpop.f32.mrf.mxu1 }
 0x10e   : > { %v497_v50 = vadd.f32 %v496_v48, %v4708_v29  ;;  %v509_v57 = vadd.f32 %v508_v55, %v4708_v29  ;;  %v517_v15 = vpop.f32.mrf.mxu2  ;;  %v433_v48 = vld [vmem:[%s4667_s21 + $0x58] sm:$0xff] }
 0x10f   : > { %v518_v31 = vadd.f32 %v517_v15, %v4708_v29 }
 0x110   : > { %v540_v51 = vadd.f32 %v497_v50, %v424_v49  ;;  %v4732_v59 = vadd.f32 %v509_v57, %v428_v58  ;;  %v526_v50 = vpop.f32.mrf.mxu3 }
 0x111   : > { %v4773_v39 = vadd.f32 %v518_v31, %v431_v33  ;;  %v527_v55 = vadd.f32 %v526_v50, %v4708_v29  ;;  %v1192_v50 = vld [vmem:[#allocation8 + $0x28] sm:$0xff] }
 0x112   : > { %558 = vadd.xlane.f32.xlu1 %v540_v51 }
 0x115   : > { %v499_v52 = vpop.f32.mrf.mxu0  ;;  %v511_v9 = vpop.f32.mrf.mxu1 }
 0x116   : > { %v500_v54 = vadd.f32 %v499_v52, %v4708_v29  ;;  %v512_v11 = vadd.f32 %v511_v9, %v4708_v29  ;;  %v520_v26 = vpop.f32.mrf.mxu2  ;;  %v1209_v9 = vld [vmem:[#allocation8 + $0xb0] sm:$0xff] }
 0x117   : > { %v521_v44 = vadd.f32 %v520_v26, %v4708_v29  ;;  %v1200_v26 = vld [vmem:[#allocation8 + $0x68] sm:$0xff] }
 0x118   : > { %v541_v56 = vadd.f32 %v500_v54, %v425_v53  ;;  %v4749_v17 = vadd.f32 %v512_v11, %v429_v13  ;;  %v529_v58 = vpop.f32.mrf.mxu3  ;;  %v1207_v11 = vld [vmem:[#allocation8 + $0xa0] sm:$0xff]  ;;  %v1205_v13 = vld [vmem:[#allocation8 + $0x90] sm:$0xff] }
 0x119   : > { %v530_v61 = vadd.f32 %v529_v58, %v4708_v29 }
 0x11a   : > { %560 = vadd.xlane.f32.xlu1 %v541_v56 }
 0x11b   : > { %v4809_v63 = vadd.f32 %v530_v61, %v435_v62 }
 0x11e   : > { %v523_v42 = vpop.f32.mrf.mxu2 }
 0x122   : > { %566 = vadd.xlane.f32.xlu1 %v4732_v59 }
 0x175   : > { %v555_v6 = vpop.xlane.xlu0 %554  ;;  %v563_v20 = vpop.xlane.xlu2 %562 }
 0x176   : > { %v593_v7 = vmul.f32 %v4737_v4, %v555_v6  ;;  %v597_v30 = vmul.f32 %v4737_v4, %v563_v20  ;;  %v1211_v6 = vld [vmem:[#allocation8 + $0xc0] sm:$0xff]  ;;  %v1204_v20 = vld [vmem:[#allocation8 + $0x88] sm:$0xff] }
 0x178   : > { %v4740_v8 = vsub.f32 %v538_v38, %v593_v7  ;;  %v4769_v35 = vsub.f32 %v4715_v37, %v597_v30  ;;  %v524_v37 = vadd.f32 %v523_v42, %v4708_v29  ;;  %v1212_v7 = vld [vmem:[#allocation8 + $0xc8] sm:$0xff]  ;;  %v1198_v30 = vld [vmem:[#allocation8 + $0x58] sm:$0xff] }
 0x179   : > { %1292 = vmatpush.msrb.mxu2 %v1212_v7 }
 0x17a   : > { %v625_v10 = vmul.f32 %v4740_v8, %v4740_v8  ;;  %v629_v43 = vmul.f32 %v4769_v35, %v4769_v35  ;;  %v4790_v52 = vadd.f32 %v524_v37, %v433_v48  ;;  %v1194_v37 = vld [vmem:[#allocation8 + $0x38] sm:$0xff] }
 0x17c   : > { %641 = vadd.xlane.f32.xlu0 %v625_v10  ;;  %v1210_v10 = vld [vmem:[#allocation8 + $0xb8] sm:$0xff] }
 0x17d   : > { %v557_v12 = vpop.xlane.xlu0 %556  ;;  %v565_v36 = vpop.xlane.xlu2 %564  ;;  %1293 = vmatpush.msrb.mxu2 %v1210_v10 }
 0x17e   : > { %v594_v14 = vmul.f32 %v4737_v4, %v557_v12  ;;  %v598_v40 = vmul.f32 %v4737_v4, %v565_v36  ;;  %v1208_v12 = vld [vmem:[#allocation8 + $0xa8] sm:$0xff] }
 0x17f   : > { %1294 = vmatpush.msrb.mxu2 %v1208_v12 }
 0x180   : > { %v4747_v16 = vsub.f32 %v539_v47, %v594_v14  ;;  %v4785_v47 = vsub.f32 %v4723_v46, %v598_v40  ;;  %v434_v46 = vld [vmem:[%s4667_s21 + $0x60] sm:$0xff]  ;;  %v1206_v14 = vld [vmem:[#allocation8 + $0x98] sm:$0xff] }
 0x181   : > { %v4802_v57 = vadd.f32 %v527_v55, %v434_v46  ;;  %1295 = vmatpush.msrb.mxu2 %v1206_v14  ;;  %v1195_v40 = vld [vmem:[#allocation8 + $0x40] sm:$0xff]  ;;  %v1189_v55 = vld [vmem:[#allocation8 + $0x10] sm:$0xff]  ;;  %v1190_v46 = vld [vmem:[#allocation8 + $0x18] sm:$0xff] }
 0x182   : > { %v626_v18 = vmul.f32 %v4747_v16, %v4747_v16  ;;  %v630_v54 = vmul.f32 %v4785_v47, %v4785_v47 }
 0x183   : > { %1296 = vmatpush.msrb.mxu2 %v1204_v20 }
 0x184   : > { %568 = vadd.xlane.f32.xlu0 %v4749_v17  ;;  %643 = vadd.xlane.f32.xlu2 %v626_v18 }
 0x185   : > { %v559_v21 = vpop.xlane.xlu1 %558  ;;  %1297 = vmatpush.msrb.mxu2 %v1202_v22 }
 0x186   : > { %v595_v23 = vmul.f32 %v4737_v4, %v559_v21  ;;  %v1201_v21 = vld [vmem:[#allocation8 + $0x70] sm:$0xff] }
 0x187   : > { %1298 = vmatpush.msrb.mxu2 %v1200_v26 }
 0x188   : > { %v4757_v24 = vsub.f32 %v540_v51, %v595_v23  ;;  %v4788_v51 = vadd.f32 %v521_v44, %v432_v45  ;;  %v1199_v23 = vld [vmem:[#allocation8 + $0x60] sm:$0xff]  ;;  %v1193_v44 = vld [vmem:[#allocation8 + $0x30] sm:$0xff] }
 0x189   : > { %1299 = vmatpush.msrb.mxu2 %v1198_v30 }
 0x18a   : > { %v627_v27 = vmul.f32 %v4757_v24, %v4757_v24 }
 0x18c   : > { %645 = vadd.xlane.f32.xlu1 %v627_v27  ;;  %570 = vadd.xlane.f32.xlu2 %v4759_v25  ;;  %v1197_v27 = vld [vmem:[#allocation8 + $0x50] sm:$0xff] }
 0x18d   : > { %v561_v32 = vpop.xlane.xlu1 %560 }
 0x18e   : > { %v596_v34 = vmul.f32 %v4737_v4, %v561_v32 }
 0x190   : > { %v4771_v38 = vsub.f32 %v541_v56, %v596_v34 }
 0x192   : > { %v628_v41 = vmul.f32 %v4771_v38, %v4771_v38 }
 0x194   : > { %572 = vadd.xlane.f32.xlu1 %v4773_v39  ;;  %647 = vadd.xlane.f32.xlu0 %v628_v41  ;;  %v1196_v41 = vld [vmem:[#allocation8 + $0x48] sm:$0xff] }
 0x195   : > { %649 = vadd.xlane.f32.xlu2 %v629_v43  ;;  %v567_v49 = vpop.xlane.xlu1 %566  ;;  %1300 = vmatpush.msrb.mxu2 %v1196_v41  ;;  %v532_v43 = vpop.f32.mrf.mxu3 }
 0x196   : > { %v599_v53 = vmul.f32 %v4737_v4, %v567_v49  ;;  %v1191_v49 = vld [vmem:[#allocation8 + $0x20] sm:$0xff] }
 0x197   : > { %1301 = vmatpush.msrb.mxu2 %v1194_v37 }
 0x198   : > { %v4800_v56 = vsub.f32 %v4732_v59, %v599_v53  ;;  %v1215_v59 = vld [vmem:[#allocation8 + $0xe0] sm:$0xff] }
 0x199   : > { %1225 = vmatpush.msrb.mxu1 %v1215_v59  ;;  %1302 = vmatpush.msrb.mxu2 %v1192_v50  ;;  %v436_v59 = vld [vmem:[%s4667_s21 + $0x70] sm:$0xff] }
 0x19a   : > { %v631_v60 = vmul.f32 %v4800_v56, %v4800_v56 }
 0x19b   : > { %1226 = vmatpush.msrb.mxu1 %v1213_v3  ;;  %1303 = vmatpush.msrb.mxu2 %v1190_v46  ;;  %v1188_v3 = vld [vmem:[#allocation8 + $0x8] sm:$0xff]  ;;  %v4874_v46 = vperm.slane %v4705_v28, 1 }
 0x19c   : > { %651 = vadd.xlane.f32.xlu1 %v630_v54  ;;  %574 = vadd.xlane.f32.xlu0 %v4788_v51 }
 0x19d   : > { %576 = vadd.xlane.f32.xlu2 %v4790_v52  ;;  %1227 = vmatpush.msrb.mxu1 %v1211_v6 }
 0x19e   : > { %1304 = vmatpush.msrb.mxu2 %v1188_v3 }
 0x19f   : > { %1228 = vmatpush.msrb.mxu1 %v1209_v9 }
 0x1a1   : > { %1229 = vmatpush.msrb.mxu1 %v1207_v11 }
 0x1a3   : > { %1230 = vmatpush.msrb.mxu1 %v1205_v13  ;;  %v535_v13 = vpop.f32.mrf.mxu3 }
 0x1a4   : > { %578 = vadd.xlane.f32.xlu1 %v4802_v57  ;;  %653 = vadd.xlane.f32.xlu0 %v631_v60 }
 0x1a5   : > { %1231 = vmatpush.msrb.mxu1 %v1203_v19 }
 0x1a7   : > { %1232 = vmatpush.msrb.mxu1 %v1201_v21 }
 0x1a9   : > { %1233 = vmatpush.msrb.mxu1 %v1199_v23  ;;  %v536_v23 = vadd.f32 %v535_v13, %v4708_v29  ;;  %v4895_v13 = vperm.slane %v4705_v28, 2 }
 0x1ab   : > { %1234 = vmatpush.msrb.mxu1 %v1197_v27 }
 0x1ac   : > { %580 = vadd.xlane.f32.xlu0 %v4809_v63 }
 0x1ad   : > { %1235 = vmatpush.msrb.mxu1 %v1195_v40 }
 0x1af   : > { %1236 = vmatpush.msrb.mxu1 %v1193_v44 }
 0x1b1   : > { %1237 = vmatpush.msrb.mxu1 %v1191_v49 }
 0x1b3   : > { %1238 = vmatpush.msrb.mxu1 %v1189_v55 }
 0x1b5   : > { %1239 = vmatpush.msrb.mxu1 %v1187_v2 }
 0x1ef   : > { %v642_v15 = vpop.xlane.xlu0 %641 }
 0x1f0   : > { %v4812_v18 = vmul.f32 0.007874016, %v642_v15 }
 0x1f2   : > { %3964 = vrsqrt.f32 %v4812_v18  ;;  %vm696_vm1 = vcmp.eq.f32.partialorder %v4812_v18, inf  ;;  %v699_v12 = vand.u32 2147483648, %v4812_v18  ;;  %vm698_vm2 = vcmp.eq.f32.partialorder %v4812_v18, 0.0 }
 0x1f7   : > { %v644_v31 = vpop.xlane.xlu2 %643  ;;  %v569_v32 = vpop.xlane.xlu0 %568 }
 0x1f8   : > { %v3965_v33 = vpop.eup %3964  ;;  %v4815_v34 = vmul.f32 0.007874016, %v644_v31  ;;  %v600_v36 = vmul.f32 %v4737_v4, %v569_v32  ;;  %v437_v32 = vld [vmem:[%s4667_s21 + $0x78] sm:$0xff] }
 0x1f9   : > { %v690_v42 = vmul.f32 %v3965_v33, %v4812_v18 }
 0x1fa   : > { %3966 = vrsqrt.f32 %v4815_v34  ;;  %v4821_v48 = vsub.f32 %v4749_v17, %v600_v36  ;;  %v533_v17 = vadd.f32 %v532_v43, %v4708_v29  ;;  %v4862_v43 = vadd.f32 %v536_v23, %v437_v32 }
 0x1fb   : > { %v691_v45 = vmul.f32 %v3965_v33, %v690_v42  ;;  %vm708_vm3 = vcmp.eq.f32.partialorder %v4815_v34, inf  ;;  %v711_v44 = vand.u32 2147483648, %v4815_v34  ;;  %vm710_vm4 = vcmp.eq.f32.partialorder %v4815_v34, 0.0 }
 0x1fc   : > { %v632_v54 = vmul.f32 %v4821_v48, %v4821_v48  ;;  %v4836_v11 = vadd.f32 %v533_v17, %v436_v59 }
 0x1fd   : > { %v692_v53 = vmul.f32 0.5, %v691_v45 }
 0x1fe   : > { %655 = vadd.xlane.f32.xlu2 %v632_v54 }
 0x1ff   : > { %v693_v58 = vsub.f32 1.5, %v692_v53  ;;  %v646_v60 = vpop.xlane.xlu1 %645  ;;  %v571_v61 = vpop.xlane.xlu2 %570 }
 0x200   : > { %v3967_v62 = vpop.eup %3966  ;;  %v4826_v0 = vmul.f32 0.007874016, %v646_v60  ;;  %v601_v1 = vmul.f32 %v4737_v4, %v571_v61 }
 0x201   : > { %v694_v5 = vmul.f32 %v3965_v33, %v693_v58  ;;  %v702_v6 = vmul.f32 %v3967_v62, %v4815_v34 }
 0x202   : > { %3968 = vrsqrt.f32 %v4826_v0  ;;  %v4834_v10 = vsub.f32 %v4759_v25, %v601_v1  ;;  %vm720_vm5 = vcmp.eq.f32.partialorder %v4826_v0, inf  ;;  %vm722_vm6 = vcmp.eq.f32.partialorder %v4826_v0, 0.0 }
 0x203   : > { %v695_v7 = vmul.f32 %v694_v5, %v4812_v18  ;;  %v703_v9 = vmul.f32 %v3967_v62, %v702_v6  ;;  %v723_v5 = vand.u32 2147483648, %v4826_v0 }
 0x204   : > { %v633_v19 = vmul.f32 %v4834_v10, %v4834_v10 }
 0x205   : > { %v697_v14 = vsel %vm696_vm1, %v4812_v18, %v695_v7  ;;  %v704_v15 = vmul.f32 0.5, %v703_v9 }
 0x206   : > { %v700_v20 = vsel %vm698_vm2, %v699_v12, %v697_v14  ;;  %657 = vadd.xlane.f32.xlu1 %v633_v19  ;;  %582 = vadd.xlane.f32.xlu2 %v4836_v11 }
 0x207   : > { %v705_v21 = vsub.f32 1.5, %v704_v15  ;;  %v573_v25 = vpop.xlane.xlu1 %572  ;;  %v648_v22 = vpop.xlane.xlu0 %647  ;;  %v4846_v26 = vadd.f32 1e-06, %v700_v20 }
 0x208   : > { %v3969_v27 = vpop.eup %3968  ;;  %v602_v30 = vmul.f32 %v4737_v4, %v573_v25  ;;  %v650_v31 = vpop.xlane.xlu2 %649  ;;  %v4849_v18 = vmul.f32 0.007874016, %v648_v22 }
 0x209   : > { %v706_v33 = vmul.f32 %v3967_v62, %v705_v21  ;;  %v714_v36 = vmul.f32 %v3969_v27, %v4826_v0  ;;  %v4853_v40 = vmul.f32 0.007874016, %v650_v31  ;;  %3970 = vrcp.f32 %v4846_v26 }
 0x20a   : > { %v4857_v41 = vsub.f32 %v4773_v39, %v602_v30  ;;  %3972 = vrsqrt.f32 %v4849_v18  ;;  %vm732_vm7 = vcmp.eq.f32.partialorder %v4849_v18, inf  ;;  %vm734_vm9 = vcmp.eq.f32.partialorder %v4849_v18, 0.0 }
 0x20b   : > { %v707_v29 = vmul.f32 %v706_v33, %v4815_v34  ;;  %v715_v42 = vmul.f32 %v3969_v27, %v714_v36  ;;  %3974 = vrsqrt.f32 %v4853_v40  ;;  %vm744_vm8 = vcmp.eq.f32.partialorder %v4853_v40, inf }
 0x20c   : > { %v634_v37 = vmul.f32 %v4857_v41, %v4857_v41  ;;  %v747_v20 = vand.u32 2147483648, %v4853_v40  ;;  %v906_v22 = vand.u32 2147483647, %v4846_v26  ;;  %v908_v32 = vand.u32 2147483648, %v4846_v26 }
 0x20d   : > { %v709_v45 = vsel %vm708_vm3, %v4815_v34, %v707_v29  ;;  %v716_v39 = vmul.f32 0.5, %v715_v42  ;;  %vm746_vm11 = vcmp.eq.f32.partialorder %v4853_v40, 0.0  ;;  %vm902_vm12 = vweird.f32 %v4846_v26 }
 0x20e   : > { %659 = vadd.xlane.f32.xlu0 %v634_v37  ;;  %v712_v49 = vsel %vm710_vm4, %v711_v44, %v709_v45  ;;  %584 = vadd.xlane.f32.xlu1 %v4862_v43  ;;  %v735_v45 = vand.u32 2147483648, %v4849_v18  ;;  %vm907_vm13 = vcmp.eq.f32.partialorder %v906_v22, 8.507059e+37 }
 0x20f   : > { %v4870_v50 = vpop.eup %3970  ;;  %v717_v53 = vsub.f32 1.5, %v716_v39  ;;  %v652_v54 = vpop.xlane.xlu1 %651  ;;  %v4881_v62 = vadd.f32 1e-06, %v712_v49 }
 0x210   : > { %v575_v55 = vpop.xlane.xlu0 %574  ;;  %v3973_v58 = vpop.eup %3972  ;;  %v4876_v60 = vmul.f32 0.007874016, %v652_v54  ;;  %v898_v34 = vmul.f32 %v4870_v50, %v4846_v26  ;;  %vm903_vm10 = vweird.f32 %v4870_v50 }
 0x211   : > { %v577_v61 = vpop.xlane.xlu2 %576  ;;  %v603_v17 = vmul.f32 %v4737_v4, %v575_v55  ;;  %v3975_v1 = vpop.eup %3974  ;;  %v718_v59 = vmul.f32 %v3969_v27, %v717_v53  ;;  %v726_v2 = vmul.f32 %v3973_v58, %v4849_v18  ;;  %vm904_vm14 = vmor %vm902_vm12, %vm903_vm10  ;;  %vm917_vm0 = vweird.f32 %v4881_v62 }
 0x212   : > { %v604_v3 = vmul.f32 %v4737_v4, %v577_v61  ;;  %v738_v6 = vmul.f32 %v3975_v1, %v4853_v40  ;;  %3976 = vrsqrt.f32 %v4876_v60  ;;  %v899_v19 = vsub.f32 1.0, %v898_v34 }
 0x213   : > { %v719_v7 = vmul.f32 %v718_v59, %v4826_v0  ;;  %v727_v9 = vmul.f32 %v3973_v58, %v726_v2  ;;  %v4899_v15 = vsub.f32 %v4788_v51, %v603_v17  ;;  %3978 = vrcp.f32 %v4881_v62 }
 0x214   : > { %v4892_v12 = vsub.f32 %v4790_v52, %v604_v3  ;;  %v739_v14 = vmul.f32 %v3975_v1, %v738_v6  ;;  %v900_v51 = vmul.f32 %v4870_v50, %v899_v19  ;;  %v921_v6 = vand.u32 2147483647, %v4881_v62 }
 0x215   : > { %v728_v21 = vmul.f32 0.5, %v727_v9  ;;  %v635_v28 = vmul.f32 %v4899_v15, %v4899_v15  ;;  %v721_v23 = vsel %vm720_vm5, %v4826_v0, %v719_v7  ;;  %v923_v19 = vand.u32 2147483648, %v4881_v62 }
 0x216   : > { %v636_v52 = vmul.f32 %v4892_v12, %v4892_v12  ;;  %v740_v25 = vmul.f32 0.5, %v739_v14  ;;  %v901_v44 = vadd.f32 %v4870_v50, %v900_v51  ;;  %v724_v17 = vsel %vm722_vm6, %v723_v5, %v721_v23 }
 0x217   : > { %v729_v27 = vsub.f32 1.5, %v728_v21  ;;  %v579_v30 = vpop.xlane.xlu1 %578  ;;  %661 = vadd.xlane.f32.xlu2 %v635_v28  ;;  %v4946_v9 = vadd.f32 1e-06, %v724_v17  ;;  %vm922_vm2 = vcmp.eq.f32.partialorder %v921_v6, 8.507059e+37  ;;  %vm756_vm3 = vcmp.eq.f32.partialorder %v4876_v60, inf }
 0x218   : > { %663 = vadd.xlane.f32.xlu0 %v636_v52  ;;  %v654_v31 = vpop.xlane.xlu0 %653  ;;  %v3977_v33 = vpop.eup %3976  ;;  %v741_v36 = vsub.f32 1.5, %v740_v25  ;;  %v605_v29 = vmul.f32 %v4737_v4, %v579_v30  ;;  %vm758_vm4 = vcmp.eq.f32.partialorder %v4876_v60, 0.0 }
 0x219   : > { %v4918_v42 = vmul.f32 0.007874016, %v654_v31  ;;  %v730_v37 = vmul.f32 %v3973_v58, %v729_v27  ;;  %v750_v39 = vmul.f32 %v3977_v33, %v4876_v60  ;;  %v3979_v49 = vpop.eup %3978  ;;  %v909_v58 = vor.u32 1.1754944e-38, %v908_v32 }
 0x21a   : > { %v742_v53 = vmul.f32 %v3975_v1, %v741_v36  ;;  %v4925_v54 = vsub.f32 %v4802_v57, %v605_v29  ;;  %v905_v57 = vsel %vm904_vm14, %v4870_v50, %v901_v44  ;;  %v913_v1 = vmul.f32 %v3979_v49, %v4881_v62 }
 0x21b   : > { %3980 = vrsqrt.f32 %v4918_v42  ;;  %v731_v55 = vmul.f32 %v730_v37, %v4849_v18  ;;  %v751_v61 = vmul.f32 %v3977_v33, %v750_v39  ;;  %v910_v3 = vsel %vm907_vm13, %v909_v58, %v905_v57 }
 0x21c   : > { %v743_v26 = vmul.f32 %v742_v53, %v4853_v40  ;;  %v637_v34 = vmul.f32 %v4925_v54, %v4925_v54  ;;  %v1137_v5 = vmul.f32 %v910_v3, %v4740_v8  ;;  %v914_v7 = vsub.f32 1.0, %v913_v1 }
 0x21d   : > { %v733_v59 = vsel %vm732_vm7, %v4849_v18, %v731_v55  ;;  %v752_v2 = vmul.f32 0.5, %v751_v61  ;;  %vm918_vm15 = vweird.f32 %v3979_v49  ;;  %3982 = vrcp.f32 %v4946_v9 }
 0x21e   : > { %v745_v0 = vsel %vm744_vm8, %v4853_v40, %v743_v26  ;;  %665 = vadd.xlane.f32.xlu1 %v637_v34  ;;  %v736_v21 = vsel %vm734_vm9, %v735_v45, %v733_v59  ;;  %v1154_v28 = vmul.f32 %v4874_v46, %v1137_v5  ;;  %v915_v51 = vmul.f32 %v3979_v49, %v914_v7  ;;  %vm919_vm1 = vmor %vm917_vm0, %vm918_vm15 }
 0x21f   : > { %v753_v50 = vsub.f32 1.5, %v752_v2  ;;  %v748_v23 = vsel %vm746_vm11, %v747_v20, %v745_v0  ;;  %v4966_v36 = vadd.f32 1e-06, %v736_v21  ;;  %v938_v17 = vand.u32 2147483648, %v4946_v9 }
 0x220   : > { %v581_v14 = vpop.xlane.xlu0 %580  ;;  %v4961_v18 = vadd.f32 %v4895_v13, %v1154_v28  ;;  %v916_v30 = vadd.f32 %v3979_v49, %v915_v51  ;;  %v4972_v20 = vadd.f32 1e-06, %v748_v23  ;;  %vm768_vm5 = vcmp.eq.f32.partialorder %v4918_v42, inf }
 0x221   : > { %v3981_v52 = vpop.eup %3980  ;;  %v606_v25 = vmul.f32 %v4737_v4, %v581_v14  ;;  %v754_v8 = vmul.f32 %v3977_v33, %v753_v50  ;;  %v924_v33 = vor.u32 1.1754944e-38, %v923_v19  ;;  %3984 = vrcp.f32 %v4966_v36 }
 0x222   : > { %v762_v22 = vmul.f32 %v3981_v52, %v4918_v42  ;;  %7197 = vst [vmem:[#allocation22_spill] sm:$0xff] %v4961_v18  ;;  %1240 = vmatmul.f32.vlgmr.msrb.gmra.mxu1 %v4961_v18  ;;  %1305 = vmatmul.f32.vlgmr.msrb.gmra.mxu2 %v4961_v18  ;;  %v920_v40 = vsel %vm919_vm1, %v3979_v49, %v916_v30  ;;  %3986 = vrcp.f32 %v4972_v20  ;;  %v759_v49 = vand.u32 2147483648, %v4876_v60  ;;  %v2788_v18 = vld [vmem:[#allocation10 + $0xd0] sm:$0xff] }
 0x223   : > { %v4958_v27 = vsub.f32 %v4809_v63, %v606_v25  ;;  %v755_v31 = vmul.f32 %v754_v8, %v4876_v60  ;;  %v925_v29 = vsel %vm922_vm2, %v924_v33, %v920_v40  ;;  %v3983_v44 = vpop.eup %3982  ;;  %v936_v59 = vand.u32 2147483647, %v4946_v9 }
 0x224   : > { %v763_v32 = vmul.f32 %v3981_v52, %v762_v22  ;;  %v1138_v37 = vmul.f32 %v925_v29, %v4747_v16  ;;  %v928_v53 = vmul.f32 %v3983_v44, %v4946_v9  ;;  %vm933_vm6 = vweird.f32 %v3983_v44 }
 0x225   : > { %v638_v63 = vmul.f32 %v4958_v27, %v4958_v27  ;;  %v757_v45 = vsel %vm756_vm3, %v4876_v60, %v755_v31  ;;  %vm770_vm7 = vcmp.eq.f32.partialorder %v4918_v42, 0.0  ;;  %v771_v60 = vand.u32 2147483648, %v4918_v42 }
 0x226   : > { %v764_v62 = vmul.f32 0.5, %v763_v32  ;;  %v1155_v55 = vmul.f32 %v4874_v46, %v1138_v37  ;;  %v929_v58 = vsub.f32 1.0, %v928_v53  ;;  %v760_v26 = vsel %vm758_vm4, %v759_v49, %v757_v45 }
 0x227   : > { %667 = vadd.xlane.f32.xlu2 %v638_v63  ;;  %v3985_v34 = vpop.eup %3984  ;;  %v4995_v3 = vadd.f32 1e-06, %v760_v26  ;;  %vm932_vm8 = vweird.f32 %v4946_v9  ;;  %v939_v7 = vor.u32 1.1754944e-38, %v938_v17  ;;  %v951_v14 = vand.u32 2147483647, %v4966_v36 }
 0x228   : > { %v765_v39 = vsub.f32 1.5, %v764_v62  ;;  %v4986_v16 = vadd.f32 %v4895_v13, %v1155_v55  ;;  %v930_v1 = vmul.f32 %v3983_v44, %v929_v58  ;;  %v943_v2 = vmul.f32 %v3985_v34, %v4966_v36  ;;  %v3987_v6 = vpop.eup %3986  ;;  %vm934_vm9 = vmor %vm932_vm8, %vm933_vm6 }
 0x229   : > { %v958_v19 = vmul.f32 %v3987_v6, %v4972_v20  ;;  %3988 = vrcp.f32 %v4995_v3  ;;  %vm937_vm10 = vcmp.eq.f32.partialorder %v936_v59, 8.507059e+37  ;;  %vm948_vm11 = vweird.f32 %v3985_v34 }
 0x22a   : > { %v766_v61 = vmul.f32 %v3981_v52, %v765_v39  ;;  %7198 = vst [vmem:[#allocation23_spill] sm:$0xff] %v4986_v16  ;;  %1243 = vmatmul.f32.gmra.mxu1 %v4986_v16  ;;  %1308 = vmatmul.f32.gmra.mxu2 %v4986_v16  ;;  %v931_v5 = vadd.f32 %v3983_v44, %v930_v1  ;;  %v944_v50 = vsub.f32 1.0, %v943_v2  ;;  %v953_v52 = vand.u32 2147483648, %v4966_v36 }
 0x22b   : > { %v959_v51 = vsub.f32 1.0, %v958_v19  ;;  %vm947_vm12 = vweird.f32 %v4966_v36  ;;  %vm952_vm13 = vcmp.eq.f32.partialorder %v951_v14, 8.507059e+37  ;;  %vm963_vm15 = vweird.f32 %v3987_v6 }
 0x22c   : > { %v767_v57 = vmul.f32 %v766_v61, %v4918_v42  ;;  %v935_v21 = vsel %vm934_vm9, %v3983_v44, %v931_v5  ;;  %v945_v28 = vmul.f32 %v3985_v34, %v944_v50  ;;  %vm949_vm14 = vmor %vm947_vm12, %vm948_vm11  ;;  %v954_v32 = vor.u32 1.1754944e-38, %v953_v52 }
 0x22d   : > { %v940_v25 = vsel %vm937_vm10, %v939_v7, %v935_v21  ;;  %v960_v30 = vmul.f32 %v3987_v6, %v959_v51  ;;  %vm962_vm0 = vweird.f32 %v4972_v20  ;;  %v966_v36 = vand.u32 2147483647, %v4972_v20 }
 0x22e   : > { %v769_v0 = vsel %vm768_vm5, %v4918_v42, %v767_v57  ;;  %v1139_v8 = vmul.f32 %v940_v25, %v4757_v24  ;;  %v946_v23 = vadd.f32 %v3985_v34, %v945_v28  ;;  %v968_v42 = vand.u32 2147483648, %v4972_v20  ;;  %vm964_vm1 = vmor %vm962_vm0, %vm963_vm15 }
 0x22f   : > { %v772_v9 = vsel %vm770_vm7, %v771_v60, %v769_v0  ;;  %v3989_v33 = vpop.eup %3988  ;;  %v961_v40 = vadd.f32 %v3987_v6, %v960_v30  ;;  %vm967_vm2 = vcmp.eq.f32.partialorder %v966_v36, 8.507059e+37  ;;  %vm977_vm4 = vweird.f32 %v4995_v3 }
 0x230   : > { %v887_v22 = vadd.f32 1e-06, %v772_v9  ;;  %v1156_v31 = vmul.f32 %v4874_v46, %v1139_v8  ;;  %v950_v63 = vsel %vm949_vm14, %v3985_v34, %v946_v23  ;;  %v973_v29 = vmul.f32 %v3989_v33, %v4995_v3 }
 0x231   : > { %v955_v62 = vsel %vm952_vm13, %v954_v32, %v950_v63  ;;  %v965_v37 = vsel %vm964_vm1, %v3987_v6, %v961_v40  ;;  %v969_v53 = vor.u32 1.1754944e-38, %v968_v42  ;;  %vm978_vm3 = vweird.f32 %v3989_v33 }
 0x232   : > { %3990 = vrcp.f32 %v887_v22  ;;  %v5011_v24 = vadd.f32 %v4895_v13, %v1156_v31  ;;  %v1140_v44 = vmul.f32 %v955_v62, %v4771_v38  ;;  %v974_v45 = vsub.f32 1.0, %v973_v29  ;;  %vm979_vm5 = vmor %vm977_vm4, %vm978_vm3 }
 0x233   : > { %v970_v61 = vsel %vm967_vm2, %v969_v53, %v965_v37  ;;  %v983_v38 = vand.u32 2147483648, %v4995_v3  ;;  %v981_v57 = vand.u32 2147483647, %v4995_v3  ;;  %v998_v5 = vand.u32 2147483648, %v887_v22 }
 0x234   : > { %7199 = vst [vmem:[#allocation24_spill] sm:$0xff] %v5011_v24  ;;  %1246 = vmatmul.f32.gmra.mxu1 %v5011_v24  ;;  %1311 = vmatmul.f32.gmra.mxu2 %v5011_v24  ;;  %v1157_v39 = vmul.f32 %v4874_v46, %v1140_v44  ;;  %v975_v55 = vmul.f32 %v3989_v33, %v974_v45  ;;  %vm992_vm8 = vweird.f32 %v887_v22  ;;  %v996_v7 = vand.u32 2147483647, %v887_v22 }
 0x235   : > { %v1141_v34 = vmul.f32 %v970_v61, %v4769_v35  ;;  %v984_v60 = vor.u32 1.1754944e-38, %v983_v38  ;;  %vm982_vm6 = vcmp.eq.f32.partialorder %v981_v57, 8.507059e+37  ;;  %v999_v14 = vor.u32 1.1754944e-38, %v998_v5 }
 0x236   : > { %v5020_v20 = vadd.f32 %v4895_v13, %v1157_v39  ;;  %v976_v17 = vadd.f32 %v3989_v33, %v975_v55  ;;  %vm997_vm10 = vcmp.eq.f32.partialorder %v996_v7, 8.507059e+37 }
 0x237   : > { %v1158_v2 = vmul.f32 %v4874_v46, %v1141_v34 }
 0x238   : > { %v3991_v49 = vpop.eup %3990  ;;  %7200 = vst [vmem:[#allocation25_spill] sm:$0xff] %v5020_v20  ;;  %v980_v1 = vsel %vm979_vm5, %v3989_v33, %v976_v17 }
 0x239   : > { %v988_v58 = vmul.f32 %v3991_v49, %v887_v22  ;;  %v985_v6 = vsel %vm982_vm6, %v984_v60, %v980_v1  ;;  %vm993_vm7 = vweird.f32 %v3991_v49  ;;  %v5030_v35 = vadd.f32 %v4895_v13, %v1158_v2 }
 0x23a   : > { %v1142_v3 = vmul.f32 %v985_v6, %v4785_v47  ;;  %vm994_vm9 = vmor %vm992_vm8, %vm993_vm7 }
 0x23b   : > { %v989_v26 = vsub.f32 1.0, %v988_v58  ;;  %7201 = vst [vmem:[#allocation26_spill] sm:$0xff] %v5030_v35 }
 0x23c   : > { %1249 = vmatmul.f32.gmra.mxu1 %v5020_v20  ;;  %1314 = vmatmul.f32.gmra.mxu2 %v5020_v20  ;;  %v1159_v19 = vmul.f32 %v4874_v46, %v1142_v3 }
 0x23d   : > { %v990_v59 = vmul.f32 %v3991_v49, %v989_v26 }
 0x23e   : > { %v5037_v52 = vadd.f32 %v4895_v13, %v1159_v19 }
 0x23f   : > { %v991_v0 = vadd.f32 %v3991_v49, %v990_v59 }
 0x240   : > { %7202 = vst [vmem:[#allocation27_spill] sm:$0xff] %v5037_v52 }
 0x241   : > { %v995_v50 = vsel %vm994_vm9, %v3991_v49, %v991_v0 }
 0x242   : > { %v1000_v21 = vsel %vm997_vm10, %v999_v14, %v995_v50 }
 0x243   : > { %v1143_v25 = vmul.f32 %v1000_v21, %v4800_v56 }
 0x244   : > { %1252 = vmatmul.f32.gmra.mxu1 %v5030_v35  ;;  %1317 = vmatmul.f32.gmra.mxu2 %v5030_v35  ;;  %v2770_v35 = vld [vmem:[#allocation10 + $0x40] sm:$0xff] }
 0x245   : > { %v1160_v47 = vmul.f32 %v4874_v46, %v1143_v25 }
 0x247   : > { %v5044_v28 = vadd.f32 %v4895_v13, %v1160_v47 }
 0x249   : > { %7203 = vst [vmem:[#allocation28_spill] sm:$0xff] %v5044_v28 }
 0x24c   : > { %1255 = vmatmul.f32.gmra.mxu1 %v5037_v52  ;;  %1320 = vmatmul.f32.gmra.mxu2 %v5037_v52 }
 0x254   : > { %1258 = vmatmul.f32.gmra.mxu1 %v5044_v28  ;;  %1323 = vmatmul.f32.gmra.mxu2 %v5044_v28 }
 0x271   : > { %v656_v51 = vpop.xlane.xlu2 %655 }
 0x272   : > { %v680_v9 = vmul.f32 0.007874016, %v656_v51 }
 0x274   : > { %3992 = vrsqrt.f32 %v680_v9  ;;  %vm780_vm11 = vcmp.eq.f32.partialorder %v680_v9, inf  ;;  %v783_v55 = vand.u32 2147483648, %v680_v9  ;;  %vm782_vm12 = vcmp.eq.f32.partialorder %v680_v9, 0.0 }
 0x279   : > { %v658_v8 = vpop.xlane.xlu1 %657  ;;  %v583_v22 = vpop.xlane.xlu2 %582 }
 0x27a   : > { %v3993_v23 = vpop.eup %3992  ;;  %v681_v56 = vmul.f32 0.007874016, %v658_v8  ;;  %v607_v30 = vmul.f32 %v4737_v4, %v583_v22 }
 0x27b   : > { %v774_v31 = vmul.f32 %v3993_v23, %v680_v9 }
 0x27c   : > { %3994 = vrsqrt.f32 %v681_v56  ;;  %v5050_v33 = vsub.f32 %v4836_v11, %v607_v30  ;;  %vm792_vm13 = vcmp.eq.f32.partialorder %v681_v56, inf  ;;  %v795_v0 = vand.u32 2147483648, %v681_v56 }
 0x27d   : > { %v775_v32 = vmul.f32 %v3993_v23, %v774_v31  ;;  %vm794_vm14 = vcmp.eq.f32.partialorder %v681_v56, 0.0 }
 0x27e   : > { %7204 = vst [vmem:[#allocation29_spill] sm:$0xff] %v5050_v33  ;;  %v639_v40 = vmul.f32 %v5050_v33, %v5050_v33  ;;  %v2787_v33 = vld [vmem:[#allocation10 + $0xc8] sm:$0xff] }
 0x27f   : > { %v776_v63 = vmul.f32 0.5, %v775_v32 }
 0x280   : > { %669 = vadd.xlane.f32.xlu0 %v639_v40 }
 0x281   : > { %v660_v42 = vpop.xlane.xlu0 %659  ;;  %v777_v62 = vsub.f32 1.5, %v776_v63  ;;  %v585_v36 = vpop.xlane.xlu1 %584 }
 0x282   : > { %v682_v29 = vmul.f32 0.007874016, %v660_v42  ;;  %v3995_v44 = vpop.eup %3994  ;;  %v608_v37 = vmul.f32 %v4737_v4, %v585_v36 }
 0x283   : > { %v778_v45 = vmul.f32 %v3993_v23, %v777_v62  ;;  %v786_v39 = vmul.f32 %v3995_v44, %v681_v56 }
 0x284   : > { %3996 = vrsqrt.f32 %v682_v29  ;;  %v5056_v53 = vsub.f32 %v4862_v43, %v608_v37  ;;  %vm804_vm15 = vcmp.eq.f32.partialorder %v682_v29, inf  ;;  %vm806_vm0 = vcmp.eq.f32.partialorder %v682_v29, 0.0 }
 0x285   : > { %v779_v11 = vmul.f32 %v778_v45, %v680_v9  ;;  %v787_v49 = vmul.f32 %v3995_v44, %v786_v39  ;;  %v807_v30 = vand.u32 2147483648, %v682_v29 }
 0x286   : > { %7205 = vst [vmem:[#allocation30_spill] sm:$0xff] %v5056_v53  ;;  %v640_v61 = vmul.f32 %v5056_v53, %v5056_v53 }
 0x287   : > { %v781_v58 = vsel %vm780_vm11, %v680_v9, %v779_v11  ;;  %v788_v17 = vmul.f32 0.5, %v787_v49  ;;  %v455_v11 = vld [vmem:[#allocation13] ss:$8 sm:$0x3] }
 0x288   : > { %671 = vadd.xlane.f32.xlu1 %v640_v61  ;;  %v784_v38 = vsel %vm782_vm12, %v783_v55, %v781_v58 }
 0x289   : > { %v789_v34 = vsub.f32 1.5, %v788_v17  ;;  %v888_v57 = vadd.f32 1e-06, %v784_v38 }
 0x28a   : > { %v3997_v26 = vpop.eup %3996  ;;  %v662_v59 = vpop.xlane.xlu2 %661 }
 0x28b   : > { %v798_v1 = vmul.f32 %v3997_v26, %v682_v29  ;;  %v790_v60 = vmul.f32 %v3995_v44, %v789_v34  ;;  %v5060_v43 = vmul.f32 0.007874016, %v662_v59  ;;  %3998 = vrcp.f32 %v888_v57  ;;  %v664_v50 = vpop.xlane.xlu0 %663 }
 0x28c   : > { %v5065_v9 = vmul.f32 0.007874016, %v664_v50  ;;  %vm1007_vm2 = vweird.f32 %v888_v57  ;;  %v1011_v42 = vand.u32 2147483647, %v888_v57  ;;  %v5084_v59 = vperm.slane %v455_v11, 1 }
 0x28d   : > { %v799_v2 = vmul.f32 %v3997_v26, %v798_v1  ;;  %v791_v6 = vmul.f32 %v790_v60, %v681_v56  ;;  %4000 = vrsqrt.f32 %v5060_v43  ;;  %vm816_vm5 = vcmp.eq.f32.partialorder %v5060_v43, inf }
 0x28e   : > { %vm1012_vm4 = vcmp.eq.f32.partialorder %v1011_v42, 8.507059e+37  ;;  %7206 = vst [vmem:[#allocation31_spill] sm:$0xff] %v5084_v59  ;;  %vm818_vm7 = vcmp.eq.f32.partialorder %v5060_v43, 0.0 }
 0x28f   : > { %v800_v5 = vmul.f32 0.5, %v799_v2  ;;  %v793_v3 = vsel %vm792_vm13, %v681_v56, %v791_v6  ;;  %v1013_v56 = vand.u32 2147483648, %v888_v57 }
 0x290   : > { %v796_v14 = vsel %vm794_vm14, %v795_v0, %v793_v3  ;;  %v2777_v0 = vld [vmem:[#allocation10 + $0x78] sm:$0xff] }
 0x291   : > { %v801_v7 = vsub.f32 1.5, %v800_v5  ;;  %v3999_v19 = vpop.eup %3998  ;;  %v5063_v21 = vadd.f32 1e-06, %v796_v14  ;;  %v666_v31 = vpop.xlane.xlu1 %665  ;;  %v1014_v55 = vor.u32 1.1754944e-38, %v1013_v56  ;;  %2795 = vmatpush.msrb.mxu3 %v2777_v0 }
 0x292   : > { %v1003_v47 = vmul.f32 %v3999_v19, %v888_v57  ;;  %vm1008_vm1 = vweird.f32 %v3999_v19  ;;  %v5070_v44 = vmul.f32 0.007874016, %v666_v31 }
 0x293   : > { %v802_v25 = vmul.f32 %v3997_v26, %v801_v7  ;;  %v4001_v51 = vpop.eup %4000  ;;  %4002 = vrcp.f32 %v5063_v21  ;;  %vm1009_vm3 = vmor %vm1007_vm2, %vm1008_vm1  ;;  %v5078_v26 = vperm.slane %v455_v11, 0  ;;  %v1026_v7 = vand.u32 2147483647, %v5063_v21 }
 0x294   : > { %v810_v22 = vmul.f32 %v4001_v51, %v5060_v43  ;;  %v1004_v23 = vsub.f32 1.0, %v1003_v47  ;;  %4004 = vrsqrt.f32 %v5065_v9  ;;  %v1028_v50 = vand.u32 2147483648, %v5063_v21 }
 0x295   : > { %v803_v8 = vmul.f32 %v802_v25, %v682_v29  ;;  %vm1022_vm8 = vweird.f32 %v5063_v21  ;;  %vm1027_vm10 = vcmp.eq.f32.partialorder %v1026_v7, 8.507059e+37  ;;  %vm840_vm1 = vcmp.eq.f32.partialorder %v5070_v44, inf }
 0x296   : > { %v811_v63 = vmul.f32 %v4001_v51, %v810_v22  ;;  %v1005_v40 = vmul.f32 %v3999_v19, %v1004_v23 }
 0x297   : > { %v805_v32 = vsel %vm804_vm15, %v682_v29, %v803_v8  ;;  %v819_v8 = vand.u32 2147483648, %v5060_v43  ;;  %vm828_vm15 = vcmp.eq.f32.partialorder %v5065_v9, inf }
 0x298   : > { %v808_v62 = vsel %vm806_vm0, %v807_v30, %v805_v32  ;;  %v812_v36 = vmul.f32 0.5, %v811_v63  ;;  %v1006_v37 = vadd.f32 %v3999_v19, %v1005_v40  ;;  %v1029_v32 = vor.u32 1.1754944e-38, %v1028_v50  ;;  %v2776_v63 = vld [vmem:[#allocation10 + $0x70] sm:$0xff] }
 0x299   : > { %v5072_v45 = vadd.f32 1e-06, %v808_v62  ;;  %v4003_v29 = vpop.eup %4002  ;;  %2796 = vmatpush.msrb.mxu3 %v2776_v63  ;;  %vm830_vm0 = vcmp.eq.f32.partialorder %v5065_v9, 0.0 }
 0x29a   : > { %v813_v39 = vsub.f32 1.5, %v812_v36  ;;  %v1010_v49 = vsel %vm1009_vm3, %v3999_v19, %v1006_v37  ;;  %v668_v61 = vpop.xlane.xlu2 %667  ;;  %v5076_v38 = vpop.eup %4004  ;;  %v1018_v57 = vmul.f32 %v4003_v29, %v5063_v21  ;;  %vm1023_vm6 = vweird.f32 %v4003_v29 }
 0x29b   : > { %4006 = vrcp.f32 %v5072_v45  ;;  %v1015_v17 = vsel %vm1012_vm4, %v1014_v55, %v1010_v49  ;;  %v5082_v1 = vmul.f32 0.007874016, %v668_v61  ;;  %v822_v3 = vmul.f32 %v5076_v38, %v5065_v9  ;;  %vm1024_vm9 = vmor %vm1022_vm8, %vm1023_vm6  ;;  %v2775_v49 = vld [vmem:[#allocation10 + $0x68] sm:$0xff] }
 0x29c   : > { %v814_v58 = vmul.f32 %v4001_v51, %v813_v39  ;;  %4008 = vrsqrt.f32 %v5070_v44  ;;  %v1144_v34 = vmul.f32 %v1015_v17, %v4821_v48  ;;  %v1019_v6 = vsub.f32 1.0, %v1018_v57  ;;  %2797 = vmatpush.msrb.mxu3 %v2775_v49 }
 0x29d   : > { %4010 = vrsqrt.f32 %v5082_v1  ;;  %v823_v56 = vmul.f32 %v5076_v38, %v822_v3  ;;  %v1043_v21 = vand.u32 2147483648, %v5072_v45  ;;  %v1041_v11 = vand.u32 2147483647, %v5072_v45 }
 0x29e   : > { %v815_v60 = vmul.f32 %v814_v58, %v5060_v43  ;;  %v1161_v2 = vmul.f32 %v4874_v46, %v1144_v34  ;;  %v1020_v25 = vmul.f32 %v4003_v29, %v1019_v6  ;;  %vm1037_vm12 = vweird.f32 %v5072_v45 }
 0x29f   : > { %v1241_v48 = vpop.f32.mrf.mxu1  ;;  %v824_v57 = vmul.f32 0.5, %v823_v56  ;;  %vm1042_vm14 = vcmp.eq.f32.partialorder %v1041_v11, 8.507059e+37  ;;  %vm852_vm2 = vcmp.eq.f32.partialorder %v5082_v1, inf }
 0x2a0   : > { %v5096_v14 = vadd.f32 %v1241_v48, %v5078_v26  ;;  %v5099_v19 = vadd.f32 %v4895_v13, %v1161_v2  ;;  %v817_v22 = vsel %vm816_vm5, %v5060_v43, %v815_v60  ;;  %v1021_v30 = vadd.f32 %v4003_v29, %v1020_v25 }
 0x2a1   : > { %v5089_v5 = vpop.eup %4006  ;;  %v820_v55 = vsel %vm818_vm7, %v819_v8, %v817_v22  ;;  %v1044_v2 = vor.u32 1.1754944e-38, %v1043_v21 }
 0x2a2   : > { %7207 = vst [vmem:[#allocation32_spill] sm:$0xff] %v5099_v19  ;;  %v1033_v47 = vmul.f32 %v5089_v5, %v5072_v45  ;;  %v5103_v51 = vpop.eup %4008  ;;  %v5113_v23 = vmul.f32 0.70710677, %v5096_v14  ;;  %1261 = vmatmul.f32.gmra.mxu1 %v5099_v19  ;;  %1326 = vmatmul.f32.gmra.mxu2 %v5099_v19  ;;  %v1025_v62 = vsel %vm1024_vm9, %v4003_v29, %v1021_v30  ;;  %vm1038_vm11 = vweird.f32 %v5089_v5 }
 0x2a3   : > { %v834_v40 = vmul.f32 %v5103_v51, %v5070_v44  ;;  %v1030_v39 = vsel %vm1027_vm10, %v1029_v32, %v1025_v62  ;;  %v5136_v34 = vpop.eup %4010  ;;  %vm1039_vm13 = vmor %vm1037_vm12, %vm1038_vm11  ;;  %vm842_vm10 = vcmp.eq.f32.partialorder %v5070_v44, 0.0 }
 0x2a4   : > { %v1034_v31 = vsub.f32 1.0, %v1033_v47  ;;  %v1418_v42 = vmul.f32 %v5113_v23, %v5113_v23  ;;  %v1145_v29 = vmul.f32 %v1030_v39, %v4834_v10  ;;  %v5146_v10 = vadd.f32 1e-06, %v820_v55 }
 0x2a5   : > { %v1306_v37 = vpop.f32.mrf.mxu2  ;;  %v835_v7 = vmul.f32 %v5103_v51, %v834_v40  ;;  %v846_v8 = vmul.f32 %v5136_v34, %v5082_v1 }
 0x2a6   : > { %v1035_v36 = vmul.f32 %v5089_v5, %v1034_v31  ;;  %v5129_v61 = vmin.f32 %v1418_v42, 16.0  ;;  %v5132_v58 = vadd.f32 %v1306_v37, %v5084_v59  ;;  %v1162_v48 = vmul.f32 %v4874_v46, %v1145_v29 }
 0x2a7   : > { %v1244_v60 = vpop.f32.mrf.mxu1  ;;  %4012 = vrcp.f32 %v5146_v10  ;;  %v825_v42 = vsub.f32 1.5, %v824_v57  ;;  %v847_v55 = vmul.f32 %v5136_v34, %v846_v8  ;;  %vm1052_vm4 = vweird.f32 %v5146_v10 }
 0x2a8   : > { %v1036_v17 = vadd.f32 %v5089_v5, %v1035_v36  ;;  %v1420_v43 = vmul.f32 2.1237322e-06, %v5129_v61  ;;  %v1431_v6 = vmul.f32 3.8918573e-05, %v5129_v61  ;;  %v5142_v0 = vadd.f32 %v1244_v60, %v5078_v26 }
 0x2a9   : > { %v5149_v3 = vmul.f32 0.70710677, %v5132_v58  ;;  %v5162_v31 = vadd.f32 %v4895_v13, %v1162_v48 }
 0x2aa   : > { %v1040_v45 = vsel %vm1039_vm13, %v5089_v5, %v1036_v17  ;;  %v1421_v50 = vadd.f32 0.00028619796, %v1420_v43  ;;  %v1432_v25 = vadd.f32 0.001143296, %v1431_v6  ;;  %v5159_v30 = vmul.f32 0.70710677, %v5142_v0 }
 0x2ab   : > { %v1045_v47 = vsel %vm1042_vm14, %v1044_v2, %v1040_v45  ;;  %v1458_v22 = vmul.f32 %v5149_v3, %v5149_v3  ;;  %7208 = vst [vmem:[#allocation33_spill] sm:$0xff] %v5162_v31  ;;  %1264 = vmatmul.f32.gmra.mxu1 %v5162_v31  ;;  %1329 = vmatmul.f32.gmra.mxu2 %v5162_v31  ;;  %v5282_v19 = vmul.f32 0.5, %v5142_v0 }
 0x2ac   : > { %v1422_v5 = vmul.f32 %v1421_v50, %v5129_v61  ;;  %v1433_v56 = vmul.f32 %v1432_v25, %v5129_v61  ;;  %v1146_v32 = vmul.f32 %v1045_v47, %v4857_v41  ;;  %v1498_v63 = vmul.f32 %v5159_v30, %v5159_v30 }
 0x2ad   : > { %v5168_v21 = vmin.f32 %v1458_v22, 16.0  ;;  %v1309_v40 = vpop.f32.mrf.mxu2  ;;  %v836_v41 = vmul.f32 0.5, %v835_v7  ;;  %v5191_v48 = vpop.eup %4012  ;;  %v826_v45 = vmul.f32 %v5076_v38, %v825_v42  ;;  %7210 = vst [vmem:[#allocation35_spill] sm:$0xff] %v5282_v19 }
 0x2ae   : > { %v1434_v62 = vadd.f32 0.014752088, %v1433_v56  ;;  %v5175_v36 = vadd.f32 %v1309_v40, %v5084_v59  ;;  %v1163_v37 = vmul.f32 %v4874_v46, %v1146_v32  ;;  %v5180_v49 = vmin.f32 %v1498_v63, 16.0 }
 0x2af   : > { %v1460_v39 = vmul.f32 2.1237322e-06, %v5168_v21  ;;  %v1471_v11 = vmul.f32 3.8918573e-05, %v5168_v21  ;;  %v1423_v29 = vadd.f32 0.0036580483, %v1422_v5  ;;  %vm1053_vm3 = vweird.f32 %v5191_v48 }
 0x2b0   : > { %v1435_v17 = vmul.f32 %v1434_v62, %v5129_v61  ;;  %v5185_v57 = vmul.f32 0.70710677, %v5175_v36  ;;  %v1500_v43 = vmul.f32 2.1237322e-06, %v5180_v49  ;;  %v5189_v6 = vadd.f32 %v4895_v13, %v1163_v37  ;;  %vm5305_vm6 = vmor %vm1052_vm4, %vm1053_vm3 }
 0x2b1   : > { %v1461_v60 = vadd.f32 0.00028619796, %v1460_v39  ;;  %v1472_v2 = vadd.f32 0.001143296, %v1471_v11  ;;  %v1247_v25 = vpop.f32.mrf.mxu1  ;;  %v837_v47 = vsub.f32 1.5, %v836_v41  ;;  %v848_v56 = vmul.f32 0.5, %v847_v55 }
 0x2b2   : > { %7209 = vst [vmem:[#allocation34_spill] sm:$0xff] %v5189_v6  ;;  %v1436_v7 = vadd.f32 0.112945676, %v1435_v17  ;;  %v1538_v50 = vmul.f32 %v5185_v57, %v5185_v57  ;;  %v5200_v5 = vadd.f32 %v1247_v25, %v5078_v26  ;;  %v1424_v32 = vmul.f32 %v1423_v29, %v5129_v61 }
 0x2b3   : > { %v1462_v8 = vmul.f32 %v1461_v60, %v5168_v21  ;;  %v1473_v22 = vmul.f32 %v1472_v2, %v5168_v21  ;;  %v831_v40 = vand.u32 2147483648, %v5065_v9  ;;  %v1501_v62 = vadd.f32 0.00028619796, %v1500_v43  ;;  %1267 = vmatmul.f32.gmra.mxu1 %v5189_v6  ;;  %1332 = vmatmul.f32.gmra.mxu2 %v5189_v6 }
 0x2b4   : > { %v1437_v38 = vmul.f32 %v1436_v7, %v5129_v61  ;;  %v5204_v63 = vmin.f32 %v1538_v50, 16.0  ;;  %v1048_v37 = vmul.f32 %v5191_v48, %v5146_v10  ;;  %v827_v55 = vmul.f32 %v826_v45, %v5065_v9 }
 0x2b5   : > { %v1474_v42 = vadd.f32 0.014752088, %v1473_v22  ;;  %v1463_v39 = vadd.f32 0.0036580483, %v1462_v8  ;;  %v838_v29 = vmul.f32 %v5103_v51, %v837_v47  ;;  %v5217_v60 = vmul.f32 0.70710677, %v5200_v5 }
 0x2b6   : > { %v1438_v41 = vadd.f32 0.4994258, %v1437_v38  ;;  %v1540_v11 = vmul.f32 2.1237322e-06, %v5204_v63  ;;  %v849_v2 = vsub.f32 1.5, %v848_v56  ;;  %v1502_v22 = vmul.f32 %v1501_v62, %v5180_v49 }
 0x2b7   : > { %v1475_v17 = vmul.f32 %v1474_v42, %v5168_v21  ;;  %v1425_v43 = vadd.f32 0.05243302, %v1424_v32  ;;  %v1578_v8 = vmul.f32 %v5217_v60, %v5217_v60  ;;  %v1312_v38 = vpop.f32.mrf.mxu2  ;;  %v1049_v45 = vsub.f32 1.0, %v1048_v37 }
 0x2b8   : > { %v1439_v7 = vmul.f32 %v1438_v41, %v5129_v61  ;;  %v1541_v50 = vadd.f32 0.00028619796, %v1540_v11  ;;  %v1464_v56 = vmul.f32 %v1463_v39, %v5168_v21  ;;  %v829_v32 = vsel %vm828_vm15, %v5065_v9, %v827_v55  ;;  %v2774_v39 = vld [vmem:[#allocation10 + $0x60] sm:$0xff] }
 0x2b9   : > { %v1476_v25 = vadd.f32 0.112945676, %v1475_v17  ;;  %v5233_v41 = vmin.f32 %v1578_v8, 16.0  ;;  %v839_v37 = vmul.f32 %v838_v29, %v5070_v44  ;;  %v850_v11 = vmul.f32 %v5136_v34, %v849_v2  ;;  %2798 = vmatpush.msrb.mxu3 %v2774_v39 }
 0x2ba   : > { %v5225_v47 = vadd.f32 1.0, %v1439_v7  ;;  %v1542_v62 = vmul.f32 %v1541_v50, %v5204_v63  ;;  %v5239_v17 = vadd.f32 %v1312_v38, %v5084_v59  ;;  %v2793_v7 = vld [vmem:[#allocation10 + $0xf8] sm:$0xff]  ;;  %v1426_v51 = vmul.f32 %v1425_v43, %v5129_v61  ;;  %v1250_v43 = vpop.f32.mrf.mxu1 }
 0x2bb   : > { %v1477_v42 = vmul.f32 %v1476_v25, %v5168_v21  ;;  %v1503_v4 = vadd.f32 0.0036580483, %v1502_v22  ;;  %v1050_v25 = vmul.f32 %v5191_v48, %v1049_v45  ;;  %2860 = vmatpush.msrb.mxu0 %v2793_v7  ;;  %v5246_v34 = vmul.f32 0.5, %v5096_v14  ;;  %v2792_v22 = vld [vmem:[#allocation10 + $0xf0] sm:$0xff]  ;;  %v2791_v7 = vld [vmem:[#allocation10 + $0xe8] sm:$0xff] }
 0x2bc   : > { %4014 = vrcp.f32 %v5225_v47  ;;  %v1465_v2 = vadd.f32 0.05243302, %v1464_v56  ;;  %v1543_v8 = vadd.f32 0.0036580483, %v1542_v62  ;;  %v1580_v38 = vmul.f32 2.1237322e-06, %v5233_v41 }
 0x2bd   : > { %v1478_v55 = vadd.f32 0.4994258, %v1477_v42  ;;  %v2773_v42 = vld [vmem:[#allocation10 + $0x58] sm:$0xff]  ;;  %v832_v45 = vsel %vm830_vm0, %v831_v40, %v829_v32  ;;  %v5255_v39 = vsel %vm840_vm1, %v5070_v44, %v839_v37  ;;  %v5258_v14 = vmul.f32 0.70710677, %v5239_v17  ;;  %2861 = vmatpush.msrb.mxu0 %v2792_v22  ;;  %v2772_v62 = vld [vmem:[#allocation10 + $0x50] sm:$0xff] }
 0x2be   : > { %v1056_v56 = vand.u32 2147483647, %v5146_v10  ;;  %2799 = vmatpush.msrb.mxu3 %v2773_v42  ;;  %v1427_v29 = vadd.f32 0.18741608, %v1426_v51  ;;  %v1504_v9 = vmul.f32 %v1503_v4, %v5180_v49  ;;  %v1051_v40 = vadd.f32 %v5191_v48, %v1050_v25  ;;  %v2771_v42 = vld [vmem:[#allocation10 + $0x48] sm:$0xff]  ;;  %v2790_v22 = vld [vmem:[#allocation10 + $0xe0] sm:$0xff] }
 0x2bf   : > { %v1479_v50 = vmul.f32 %v1478_v55, %v5168_v21  ;;  %v851_v55 = vmul.f32 %v850_v11, %v5082_v1  ;;  %v1466_v37 = vmul.f32 %v1465_v2, %v5168_v21  ;;  %v1618_v6 = vmul.f32 %v5258_v14, %v5258_v14  ;;  %2862 = vmatpush.msrb.mxu0 %v2791_v7 }
 0x2c0   : > { %v5270_v31 = vadd.f32 %v1250_v43, %v5078_v26  ;;  %2800 = vmatpush.msrb.mxu3 %v2772_v62  ;;  %v5272_v11 = vadd.f32 1e-06, %v832_v45  ;;  %v1544_v4 = vmul.f32 %v1543_v8, %v5204_v63  ;;  %v1581_v25 = vadd.f32 0.00028619796, %v1580_v38 }
 0x2c1   : > { %v5274_v51 = vadd.f32 1.0, %v1479_v50  ;;  %v5279_v2 = vmul.f32 0.5, %v5132_v58  ;;  %v1058_v43 = vand.u32 2147483648, %v5146_v10  ;;  %2863 = vmatpush.msrb.mxu0 %v2790_v22  ;;  %v1428_v50 = vmul.f32 %v1427_v29, %v5129_v61 }
 0x2c2   : > { %v5264_v32 = vpop.eup %4014  ;;  %2801 = vmatpush.msrb.mxu3 %v2771_v42  ;;  %v5289_v38 = vmin.f32 %v1618_v6, 16.0  ;;  %vm5291_vm5 = vcmp.eq.f32.partialorder %v1056_v56, 8.507059e+37  ;;  %v5298_v58 = vsel %vm852_vm2, %v5082_v1, %v851_v55  ;;  %v1467_v0 = vadd.f32 0.18741608, %v1466_v37  ;;  %v1315_v42 = vpop.f32.mrf.mxu2 }
 0x2c3   : > { %v1442_v8 = vmul.f32 %v5264_v32, %v5225_v47  ;;  %v1505_v10 = vadd.f32 0.05243302, %v1504_v9  ;;  %v5301_v62 = vmul.f32 0.70710677, %v5270_v31  ;;  %4016 = vrcp.f32 %v5274_v51  ;;  %v1253_v52 = vpop.f32.mrf.mxu1 }
 0x2c4   : > { %v1545_v6 = vadd.f32 0.05243302, %v1544_v4  ;;  %v1582_v29 = vmul.f32 %v1581_v25, %v5233_v41  ;;  %v1055_v56 = vsel %vm5305_vm6, %v5191_v48, %v1051_v40  ;;  %v5315_v7 = vmul.f32 0.5, %v5175_v36  ;;  %2802 = vmatpush.msrb.mxu3 %v2770_v35 }
 0x2c5   : > { %v1620_v55 = vmul.f32 2.1237322e-06, %v5289_v38  ;;  %v1658_v9 = vmul.f32 %v5301_v62, %v5301_v62  ;;  %v1059_v37 = vor.u32 1.1754944e-38, %v1058_v43  ;;  %v1429_v22 = vadd.f32 1.1283791, %v1428_v50  ;;  %v2789_v43 = vld [vmem:[#allocation10 + $0xd8] sm:$0xff] }
 0x2c6   : > { %7215 = vst [vmem:[#allocation36_spill] sm:$0xff] %v5315_v7  ;;  %v1443_v28 = vsub.f32 1.0, %v1442_v8  ;;  %v1452_v4 = vand.u32 2147483648, %v5225_v47  ;;  %v5322_v25 = vmul.f32 0.5, %v5200_v5  ;;  %v1468_v48 = vmul.f32 %v1467_v0, %v5168_v21  ;;  %2864 = vmatpush.msrb.mxu0 %v2789_v43 }
 0x2c7   : > { %v1506_v36 = vmul.f32 %v1505_v10, %v5180_v49  ;;  %v5326_v40 = vmin.f32 %v1658_v9, 16.0  ;;  %v1060_v61 = vsel %vm5291_vm5, %v1059_v37, %v1055_v56  ;;  %v1450_v50 = vand.u32 2147483647, %v5225_v47 }
 0x2c8   : > { %7216 = vst [vmem:[#allocation37_spill] sm:$0xff] %v5322_v25  ;;  %v1546_v8 = vmul.f32 %v1545_v6, %v5204_v63  ;;  %v1583_v20 = vadd.f32 0.0036580483, %v1582_v29  ;;  %v5333_v5 = vadd.f32 %v1315_v42, %v5084_v59  ;;  %v1621_v21 = vadd.f32 0.00028619796, %v1620_v55  ;;  %2865 = vmatpush.msrb.mxu0 %v2788_v18  ;;  %v2786_v25 = vld [vmem:[#allocation10 + $0xc0] sm:$0xff] }
 0x2c9   : > { %v1660_v0 = vmul.f32 2.1237322e-06, %v5326_v40  ;;  %v1147_v10 = vmul.f32 %v1060_v61, %v4899_v15  ;;  %v5338_v45 = vadd.f32 %v1253_v52, %v5078_v26  ;;  %v5340_v56 = vpop.eup %4016  ;;  %v1444_v9 = vmul.f32 %v5264_v32, %v1443_v28 }
 0x2ca   : > { %vm1446_vm7 = vweird.f32 %v5225_v47  ;;  %v5344_v6 = vor.u32 1.1754944e-38, %v1452_v4  ;;  %v5347_v29 = vmul.f32 0.5, %v5239_v17  ;;  %v1469_v35 = vadd.f32 1.1283791, %v1468_v48  ;;  %2866 = vmatpush.msrb.mxu0 %v2787_v33 }
 0x2cb   : > { %v1507_v55 = vadd.f32 0.18741608, %v1506_v36  ;;  %v1661_v37 = vadd.f32 0.00028619796, %v1660_v0  ;;  %v1164_v42 = vmul.f32 %v4874_v46, %v1147_v10  ;;  %vm1447_vm8 = vweird.f32 %v5264_v32  ;;  %v1256_v53 = vpop.f32.mrf.mxu1 }
 0x2cc   : > { %7217 = vst [vmem:[#allocation38_spill] sm:$0xff] %v5347_v29  ;;  %vm5351_vm9 = vcmp.eq.f32.partialorder %v1450_v50, 8.507059e+37  ;;  %v1547_v52 = vadd.f32 0.18741608, %v1546_v8  ;;  %v1584_v28 = vmul.f32 %v1583_v20, %v5233_v41  ;;  %v5357_v4 = vmul.f32 0.70710677, %v5333_v5  ;;  %vm5394_vm11 = vmor %vm1446_vm7, %vm1447_vm8  ;;  %2867 = vmatpush.msrb.mxu0 %v2786_v25 }
 0x2cd   : > { %v1482_v17 = vmul.f32 %v5340_v56, %v5274_v51  ;;  %v1622_v48 = vmul.f32 %v1621_v21, %v5289_v38  ;;  %v5363_v36 = vadd.f32 %v4895_v13, %v1164_v42  ;;  %v5366_v61 = vmul.f32 0.70710677, %v5338_v45  ;;  %v2769_v8 = vld [vmem:[#allocation10 + $0x38] sm:$0xff]  ;;  %v2767_v29 = vld [vmem:[#allocation10 + $0x28] sm:$0xff] }
 0x2ce   : > { %v1445_v43 = vadd.f32 %v5264_v32, %v1444_v9  ;;  %v1662_v50 = vmul.f32 %v1661_v37, %v5326_v40  ;;  %v1698_v20 = vmul.f32 %v5357_v4, %v5357_v4  ;;  %4018 = vrcp.f32 %v5272_v11  ;;  %v1318_v9 = vpop.f32.mrf.mxu2  ;;  %2803 = vmatpush.msrb.mxu3 %v2769_v8 }
 0x2cf   : > { %7220 = vst [vmem:[#allocation39_spill] sm:$0xff] %v5363_v36  ;;  %v1492_v21 = vand.u32 2147483648, %v5274_v51  ;;  %v1508_v0 = vmul.f32 %v1507_v55, %v5180_v49  ;;  %1270 = vmatmul.f32.gmra.mxu1 %v5363_v36  ;;  %1335 = vmatmul.f32.gmra.mxu2 %v5363_v36  ;;  %v1738_v10 = vmul.f32 %v5366_v61, %v5366_v61  ;;  %v1585_v42 = vadd.f32 0.05243302, %v1584_v28 }
 0x2d0   : > { %v1548_v37 = vmul.f32 %v1547_v52, %v5204_v63  ;;  %v5383_v24 = vmul.f32 0.5, %v5270_v31  ;;  %v5385_v16 = vmin.f32 %v1698_v20, 16.0  ;;  %v5388_v55 = vmul.f32 %v1429_v22, %v5113_v23  ;;  %v2768_v20 = vld [vmem:[#allocation10 + $0x30] sm:$0xff] }
 0x2d1   : > { %v1483_v52 = vsub.f32 1.0, %v1482_v17  ;;  %v1623_v28 = vadd.f32 0.0036580483, %v1622_v48  ;;  %v5398_v31 = vmin.f32 %v1738_v10, 16.0  ;;  %v1449_v23 = vsel %vm5394_vm11, %v5264_v32, %v1445_v43  ;;  %2804 = vmatpush.msrb.mxu3 %v2768_v20 }
 0x2d2   : > { %7221 = vst [vmem:[#allocation40_spill] sm:$0xff] %v5383_v24  ;;  %v1663_v22 = vadd.f32 0.0036580483, %v1662_v50  ;;  %v1700_v24 = vmul.f32 2.1237322e-06, %v5385_v16  ;;  %v5405_v47 = vadd.f32 %v1318_v9, %v5084_v59  ;;  %v5407_v17 = vor.u32 1.1754944e-38, %v1492_v21 }
 0x2d3   : > { %v5409_v48 = vadd.f32 1.1283791, %v1508_v0  ;;  %v1740_v18 = vmul.f32 2.1237322e-06, %v5398_v31  ;;  %v5413_v8 = vadd.f32 %v1256_v53, %v5078_v26  ;;  %v5416_v36 = vmul.f32 %v1469_v35, %v5149_v3  ;;  %v2766_v21 = vld [vmem:[#allocation10 + $0x20] sm:$0xff]  ;;  %v2785_v9 = vld [vmem:[#allocation10 + $0xb8] sm:$0xff]  ;;  %2805 = vmatpush.msrb.mxu3 %v2767_v29 }
 0x2d4   : > { %v4019_v32 = vpop.eup %4018  ;;  %v5418_v43 = vadd.f32 1.1283791, %v1548_v37  ;;  %v1586_v50 = vmul.f32 %v1585_v42, %v5233_v41  ;;  %v1701_v10 = vadd.f32 0.00028619796, %v1700_v24  ;;  %v1454_v0 = vsel %vm5351_vm9, %v5344_v6, %v1449_v23  ;;  %2868 = vmatpush.msrb.mxu0 %v2785_v9 }
 0x2d5   : > { %v1484_v53 = vmul.f32 %v5340_v56, %v1483_v52  ;;  %vm1487_vm12 = vweird.f32 %v5340_v56  ;;  %v1741_v33 = vadd.f32 0.00028619796, %v1740_v18  ;;  %v1063_v20 = vmul.f32 %v4019_v32, %v5272_v11  ;;  %2806 = vmatpush.msrb.mxu3 %v2766_v21 }
 0x2d6   : > { %v1624_v3 = vmul.f32 %v1623_v28, %v5289_v38  ;;  %v1664_v35 = vmul.f32 %v1663_v22, %v5326_v40  ;;  %v1702_v24 = vmul.f32 %v1701_v10, %v5385_v16  ;;  %v5431_v37 = vmul.f32 0.70710677, %v5405_v47 }
 0x2d7   : > { %vm1486_vm13 = vweird.f32 %v5274_v51  ;;  %v1742_v6 = vmul.f32 %v1741_v33, %v5398_v31  ;;  %v1064_v15 = vsub.f32 1.0, %v1063_v20  ;;  %v1071_v42 = vand.u32 2147483647, %v5272_v11 }
 0x2d8   : > { %7224 = vst [vmem:[#allocation41_spill] sm:$0xff] %v5431_v37  ;;  %v5437_v52 = vmul.f32 0.70710677, %v5413_v8  ;;  %v1703_v25 = vadd.f32 0.0036580483, %v1702_v24  ;;  %v1073_v29 = vand.u32 2147483648, %v5272_v11  ;;  %v1778_v28 = vmul.f32 %v5431_v37, %v5431_v37  ;;  %vm5490_vm4 = vmor %vm1486_vm13, %vm1487_vm12 }
 0x2d9   : > { %v7226_v23 = vand.u32 2147483648, %v5070_v44  ;;  %v1743_v18 = vadd.f32 0.0036580483, %v1742_v6  ;;  %v1065_v10 = vmul.f32 %v4019_v32, %v1064_v15  ;;  %vm1068_vm14 = vweird.f32 %v4019_v32  ;;  %v1321_v15 = vpop.f32.mrf.mxu2 }
 0x2da   : > { %7225 = vst [vmem:[#allocation42_spill] sm:$0xff] %v5437_v52  ;;  %v1818_v33 = vmul.f32 %v5437_v52, %v5437_v52  ;;  %v1625_v21 = vadd.f32 0.05243302, %v1624_v3  ;;  %v1704_v9 = vmul.f32 %v1703_v25, %v5385_v16  ;;  %v5450_v20 = vmin.f32 %v1778_v28, 16.0 }
 0x2db   : > { %v844_v22 = vsel %vm842_vm10, %v7226_v23, %v5255_v39  ;;  %v7227_v37 = vand.u32 2147483647, %v5274_v51  ;;  %v1665_v44 = vadd.f32 0.05243302, %v1664_v35  ;;  %v1066_v39 = vadd.f32 %v4019_v32, %v1065_v10 }
 0x2dc   : > { %v5452_v24 = vadd.f32 1e-06, %v844_v22  ;;  %vm1067_vm0 = vweird.f32 %v5272_v11  ;;  %v5461_v6 = vmin.f32 %v1818_v33, 16.0  ;;  %v1485_v3 = vadd.f32 %v5340_v56, %v1484_v53  ;;  %v2784_v22 = vld [vmem:[#allocation10 + $0xb0] sm:$0xff] }
 0x2dd   : > { %vm5456_vm15 = vcmp.eq.f32.partialorder %v7227_v37, 8.507059e+37  ;;  %vm5464_vm1 = vmor %vm1067_vm0, %vm1068_vm14  ;;  %v1074_v28 = vor.u32 1.1754944e-38, %v1073_v29  ;;  %v1780_v23 = vmul.f32 2.1237322e-06, %v5450_v20  ;;  %v2765_v37 = vld [vmem:[#allocation10 + $0x18] sm:$0xff]  ;;  %v1744_v35 = vmul.f32 %v1743_v18, %v5398_v31  ;;  %2869 = vmatpush.msrb.mxu0 %v2784_v22 }
 0x2de   : > { %4020 = vrcp.f32 %v5452_v24  ;;  %v1070_v11 = vsel %vm5464_vm1, %v4019_v32, %v1066_v39  ;;  %vm1072_vm2 = vcmp.eq.f32.partialorder %v1071_v42, 8.507059e+37  ;;  %v1820_v10 = vmul.f32 2.1237322e-06, %v5461_v6  ;;  %2807 = vmatpush.msrb.mxu3 %v2765_v37  ;;  %v1259_v39 = vpop.f32.mrf.mxu1 }
 0x2df   : > { %vm854_vm3 = vcmp.eq.f32.partialorder %v5082_v1, 0.0  ;;  %v1587_v53 = vadd.f32 0.18741608, %v1586_v50  ;;  %v1705_v29 = vadd.f32 0.05243302, %v1704_v9  ;;  %v1075_v33 = vsel %vm1072_vm2, %v1074_v28, %v1070_v11  ;;  %v2783_v9 = vld [vmem:[#allocation10 + $0xa8] sm:$0xff] }
 0x2e0   : > { %v5476_v52 = vadd.f32 %v1321_v15, %v5084_v59  ;;  %v5479_v19 = vmul.f32 %v1454_v0, %v5388_v55  ;;  %v5483_v18 = vmul.f32 %v5409_v48, %v5159_v30  ;;  %v1148_v32 = vmul.f32 %v1075_v33, %v4892_v12  ;;  %v2764_v48 = vld [vmem:[#allocation10 + $0x10] sm:$0xff]  ;;  %2870 = vmatpush.msrb.mxu0 %v2783_v9  ;;  %v2762_v11 = vld [vmem:[#allocation10] sm:$0xff] }
 0x2e1   : > { %v1781_v42 = vadd.f32 0.00028619796, %v1780_v23  ;;  %v5496_v55 = vmul.f32 %v5418_v43, %v5185_v57  ;;  %v1626_v0 = vmul.f32 %v1625_v21, %v5289_v38  ;;  %v1666_v30 = vmul.f32 %v1665_v44, %v5326_v40  ;;  %2808 = vmatpush.msrb.mxu3 %v2764_v48  ;;  %v2763_v57 = vld [vmem:[#allocation10 + $0x8] sm:$0xff]  ;;  %v2782_v43 = vld [vmem:[#allocation10 + $0xa0] sm:$0xff] }
 0x2e2   : > { %v5501_v12 = vmul.f32 0.5, %v5333_v5  ;;  %v1489_v51 = vsel %vm5490_vm4, %v5340_v56, %v1485_v3  ;;  %v1745_v15 = vadd.f32 0.05243302, %v1744_v35  ;;  %v1165_v25 = vmul.f32 %v4874_v46, %v1148_v32  ;;  %2871 = vmatpush.msrb.mxu0 %v2782_v43 }
 0x2e3   : > { %v1821_v28 = vadd.f32 0.00028619796, %v1820_v10  ;;  %v1588_v44 = vmul.f32 %v1587_v53, %v5233_v41  ;;  %v1706_v5 = vmul.f32 %v1705_v29, %v5385_v16  ;;  %v5510_v23 = vmul.f32 0.70710677, %v5476_v52  ;;  %2809 = vmatpush.msrb.mxu3 %v2763_v57  ;;  %v2781_v10 = vld [vmem:[#allocation10 + $0x98] sm:$0xff] }
 0x2e4   : > { %v4021_v21 = vpop.eup %4020  ;;  %v5513_v37 = vadd.f32 %v1259_v39, %v5078_v26  ;;  %v5516_v56 = vmul.f32 0.5, %v5338_v45  ;;  %v5519_v3 = vadd.f32 %v4895_v13, %v1165_v25  ;;  %v1782_v22 = vmul.f32 %v1781_v42, %v5450_v20  ;;  %2872 = vmatpush.msrb.mxu0 %v2781_v10  ;;  %v2780_v10 = vld [vmem:[#allocation10 + $0x90] sm:$0xff] }
 0x2e5   : > { %v1078_v35 = vmul.f32 %v4021_v21, %v5452_v24  ;;  %v1494_v53 = vsel %vm5456_vm15, %v5407_v17, %v1489_v51  ;;  %v1627_v29 = vadd.f32 0.18741608, %v1626_v0  ;;  %v1667_v33 = vadd.f32 0.18741608, %v1666_v30  ;;  %2810 = vmatpush.msrb.mxu3 %v2762_v11  ;;  %v1324_v11 = vpop.f32.mrf.mxu2 }
 0x2e6   : > { %7234 = vst [vmem:[#allocation43_spill] sm:$0xff] %v5519_v3  ;;  %v1858_v45 = vmul.f32 %v5510_v23, %v5510_v23  ;;  %v1746_v32 = vmul.f32 %v1745_v15, %v5398_v31  ;;  %1273 = vmatmul.f32.gmra.mxu1 %v5519_v3  ;;  %1338 = vmatmul.f32.gmra.mxu2 %v5519_v3  ;;  %v1086_v50 = vand.u32 2147483647, %v5452_v24  ;;  %v1707_v48 = vadd.f32 0.18741608, %v1706_v5 }
 0x2e7   : > { %v1822_v42 = vmul.f32 %v1821_v28, %v5461_v6  ;;  %v1079_v39 = vsub.f32 1.0, %v1078_v35  ;;  %v1088_v7 = vand.u32 2147483648, %v5452_v24  ;;  %v5537_v0 = vmul.f32 0.70710677, %v5513_v37  ;;  %2873 = vmatpush.msrb.mxu0 %v2780_v10 }
 0x2e8   : > { %v5534_v17 = vmin.f32 %v1858_v45, 16.0  ;;  %v1783_v30 = vadd.f32 0.0036580483, %v1782_v22  ;;  %vm1083_vm5 = vweird.f32 %v4021_v21  ;;  %v7235_v51 = vand.u32 2147483648, %v5082_v1 }
 0x2e9   : > { %v1080_v9 = vmul.f32 %v4021_v21, %v1079_v39  ;;  %v1628_v25 = vmul.f32 %v1627_v29, %v5289_v38  ;;  %v1898_v57 = vmul.f32 %v5537_v0, %v5537_v0  ;;  %v1668_v5 = vmul.f32 %v1667_v33, %v5326_v40  ;;  %v2779_v33 = vld [vmem:[#allocation10 + $0x88] sm:$0xff] }
 0x2ea   : > { %v856_v15 = vsel %vm854_vm3, %v7235_v51, %v5298_v58  ;;  %v1860_v28 = vmul.f32 2.1237322e-06, %v5534_v17  ;;  %v1823_v22 = vadd.f32 0.0036580483, %v1822_v42  ;;  %vm1082_vm6 = vweird.f32 %v5452_v24  ;;  %2874 = vmatpush.msrb.mxu0 %v2779_v33 }
 0x2eb   : > { %v5548_v43 = vadd.f32 1e-06, %v856_v15  ;;  %v1081_v35 = vadd.f32 %v4021_v21, %v1080_v9  ;;  %vm1084_vm7 = vmor %vm1082_vm6, %vm1083_vm5  ;;  %vm1087_vm8 = vcmp.eq.f32.partialorder %v1086_v50, 8.507059e+37  ;;  %v1089_v1 = vor.u32 1.1754944e-38, %v1088_v7  ;;  %v2778_v7 = vld [vmem:[#allocation10 + $0x80] sm:$0xff] }
 0x2ec   : > { %v5552_v58 = vmin.f32 %v1898_v57, 16.0  ;;  %v1708_v29 = vmul.f32 %v1707_v48, %v5385_v16  ;;  %v1747_v45 = vadd.f32 0.18741608, %v1746_v32  ;;  %v1784_v39 = vmul.f32 %v1783_v30, %v5450_v20  ;;  %2875 = vmatpush.msrb.mxu0 %v2778_v7 }
 0x2ed   : > { %4022 = vrcp.f32 %v5548_v43  ;;  %v1085_v51 = vsel %vm1084_vm7, %v4021_v21, %v1081_v35  ;;  %v1861_v9 = vadd.f32 0.00028619796, %v1860_v28  ;;  %v5559_v50 = vadd.f32 %v1324_v11, %v5084_v59 }
 0x2ee   : > { %v1090_v42 = vsel %vm1087_vm8, %v1089_v1, %v1085_v51  ;;  %v1900_v24 = vmul.f32 2.1237322e-06, %v5552_v58  ;;  %v1495_v15 = vmul.f32 %v1494_v53, %v5416_v36  ;;  %v5562_v57 = vadd.f32 1.1283791, %v1588_v44 }
 0x2ef   : > { %7236 = vst [vmem:[#allocation44_spill] sm:$0xff] %v5559_v50  ;;  %v1824_v48 = vmul.f32 %v1823_v22, %v5461_v6  ;;  %v1149_v32 = vmul.f32 %v1090_v42, %v4925_v54  ;;  %v5566_v21 = vadd.f32 1.1283791, %v1628_v25  ;;  %v5569_v30 = vmul.f32 0.5, %v5405_v47 }
 0x2f0   : > { %v1901_v28 = vadd.f32 0.00028619796, %v1900_v24  ;;  %v3765_v35 = vclamps-f32 %v5479_v19, 1.0  ;;  %v5572_v11 = vadd.f32 1.1283791, %v1668_v5  ;;  %v1748_v1 = vmul.f32 %v1747_v45, %v5398_v31 }
 0x2f1   : > { %v5576_v36 = vmul.f32 0.5, %v5413_v8  ;;  %v1166_v44 = vmul.f32 %v4874_v46, %v1149_v32  ;;  %v5579_v53 = vadd.f32 1.1283791, %v1708_v29  ;;  %v1785_v25 = vadd.f32 0.05243302, %v1784_v39 }
 0x2f2   : > { %v1862_v47 = vmul.f32 %v1861_v9, %v5534_v17  ;;  %v5583_v22 = vmul.f32 0.70710677, %v5559_v50  ;;  %v1825_v19 = vadd.f32 0.05243302, %v1824_v48  ;;  %v1101_v8 = vand.u32 2147483647, %v5548_v43 }
 0x2f3   : > { %v4023_v54 = vpop.eup %4022  ;;  %v5586_v5 = vadd.f32 %v4895_v13, %v1166_v44  ;;  %v1902_v45 = vmul.f32 %v1901_v28, %v5552_v58  ;;  %v1103_v51 = vand.u32 2147483648, %v5548_v43  ;;  %v2698_v39 = vadd.f32 1.0, %v3765_v35 }
 0x2f4   : > { %v1093_v10 = vmul.f32 %v4023_v54, %v5548_v43  ;;  %v1938_v29 = vmul.f32 %v5583_v22, %v5583_v22  ;;  %v3766_v42 = vclamps-f32 %v1495_v15, 1.0  ;;  %v1511_v9 = vmul.f32 3.8918573e-05, %v5180_v49 }
 0x2f5   : > { %7237 = vst [vmem:[#allocation45_spill] sm:$0xff] %v5586_v5  ;;  %1276 = vmatmul.f32.gmra.mxu1 %v5586_v5  ;;  %1341 = vmatmul.f32.gmra.mxu2 %v5586_v5  ;;  %v1551_v24 = vmul.f32 3.8918573e-05, %v5204_v63  ;;  %v1863_v7 = vadd.f32 0.0036580483, %v1862_v47  ;;  %vm1098_vm9 = vweird.f32 %v4023_v54  ;;  %v2730_v32 = vmul.f32 %v2698_v39, %v5246_v34 }
 0x2f6   : > { %v1094_v33 = vsub.f32 1.0, %v1093_v10  ;;  %v5598_v48 = vmin.f32 %v1938_v29, 16.0  ;;  %v2699_v44 = vadd.f32 1.0, %v3766_v42  ;;  %v1512_v3 = vadd.f32 0.001143296, %v1511_v9 }
 0x2f7   : > { %v1552_v35 = vadd.f32 0.001143296, %v1551_v24  ;;  %v1786_v50 = vmul.f32 %v1785_v25, %v5450_v20  ;;  %v1903_v59 = vadd.f32 0.0036580483, %v1902_v45  ;;  %vm1097_vm10 = vweird.f32 %v5548_v43  ;;  %2811 = vmatmul.f32.vlgmr.msrb.gmra.mxu3 %v2730_v32 }
 0x2f8   : > { %v1095_v28 = vmul.f32 %v4023_v54, %v1094_v33  ;;  %v1940_v15 = vmul.f32 2.1237322e-06, %v5598_v48  ;;  %v2731_v47 = vmul.f32 %v2699_v44, %v5279_v2  ;;  %v1513_v29 = vmul.f32 %v1512_v3, %v5180_v49  ;;  %vm1099_vm11 = vmor %vm1097_vm10, %vm1098_vm9 }
 0x2f9   : > { %v1553_v5 = vmul.f32 %v1552_v35, %v5204_v63  ;;  %v1864_v34 = vmul.f32 %v1863_v7, %v5534_v17  ;;  %vm1102_vm12 = vcmp.eq.f32.partialorder %v1101_v8, 8.507059e+37  ;;  %v1104_v39 = vor.u32 1.1754944e-38, %v1103_v51 }
 0x2fa   : > { %v1096_v10 = vadd.f32 %v4023_v54, %v1095_v28  ;;  %v1591_v25 = vmul.f32 3.8918573e-05, %v5233_v41  ;;  %2876 = vmatmul.f32.vlgmr.msrb.gmra.mxu0 %v2731_v47  ;;  %v1514_v43 = vadd.f32 0.014752088, %v1513_v29  ;;  %v1631_v42 = vmul.f32 3.8918573e-05, %v5289_v38 }
 0x2fb   : > { %v1554_v33 = vadd.f32 0.014752088, %v1553_v5  ;;  %v1749_v9 = vadd.f32 1.1283791, %v1748_v1  ;;  %v1904_v2 = vmul.f32 %v1903_v59, %v5552_v58  ;;  %v1941_v24 = vadd.f32 0.00028619796, %v1940_v15 }
 0x2fc   : > { %v1100_v45 = vsel %vm1099_vm11, %v4023_v54, %v1096_v10  ;;  %v1515_v7 = vmul.f32 %v1514_v43, %v5180_v49  ;;  %v1592_v51 = vadd.f32 0.001143296, %v1591_v25  ;;  %v1787_v28 = vadd.f32 0.18741608, %v1786_v50 }
 0x2fd   : > { %v1105_v3 = vsel %vm1102_vm12, %v1104_v39, %v1100_v45  ;;  %v1555_v8 = vmul.f32 %v1554_v33, %v5204_v63  ;;  %v1826_v54 = vmul.f32 %v1825_v19, %v5461_v6  ;;  %v1865_v44 = vadd.f32 0.05243302, %v1864_v34 }
 0x2fe   : > { %v1150_v32 = vmul.f32 %v1105_v3, %v4958_v27  ;;  %v1632_v35 = vadd.f32 0.001143296, %v1631_v42  ;;  %v1516_v10 = vadd.f32 0.112945676, %v1515_v7  ;;  %v1593_v59 = vmul.f32 %v1592_v51, %v5233_v41 }
 0x2ff   : > { %v1556_v1 = vadd.f32 0.112945676, %v1555_v8  ;;  %v1905_v47 = vadd.f32 0.05243302, %v1904_v2  ;;  %v1942_v15 = vmul.f32 %v1941_v24, %v5598_v48  ;;  %v1671_v29 = vmul.f32 3.8918573e-05, %v5326_v40 }
 0x300   : > { %v1167_v5 = vmul.f32 %v4874_v46, %v1150_v32  ;;  %v1633_v27 = vmul.f32 %v1632_v35, %v5289_v38  ;;  %v1517_v50 = vmul.f32 %v1516_v10, %v5180_v49  ;;  %v1594_v34 = vadd.f32 0.014752088, %v1593_v59 }
 0x301   : > { %v1557_v19 = vmul.f32 %v1556_v1, %v5204_v63  ;;  %v1827_v25 = vadd.f32 0.18741608, %v1826_v54  ;;  %v1866_v45 = vmul.f32 %v1865_v44, %v5534_v17  ;;  %v1672_v33 = vadd.f32 0.001143296, %v1671_v29 }
 0x302   : > { %v5622_v39 = vadd.f32 %v4895_v13, %v1167_v5  ;;  %v1634_v43 = vadd.f32 0.014752088, %v1633_v27  ;;  %v1518_v42 = vadd.f32 0.4994258, %v1517_v50  ;;  %v1595_v3 = vmul.f32 %v1594_v34, %v5233_v41 }
 0x303   : > { %v1558_v2 = vadd.f32 0.4994258, %v1557_v19  ;;  %v1711_v24 = vmul.f32 3.8918573e-05, %v5385_v16  ;;  %v1906_v32 = vmul.f32 %v1905_v47, %v5552_v58  ;;  %v1943_v7 = vadd.f32 0.0036580483, %v1942_v15 }
 0x304   : > { %7238 = vst [vmem:[#allocation46_spill] sm:$0xff] %v5622_v39  ;;  %1279 = vmatmul.f32.gmra.mxu1 %v5622_v39  ;;  %1344 = vmatmul.f32.gmra.mxu2 %v5622_v39  ;;  %v1635_v8 = vmul.f32 %v1634_v43, %v5289_v38  ;;  %v1673_v51 = vmul.f32 %v1672_v33, %v5326_v40  ;;  %v1596_v35 = vadd.f32 0.112945676, %v1595_v3  ;;  %v1867_v1 = vadd.f32 0.18741608, %v1866_v45 }
 0x305   : > { %v1519_v54 = vmul.f32 %v1518_v42, %v5180_v49  ;;  %v1559_v44 = vmul.f32 %v1558_v2, %v5204_v63  ;;  %v1712_v5 = vadd.f32 0.001143296, %v1711_v24  ;;  %v5638_v10 = vmul.f32 %v5562_v57, %v5217_v60 }
 0x306   : > { %v1636_v59 = vadd.f32 0.112945676, %v1635_v8  ;;  %v1674_v27 = vadd.f32 0.014752088, %v1673_v51  ;;  %v1597_v15 = vmul.f32 %v1596_v35, %v5233_v41  ;;  %v1751_v50 = vmul.f32 3.8918573e-05, %v5398_v31 }
 0x307   : > { %v5640_v29 = vadd.f32 1.0, %v1519_v54  ;;  %v5642_v47 = vadd.f32 1.0, %v1559_v44  ;;  %v5648_v49 = vmul.f32 %v5566_v21, %v5258_v14  ;;  %v1907_v63 = vadd.f32 0.18741608, %v1906_v32 }
 0x308   : > { %v1637_v19 = vmul.f32 %v1636_v59, %v5289_v38  ;;  %v1675_v60 = vmul.f32 %v1674_v27, %v5326_v40  ;;  %v5654_v57 = vmul.f32 %v5572_v11, %v5301_v62  ;;  %v1944_v34 = vmul.f32 %v1943_v7, %v5598_v48 }
 0x309   : > { %4024 = vrcp.f32 %v5640_v29  ;;  %v1713_v45 = vmul.f32 %v1712_v5, %v5385_v16  ;;  %v5661_v43 = vmul.f32 %v5579_v53, %v5357_v4  ;;  %v5664_v14 = vmul.f32 %v1749_v9, %v5366_v61 }
 0x30a   : > { %v5667_v21 = vmul.f32 %v1787_v28, %v5450_v20  ;;  %4026 = vrcp.f32 %v5642_v47  ;;  %v5671_v62 = vmul.f32 %v1827_v25, %v5461_v6  ;;  %v5674_v11 = vmul.f32 %v1867_v1, %v5534_v17 }
 0x30b   : > { %v1598_v33 = vadd.f32 0.4994258, %v1597_v15  ;;  %v1752_v42 = vadd.f32 0.001143296, %v1751_v50  ;;  %v5677_v2 = vmul.f32 %v1907_v63, %v5552_v58  ;;  %v1530_v4 = vand.u32 2147483647, %v5640_v29 }
 0x30c   : > { %v1638_v61 = vadd.f32 0.4994258, %v1637_v19  ;;  %v1676_v53 = vadd.f32 0.112945676, %v1675_v60  ;;  %v5680_v9 = vadd.f32 0.05243302, %v1944_v34  ;;  %vm1526_vm13 = vweird.f32 %v5640_v29 }
 0x30d   : > { %v1532_v28 = vand.u32 2147483648, %v5640_v29  ;;  %v1599_v3 = vmul.f32 %v1598_v33, %v5233_v41  ;;  %v1714_v25 = vadd.f32 0.014752088, %v1713_v45  ;;  %v1570_v24 = vand.u32 2147483647, %v5642_v47 }
 0x30e   : > { %v1639_v32 = vmul.f32 %v1638_v61, %v5289_v38  ;;  %v1677_v7 = vmul.f32 %v1676_v53, %v5326_v40  ;;  %vm1566_vm14 = vweird.f32 %v5642_v47  ;;  %v1572_v51 = vand.u32 2147483648, %v5642_v47 }
 0x30f   : > { %v4025_v8 = vpop.eup %4024  ;;  %v5690_v54 = vadd.f32 1.0, %v1599_v3  ;;  %v1753_v44 = vmul.f32 %v1752_v42, %v5398_v31  ;;  %vm5694_vm15 = vcmp.eq.f32.partialorder %v1530_v4, 8.507059e+37  ;;  %v1533_v59 = vor.u32 1.1754944e-38, %v1532_v28 }
 0x310   : > { %v4027_v35 = vpop.eup %4026  ;;  %v1522_v41 = vmul.f32 %v4025_v8, %v5640_v29  ;;  %v5698_v1 = vadd.f32 1.0, %v1639_v32  ;;  %v1678_v38 = vadd.f32 0.4994258, %v1677_v7  ;;  %v1715_v15 = vmul.f32 %v1714_v25, %v5385_v16 }
 0x311   : > { %v1562_v27 = vmul.f32 %v4027_v35, %v5642_v47  ;;  %4028 = vrcp.f32 %v5690_v54  ;;  %vm5703_vm0 = vcmp.eq.f32.partialorder %v1570_v24, 8.507059e+37  ;;  %v1791_v19 = vmul.f32 3.8918573e-05, %v5450_v20 }
 0x312   : > { %v1523_v50 = vsub.f32 1.0, %v1522_v41  ;;  %4030 = vrcp.f32 %v5698_v1  ;;  %v1573_v34 = vor.u32 1.1754944e-38, %v1572_v51  ;;  %v1754_v45 = vadd.f32 0.014752088, %v1753_v44 }
 0x313   : > { %v1563_v60 = vsub.f32 1.0, %v1562_v27  ;;  %v5710_v33 = vmul.f32 3.8918573e-05, %v5461_v6  ;;  %vm1527_vm1 = vweird.f32 %v4025_v8  ;;  %v1610_v4 = vand.u32 2147483647, %v5690_v54 }
 0x314   : > { %v1524_v42 = vmul.f32 %v4025_v8, %v1523_v50  ;;  %v1679_v61 = vmul.f32 %v1678_v38, %v5326_v40  ;;  %vm1567_vm2 = vweird.f32 %v4027_v35  ;;  %v1612_v28 = vand.u32 2147483648, %v5690_v54  ;;  %vm1528_vm4 = vmor %vm1526_vm13, %vm1527_vm1 }
 0x315   : > { %v1564_v53 = vmul.f32 %v4027_v35, %v1563_v60  ;;  %v1716_v3 = vadd.f32 0.112945676, %v1715_v15  ;;  %vm1606_vm3 = vweird.f32 %v5690_v54  ;;  %v1650_v24 = vand.u32 2147483647, %v5698_v1  ;;  %vm1568_vm6 = vmor %vm1566_vm14, %vm1567_vm2 }
 0x316   : > { %v1525_v25 = vadd.f32 %v4025_v8, %v1524_v42  ;;  %v5717_v32 = vadd.f32 1.0, %v1679_v61  ;;  %vm1646_vm5 = vweird.f32 %v5698_v1  ;;  %v1652_v40 = vand.u32 2147483648, %v5698_v1 }
 0x317   : > { %v4029_v7 = vpop.eup %4028  ;;  %v1565_v51 = vadd.f32 %v4027_v35, %v1564_v53  ;;  %v1755_v44 = vmul.f32 %v1754_v45, %v5398_v31  ;;  %vm5728_vm7 = vcmp.eq.f32.partialorder %v1610_v4, 8.507059e+37  ;;  %v1717_v29 = vmul.f32 %v1716_v3, %v5385_v16 }
 0x318   : > { %v4031_v41 = vpop.eup %4030  ;;  %v1529_v38 = vsel %vm1528_vm4, %v4025_v8, %v1525_v25  ;;  %v1602_v27 = vmul.f32 %v4029_v7, %v5690_v54  ;;  %4032 = vrcp.f32 %v5717_v32  ;;  %v1613_v45 = vor.u32 1.1754944e-38, %v1612_v28 }
 0x319   : > { %v1534_v50 = vsel %vm5694_vm15, %v1533_v59, %v1529_v38  ;;  %v1569_v60 = vsel %vm1568_vm6, %v4027_v35, %v1565_v51  ;;  %v1642_v8 = vmul.f32 %v4031_v41, %v5698_v1  ;;  %vm5740_vm8 = vcmp.eq.f32.partialorder %v1650_v24, 8.507059e+37 }
 0x31a   : > { %v1535_v47 = vmul.f32 %v1534_v50, %v5483_v18  ;;  %v1574_v42 = vsel %vm5703_vm0, %v1573_v34, %v1569_v60  ;;  %v1603_v4 = vsub.f32 1.0, %v1602_v27  ;;  %vm1607_vm9 = vweird.f32 %v4029_v7 }
 0x31b   : > { %v1575_v53 = vmul.f32 %v1574_v42, %v5496_v55  ;;  %v1643_v3 = vsub.f32 1.0, %v1642_v8  ;;  %v1653_v5 = vor.u32 1.1754944e-38, %v1652_v40  ;;  %v1718_v28 = vadd.f32 0.4994258, %v1717_v29  ;;  %vm1608_vm11 = vmor %vm1606_vm3, %vm1607_vm9  ;;  %v7247_v29 = vld [vmem:[#allocation35_spill] sm:$0xff]  ;;  %v7248_v42 = vld [vmem:[#allocation36_spill] sm:$0xff] }
 0x31c   : > { %v3767_v59 = vclamps-f32 %v1535_v47, 1.0  ;;  %v1604_v35 = vmul.f32 %v4029_v7, %v1603_v4  ;;  %v1756_v25 = vadd.f32 0.112945676, %v1755_v44  ;;  %vm1647_vm10 = vweird.f32 %v4031_v41 }
 0x31d   : > { %v3768_v51 = vclamps-f32 %v1575_v53, 1.0  ;;  %v1644_v38 = vmul.f32 %v4031_v41, %v1643_v3  ;;  %v1792_v18 = vadd.f32 0.001143296, %v1791_v19  ;;  %v1719_v24 = vmul.f32 %v1718_v28, %v5385_v16  ;;  %vm1648_vm12 = vmor %vm1646_vm5, %vm1647_vm10 }
 0x31e   : > { %v4033_v63 = vpop.eup %4032  ;;  %v2700_v34 = vadd.f32 1.0, %v3767_v59  ;;  %v1605_v27 = vadd.f32 %v4029_v7, %v1604_v35  ;;  %v1757_v50 = vmul.f32 %v1756_v25, %v5398_v31  ;;  %v1692_v44 = vand.u32 2147483648, %v5717_v32  ;;  %v670_v59 = vpop.xlane.xlu0 %669 }
 0x31f   : > { %v2701_v60 = vadd.f32 1.0, %v3768_v51  ;;  %v1645_v55 = vadd.f32 %v4031_v41, %v1644_v38  ;;  %v1682_v40 = vmul.f32 %v4033_v63, %v5717_v32  ;;  %v5755_v47 = vadd.f32 1.0, %v1719_v24 }
 0x320   : > { %v2732_v8 = vmul.f32 %v2700_v34, %v7247_v29  ;;  %v1609_v19 = vsel %vm1608_vm11, %v4029_v7, %v1605_v27  ;;  %v1758_v16 = vadd.f32 0.4994258, %v1757_v50  ;;  %v1832_v1 = vadd.f32 0.001143296, %v5710_v33  ;;  %v7249_v50 = vld [vmem:[#allocation37_spill] sm:$0xff]  ;;  %v7250_v29 = vld [vmem:[#allocation38_spill] sm:$0xff] }
 0x321   : > { %v2733_v4 = vmul.f32 %v2701_v60, %v7248_v42  ;;  %v1614_v54 = vsel %vm5728_vm7, %v1613_v45, %v1609_v19  ;;  %v1649_v53 = vsel %vm1648_vm12, %v4031_v41, %v1645_v55  ;;  %v1683_v3 = vsub.f32 1.0, %v1682_v40 }
 0x322   : > { %2814 = vmatmul.f32.gmra.mxu3 %v2732_v8  ;;  %v1615_v35 = vmul.f32 %v1614_v54, %v5638_v10  ;;  %v1654_v7 = vsel %vm5740_vm8, %v1653_v5, %v1649_v53  ;;  %4034 = vrcp.f32 %v5755_v47  ;;  %vm1687_vm13 = vweird.f32 %v4033_v63 }
 0x323   : > { %2879 = vmatmul.f32.gmra.mxu0 %v2733_v4  ;;  %v1655_v28 = vmul.f32 %v1654_v7, %v5648_v49  ;;  %v1684_v25 = vmul.f32 %v4033_v63, %v1683_v3  ;;  %v1690_v15 = vand.u32 2147483647, %v5717_v32  ;;  %vm1686_vm14 = vweird.f32 %v5717_v32 }
 0x324   : > { %v3769_v41 = vclamps-f32 %v1615_v35, 1.0  ;;  %v1759_v45 = vmul.f32 %v1758_v16, %v5398_v31  ;;  %v5769_v10 = vmul.f32 0.007874016, %v670_v59  ;;  %v1693_v51 = vor.u32 1.1754944e-38, %v1692_v44  ;;  %vm1688_vm15 = vmor %vm1686_vm14, %vm1687_vm13 }
 0x325   : > { %v3770_v61 = vclamps-f32 %v1655_v28, 1.0  ;;  %v1685_v5 = vadd.f32 %v4033_v63, %v1684_v25  ;;  %v1730_v38 = vand.u32 2147483647, %v5755_v47  ;;  %v1793_v49 = vmul.f32 %v1792_v18, %v5450_v20 }
 0x326   : > { %v2702_v33 = vadd.f32 1.0, %v3769_v41  ;;  %v5772_v34 = vadd.f32 1.0, %v1759_v45  ;;  %4036 = vrsqrt.f32 %v5769_v10  ;;  %vm1691_vm0 = vcmp.eq.f32.partialorder %v1690_v15, 8.507059e+37 }
 0x327   : > { %v2703_v27 = vadd.f32 1.0, %v3770_v61  ;;  %v1689_v24 = vsel %vm1688_vm15, %v4033_v63, %v1685_v5  ;;  %v1871_v31 = vmul.f32 3.8918573e-05, %v5534_v17  ;;  %v1732_v40 = vand.u32 2147483648, %v5755_v47 }
 0x328   : > { %v4035_v32 = vpop.eup %4034  ;;  %v2734_v60 = vmul.f32 %v2702_v33, %v7249_v50  ;;  %v1694_v55 = vsel %vm1691_vm0, %v1693_v51, %v1689_v24  ;;  %4038 = vrcp.f32 %v5772_v34  ;;  %v1946_v44 = vmul.f32 %v5680_v9, %v5598_v48  ;;  %v7253_v51 = vld [vmem:[#allocation40_spill] sm:$0xff] }
 0x329   : > { %v2735_v8 = vmul.f32 %v2703_v27, %v7250_v29  ;;  %v1695_v18 = vmul.f32 %v1694_v55, %v5654_v57  ;;  %v1722_v63 = vmul.f32 %v4035_v32, %v5755_v47  ;;  %vm1726_vm1 = vweird.f32 %v5755_v47 }
 0x32a   : > { %2817 = vmatmul.f32.gmra.mxu3 %v2734_v60  ;;  %vm5786_vm2 = vcmp.eq.f32.partialorder %v1730_v38, 8.507059e+37  ;;  %v1794_v16 = vadd.f32 0.014752088, %v1793_v49  ;;  %v1833_v42 = vmul.f32 %v1832_v1, %v5461_v6  ;;  %v1872_v9 = vadd.f32 0.001143296, %v1871_v31 }
 0x32b   : > { %2882 = vmatmul.f32.gmra.mxu0 %v2735_v8  ;;  %v3771_v4 = vclamps-f32 %v1695_v18, 1.0  ;;  %v1723_v54 = vsub.f32 1.0, %v1722_v63  ;;  %v1911_v53 = vmul.f32 3.8918573e-05, %v5552_v58  ;;  %vm1727_vm3 = vweird.f32 %v4035_v32  ;;  %v672_v8 = vpop.xlane.xlu1 %671 }
 0x32c   : > { %v5792_v3 = vpop.eup %4036  ;;  %v1733_v57 = vor.u32 1.1754944e-38, %v1732_v40  ;;  %v1795_v59 = vmul.f32 %v1794_v16, %v5450_v20  ;;  %v1834_v35 = vadd.f32 0.014752088, %v1833_v42  ;;  %v1873_v1 = vmul.f32 %v1872_v9, %v5534_v17  ;;  %vm1728_vm4 = vmor %vm1726_vm1, %vm1727_vm3 }
 0x32d   : > { %v2704_v7 = vadd.f32 1.0, %v3771_v4  ;;  %v1724_v28 = vmul.f32 %v4035_v32, %v1723_v54  ;;  %v858_v25 = vmul.f32 %v5792_v3, %v5769_v10  ;;  %v1770_v41 = vand.u32 2147483647, %v5772_v34 }
 0x32e   : > { %v4039_v15 = vpop.eup %4038  ;;  %v1796_v45 = vadd.f32 0.112945676, %v1795_v59  ;;  %v1835_v61 = vmul.f32 %v1834_v35, %v5461_v6  ;;  %v1912_v5 = vadd.f32 0.001143296, %v1911_v53  ;;  %v1772_v27 = vand.u32 2147483648, %v5772_v34 }
 0x32f   : > { %v2736_v38 = vmul.f32 %v2704_v7, %v7253_v51  ;;  %v1725_v33 = vadd.f32 %v4035_v32, %v1724_v28  ;;  %v1762_v49 = vmul.f32 %v4039_v15, %v5772_v34  ;;  %v1874_v50 = vadd.f32 0.014752088, %v1873_v1 }
 0x330   : > { %v1797_v24 = vmul.f32 %v1796_v45, %v5450_v20  ;;  %v1836_v31 = vadd.f32 0.112945676, %v1835_v61  ;;  %v1951_v60 = vmul.f32 3.8918573e-05, %v5598_v48  ;;  %vm1767_vm5 = vweird.f32 %v4039_v15 }
 0x331   : > { %v1729_v55 = vsel %vm1728_vm4, %v4035_v32, %v1725_v33  ;;  %v1763_v40 = vsub.f32 1.0, %v1762_v49  ;;  %v859_v29 = vmul.f32 %v5792_v3, %v858_v25  ;;  %v5811_v16 = vmul.f32 0.007874016, %v672_v8 }
 0x332   : > { %2820 = vmatmul.f32.gmra.mxu3 %v2736_v38  ;;  %v1734_v18 = vsel %vm5786_vm2, %v1733_v57, %v1729_v55  ;;  %v1798_v63 = vadd.f32 0.4994258, %v1797_v24  ;;  %v1913_v47 = vmul.f32 %v1912_v5, %v5552_v58  ;;  %v1837_v54 = vmul.f32 %v1836_v31, %v5461_v6 }
 0x333   : > { %v1735_v42 = vmul.f32 %v1734_v18, %v5661_v43  ;;  %v1764_v4 = vmul.f32 %v4039_v15, %v1763_v40  ;;  %v1875_v32 = vmul.f32 %v1874_v50, %v5534_v17  ;;  %v1947_v9 = vadd.f32 0.18741608, %v1946_v44  ;;  %v7254_v18 = vld [vmem:[#allocation41_spill] sm:$0xff] }
 0x334   : > { %vm1766_vm6 = vweird.f32 %v5772_v34  ;;  %v1799_v53 = vmul.f32 %v1798_v63, %v5450_v20  ;;  %4040 = vrsqrt.f32 %v5811_v16  ;;  %v1773_v59 = vor.u32 1.1754944e-38, %v1772_v27 }
 0x335   : > { %v3772_v19 = vclamps-f32 %v1735_v42, 1.0  ;;  %v1765_v57 = vadd.f32 %v4039_v15, %v1764_v4  ;;  %v1952_v35 = vadd.f32 0.001143296, %v1951_v60  ;;  %vm1768_vm7 = vmor %vm1766_vm6, %vm1767_vm5  ;;  %v860_v7 = vmul.f32 0.5, %v859_v29 }
 0x336   : > { %v5821_v43 = vadd.f32 1.0, %v1799_v53  ;;  %v1838_v28 = vadd.f32 0.4994258, %v1837_v54  ;;  %v1876_v25 = vadd.f32 0.112945676, %v1875_v32  ;;  %vm1771_vm8 = vcmp.eq.f32.partialorder %v1770_v41, 8.507059e+37 }
 0x337   : > { %v2705_v1 = vadd.f32 1.0, %v3772_v19  ;;  %v1769_v45 = vsel %vm1768_vm7, %v4039_v15, %v1765_v57  ;;  %v1914_v44 = vadd.f32 0.014752088, %v1913_v47  ;;  %v1789_v34 = vadd.f32 1.1283791, %v5667_v21 }
 0x338   : > { %v1829_v20 = vadd.f32 1.1283791, %v5671_v62  ;;  %v1774_v61 = vsel %vm1771_vm8, %v1773_v59, %v1769_v45  ;;  %4042 = vrcp.f32 %v5821_v43  ;;  %v1948_v5 = vmul.f32 %v1947_v9, %v5598_v48 }
 0x339   : > { %v2737_v51 = vmul.f32 %v2705_v1, %v5501_v12  ;;  %v1775_v38 = vmul.f32 %v1774_v61, %v5664_v14  ;;  %v1953_v33 = vmul.f32 %v1952_v35, %v5598_v48  ;;  %v861_v15 = vsub.f32 1.5, %v860_v7 }
 0x33a   : > { %v5830_v49 = vpop.eup %4040  ;;  %v1839_v41 = vmul.f32 %v1838_v28, %v5461_v6  ;;  %v1877_v21 = vmul.f32 %v1876_v25, %v5534_v17  ;;  %v1915_v62 = vmul.f32 %v1914_v44, %v5552_v58  ;;  %v1869_v27 = vadd.f32 1.1283791, %v5674_v11 }
 0x33b   : > { %v1909_v24 = vadd.f32 1.1283791, %v5677_v2  ;;  %2885 = vmatmul.f32.gmra.mxu0 %v2737_v51  ;;  %v3773_v31 = vclamps-f32 %v1775_v38, 1.0  ;;  %v870_v12 = vmul.f32 %v5830_v49, %v5811_v16  ;;  %v5840_v14 = vmul.f32 0.5, %v5476_v52  ;;  %v7255_v52 = vld [vmem:[#allocation42_spill] sm:$0xff] }
 0x33c   : > { %v5842_v50 = vadd.f32 1.0, %v1839_v41  ;;  %v1878_v60 = vadd.f32 0.4994258, %v1877_v21  ;;  %v1916_v6 = vadd.f32 0.112945676, %v1915_v62  ;;  %v1790_v2 = vmul.f32 %v1789_v34, %v7254_v18 }
 0x33d   : > { %v1949_v55 = vadd.f32 1.1283791, %v1948_v5  ;;  %v2706_v40 = vadd.f32 1.0, %v3773_v31  ;;  %v871_v29 = vmul.f32 %v5830_v49, %v870_v12  ;;  %v1954_v8 = vadd.f32 0.014752088, %v1953_v33 }
 0x33e   : > { %v4043_v11 = vpop.eup %4042  ;;  %v5847_v63 = vmul.f32 0.5, %v5513_v37  ;;  %v862_v47 = vmul.f32 %v5792_v3, %v861_v15  ;;  %4044 = vrcp.f32 %v5842_v50  ;;  %v5852_v42 = vmul.f32 %v1829_v20, %v7255_v52 }
 0x33f   : > { %v5855_v4 = vmul.f32 %v1869_v27, %v5510_v23  ;;  %v2738_v54 = vmul.f32 %v2706_v40, %v5516_v56  ;;  %v1802_v32 = vmul.f32 %v4043_v11, %v5821_v43  ;;  %v5860_v9 = vmul.f32 %v1909_v24, %v5537_v0 }
 0x340   : > { %v872_v53 = vmul.f32 0.5, %v871_v29  ;;  %v1879_v37 = vmul.f32 %v1878_v60, %v5534_v17  ;;  %v1917_v3 = vmul.f32 %v1916_v6, %v5552_v58  ;;  %v5865_v19 = vmul.f32 %v1949_v55, %v5583_v22 }
 0x341   : > { %2823 = vmatmul.f32.gmra.mxu3 %v2738_v54  ;;  %v1803_v57 = vsub.f32 1.0, %v1802_v32  ;;  %v1812_v23 = vand.u32 2147483648, %v5821_v43  ;;  %v1955_v59 = vmul.f32 %v1954_v8, %v5598_v48  ;;  %v863_v56 = vmul.f32 %v862_v47, %v5769_v10 }
 0x342   : > { %vm864_vm9 = vcmp.eq.f32.partialorder %v5769_v10, inf  ;;  %v5871_v0 = vadd.f32 1.0, %v1879_v37  ;;  %v1918_v35 = vadd.f32 0.4994258, %v1917_v3  ;;  %vm1807_vm10 = vweird.f32 %v4043_v11 }
 0x343   : > { %v1804_v7 = vmul.f32 %v4043_v11, %v1803_v57  ;;  %v1810_v17 = vand.u32 2147483647, %v5821_v43  ;;  %v1956_v28 = vadd.f32 0.112945676, %v1955_v59  ;;  %vm866_vm11 = vcmp.eq.f32.partialorder %v5769_v10, 0.0  ;;  %v1327_v59 = vpop.f32.mrf.mxu2 }
 0x344   : > { %v4045_v22 = vpop.eup %4044  ;;  %v867_v25 = vand.u32 2147483648, %v5769_v10  ;;  %v873_v1 = vsub.f32 1.5, %v872_v53  ;;  %v879_v45 = vand.u32 2147483648, %v5811_v16  ;;  %4046 = vrcp.f32 %v5871_v0 }
 0x345   : > { %v1805_v44 = vadd.f32 %v4043_v11, %v1804_v7  ;;  %vm1806_vm12 = vweird.f32 %v5821_v43  ;;  %v1813_v34 = vor.u32 1.1754944e-38, %v1812_v23  ;;  %v1842_v20 = vmul.f32 %v4045_v22, %v5842_v50 }
 0x346   : > { %vm1808_vm13 = vmor %vm1806_vm12, %vm1807_vm10  ;;  %v1850_v61 = vand.u32 2147483647, %v5842_v50  ;;  %v1852_v5 = vand.u32 2147483648, %v5842_v50  ;;  %v1919_v51 = vmul.f32 %v1918_v35, %v5552_v58  ;;  %v1957_v38 = vmul.f32 %v1956_v28, %v5598_v48  ;;  %v1262_v58 = vpop.f32.mrf.mxu1 }
 0x347   : > { %v865_v33 = vsel %vm864_vm9, %v5769_v10, %v863_v56  ;;  %v1809_v15 = vsel %vm1808_vm13, %v4043_v11, %v1805_v44  ;;  %vm1811_vm14 = vcmp.eq.f32.partialorder %v1810_v17, 8.507059e+37  ;;  %v1843_v41 = vsub.f32 1.0, %v1842_v20 }
 0x348   : > { %v1814_v43 = vsel %vm1811_vm14, %v1813_v34, %v1809_v15  ;;  %v874_v21 = vmul.f32 %v5830_v49, %v873_v1  ;;  %vm876_vm15 = vcmp.eq.f32.partialorder %v5811_v16, inf  ;;  %v5889_v62 = vadd.f32 1.0, %v1919_v51  ;;  %v7262_v15 = vld [vmem:[#allocation31_spill] sm:$0xff] }
 0x349   : > { %v1958_v27 = vadd.f32 0.4994258, %v1957_v38  ;;  %v1815_v24 = vmul.f32 %v1814_v43, %v1790_v2  ;;  %v1844_v31 = vmul.f32 %v4045_v22, %v1843_v41  ;;  %vm1846_vm0 = vweird.f32 %v5842_v50 }
 0x34a   : > { %vm1847_vm1 = vweird.f32 %v4045_v22  ;;  %v4047_v12 = vpop.eup %4046  ;;  %vm5892_vm2 = vcmp.eq.f32.partialorder %v1850_v61, 8.507059e+37  ;;  %v1853_v6 = vor.u32 1.1754944e-38, %v1852_v5  ;;  %vm1886_vm3 = vweird.f32 %v5871_v0  ;;  %v7265_v61 = vld [vmem:[#allocation29_spill] sm:$0xff] }
 0x34b   : > { %4048 = vrcp.f32 %v5889_v62  ;;  %v3774_v49 = vclamps-f32 %v1815_v24, 1.0  ;;  %v1845_v55 = vadd.f32 %v4045_v22, %v1844_v31  ;;  %v1882_v40 = vmul.f32 %v4047_v12, %v5871_v0  ;;  %vm1848_vm4 = vmor %vm1846_vm0, %vm1847_vm1 }
 0x34c   : > { %v1890_v29 = vand.u32 2147483647, %v5871_v0  ;;  %v875_v50 = vmul.f32 %v874_v21, %v5811_v16  ;;  %v1892_v8 = vand.u32 2147483648, %v5871_v0  ;;  %v1959_v11 = vmul.f32 %v1958_v27, %v5598_v48 }
 0x34d   : > { %v5904_v18 = vadd.f32 %v1262_v58, %v5078_v26  ;;  %v2707_v2 = vadd.f32 1.0, %v3774_v49  ;;  %v1849_v47 = vsel %vm1848_vm4, %v4045_v22, %v1845_v55  ;;  %v1883_v52 = vsub.f32 1.0, %v1882_v40 }
 0x34e   : > { %v868_v54 = vsel %vm866_vm11, %v867_v25, %v865_v33  ;;  %v1854_v32 = vsel %vm5892_vm2, %v1853_v6, %v1849_v47  ;;  %vm1887_vm5 = vweird.f32 %v4047_v12  ;;  %v5910_v53 = vadd.f32 1.0, %v1959_v11  ;;  %v1265_v43 = vpop.f32.mrf.mxu1 }
 0x34f   : > { %v5913_v37 = vmul.f32 0.70710677, %v5904_v18  ;;  %v2739_v48 = vmul.f32 %v2707_v2, %v5569_v30  ;;  %v1855_v3 = vmul.f32 %v1854_v32, %v5852_v42  ;;  %v1884_v57 = vmul.f32 %v4047_v12, %v1883_v52  ;;  %vm1888_vm7 = vmor %vm1886_vm3, %vm1887_vm5  ;;  %v1330_v2 = vpop.f32.mrf.mxu2 }
 0x350   : > { %v5917_v23 = vadd.f32 1e-06, %v868_v54  ;;  %vm5919_vm6 = vcmp.eq.f32.partialorder %v1890_v29, 8.507059e+37  ;;  %v1893_v35 = vor.u32 1.1754944e-38, %v1892_v8  ;;  %v1930_v7 = vand.u32 2147483647, %v5889_v62 }
 0x351   : > { %v4049_v56 = vpop.eup %4048  ;;  %4050 = vrcp.f32 %v5910_v53  ;;  %2888 = vmatmul.f32.gmra.mxu0 %v2739_v48  ;;  %v877_v30 = vsel %vm876_vm15, %v5811_v16, %v875_v50  ;;  %v3775_v42 = vclamps-f32 %v1855_v3, 1.0  ;;  %v1885_v17 = vadd.f32 %v4047_v12, %v1884_v57 }
 0x352   : > { %v1922_v28 = vmul.f32 %v4049_v56, %v5889_v62  ;;  %vm1926_vm8 = vweird.f32 %v5889_v62  ;;  %v1932_v22 = vand.u32 2147483648, %v5889_v62  ;;  %v1978_v25 = vmul.f32 %v5913_v37, %v5913_v37 }
 0x353   : > { %4052 = vrcp.f32 %v5917_v23  ;;  %vm878_vm9 = vcmp.eq.f32.partialorder %v5811_v16, 0.0  ;;  %v2708_v1 = vadd.f32 1.0, %v3775_v42  ;;  %v1889_v44 = vsel %vm1888_vm7, %v4047_v12, %v1885_v17 }
 0x354   : > { %v1923_v34 = vsub.f32 1.0, %v1922_v28  ;;  %v1970_v20 = vand.u32 2147483647, %v5910_v53  ;;  %v1894_v0 = vsel %vm5919_vm6, %v1893_v35, %v1889_v44  ;;  %vm1927_vm10 = vweird.f32 %v4049_v56 }
 0x355   : > { %vm5941_vm11 = vcmp.eq.f32.partialorder %v1930_v7, 8.507059e+37  ;;  %v5945_v5 = vmin.f32 %v1978_v25, 16.0  ;;  %v2740_v51 = vmul.f32 %v2708_v1, %v5576_v36  ;;  %v1895_v38 = vmul.f32 %v1894_v0, %v5855_v4  ;;  %vm1928_vm14 = vmor %vm1926_vm8, %vm1927_vm10 }
 0x356   : > { %v1924_v33 = vmul.f32 %v4049_v56, %v1923_v34  ;;  %v5950_v41 = vadd.f32 %v1327_v59, %v7262_v15  ;;  %v1933_v27 = vor.u32 1.1754944e-38, %v1932_v22  ;;  %vm1966_vm12 = vweird.f32 %v5910_v53 }
 0x357   : > { %v4051_v21 = vpop.eup %4050  ;;  %v1972_v24 = vand.u32 2147483648, %v5910_v53  ;;  %v1980_v31 = vmul.f32 2.1237322e-06, %v5945_v5  ;;  %2826 = vmatmul.f32.gmra.mxu3 %v2740_v51  ;;  %v3776_v58 = vclamps-f32 %v1895_v38, 1.0  ;;  %vm5956_vm13 = vcmp.eq.f32.partialorder %v1970_v20, 8.507059e+37  ;;  %v1268_v38 = vpop.f32.mrf.mxu1 }
 0x358   : > { %v1925_v12 = vadd.f32 %v4049_v56, %v1924_v33  ;;  %v1962_v36 = vmul.f32 %v4051_v21, %v5910_v53  ;;  %v1116_v6 = vand.u32 2147483647, %v5917_v23  ;;  %v1118_v49 = vand.u32 2147483648, %v5917_v23  ;;  %v1333_v33 = vpop.f32.mrf.mxu2 }
 0x359   : > { %v4053_v60 = vpop.eup %4052  ;;  %v5966_v55 = vmul.f32 0.70710677, %v5950_v41  ;;  %v5969_v40 = vadd.f32 %v1265_v43, %v5078_v26  ;;  %v2709_v29 = vadd.f32 1.0, %v3776_v58  ;;  %vm1967_vm15 = vweird.f32 %v4051_v21  ;;  %v7266_v43 = vld [vmem:[#allocation44_spill] sm:$0xff] }
 0x35a   : > { %v1929_v50 = vsel %vm1928_vm14, %v4049_v56, %v1925_v12  ;;  %v1963_v8 = vsub.f32 1.0, %v1962_v36  ;;  %v1108_v11 = vmul.f32 %v4053_v60, %v5917_v23  ;;  %v1981_v47 = vadd.f32 0.00028619796, %v1980_v31  ;;  %vm1968_vm1 = vmor %vm1966_vm12, %vm1967_vm15 }
 0x35b   : > { %v1934_v62 = vsel %vm5941_vm11, %v1933_v27, %v1929_v50  ;;  %v2018_v52 = vmul.f32 %v5966_v55, %v5966_v55  ;;  %v2741_v54 = vmul.f32 %v2709_v29, %v5840_v14  ;;  %vm1113_vm0 = vweird.f32 %v4053_v60 }
 0x35c   : > { %v1935_v32 = vmul.f32 %v1934_v62, %v5860_v9  ;;  %v1964_v48 = vmul.f32 %v4051_v21, %v1963_v8  ;;  %v1109_v3 = vsub.f32 1.0, %v1108_v11  ;;  %v5981_v59 = vmul.f32 0.70710677, %v5969_v40 }
 0x35d   : > { %v5978_v57 = vmin.f32 %v2018_v52, 16.0  ;;  %v880_v56 = vsel %vm878_vm9, %v879_v45, %v877_v30  ;;  %2891 = vmatmul.f32.gmra.mxu0 %v2741_v54  ;;  %v1973_v9 = vor.u32 1.1754944e-38, %v1972_v24  ;;  %vm1112_vm2 = vweird.f32 %v5917_v23 }
 0x35e   : > { %v3777_v10 = vclamps-f32 %v1935_v32, 1.0  ;;  %v1965_v35 = vadd.f32 %v4051_v21, %v1964_v48  ;;  %v1110_v7 = vmul.f32 %v4053_v60, %v1109_v3  ;;  %v5987_v14 = vadd.f32 1e-06, %v880_v56  ;;  %vm1114_vm3 = vmor %vm1112_vm2, %vm1113_vm0 }
 0x35f   : > { %v2020_v42 = vmul.f32 2.1237322e-06, %v5978_v57  ;;  %v2058_v17 = vmul.f32 %v5981_v59, %v5981_v59  ;;  %v1982_v22 = vmul.f32 %v1981_v47, %v5945_v5  ;;  %v1119_v53 = vor.u32 1.1754944e-38, %v1118_v49  ;;  %v1271_v56 = vpop.f32.mrf.mxu1 }
 0x360   : > { %v2710_v16 = vadd.f32 1.0, %v3777_v10  ;;  %v1969_v45 = vsel %vm1968_vm1, %v4051_v21, %v1965_v35  ;;  %v1111_v30 = vadd.f32 %v4053_v60, %v1110_v7  ;;  %4054 = vrcp.f32 %v5987_v14  ;;  %v1336_v10 = vpop.f32.mrf.mxu2 }
 0x361   : > { %v1974_v28 = vsel %vm5956_vm13, %v1973_v9, %v1969_v45  ;;  %v2021_v25 = vadd.f32 0.00028619796, %v2020_v42  ;;  %vm1117_vm4 = vcmp.eq.f32.partialorder %v1116_v6, 8.507059e+37  ;;  %v6003_v20 = vmin.f32 %v2058_v17, 16.0 }
 0x362   : > { %v2742_v23 = vmul.f32 %v2710_v16, %v5847_v63  ;;  %v1975_v1 = vmul.f32 %v1974_v28, %v5865_v19  ;;  %v1115_v44 = vsel %vm1114_vm3, %v4053_v60, %v1111_v30  ;;  %v1367_v21 = vmul.f32 0.5, %v7266_v43 }
 0x363   : > { %v1120_v34 = vsel %vm1117_vm4, %v1119_v53, %v1115_v44  ;;  %v1983_v27 = vadd.f32 0.0036580483, %v1982_v22  ;;  %v2022_v24 = vmul.f32 %v2021_v25, %v5978_v57  ;;  %v6010_v58 = vadd.f32 %v1330_v2, %v7262_v15 }
 0x364   : > { %2829 = vmatmul.f32.gmra.mxu3 %v2742_v23  ;;  %v3778_v0 = vclamps-f32 %v1975_v1, 1.0  ;;  %v1151_v51 = vmul.f32 %v1120_v34, %v7265_v61  ;;  %v6013_v12 = vadd.f32 %v1268_v38, %v5078_v26  ;;  %v2060_v36 = vmul.f32 2.1237322e-06, %v6003_v20  ;;  %v7268_v61 = vld [vmem:[#allocation30_spill] sm:$0xff] }
 0x365   : > { %v2023_v49 = vadd.f32 0.0036580483, %v2022_v24  ;;  %v6021_v29 = vadd.f32 %v1333_v33, %v7262_v15  ;;  %v1984_v50 = vmul.f32 %v1983_v27, %v5945_v5  ;;  %v6026_v11 = vmul.f32 0.70710677, %v6010_v58 }
 0x366   : > { %v4055_v31 = vpop.eup %4054  ;;  %v2711_v63 = vadd.f32 1.0, %v3778_v0  ;;  %v1168_v19 = vmul.f32 %v4874_v46, %v1151_v51  ;;  %v6029_v2 = vmul.f32 0.70710677, %v6013_v12  ;;  %v2061_v62 = vadd.f32 0.00028619796, %v2060_v36 }
 0x367   : > { %v1123_v4 = vmul.f32 %v4055_v31, %v5987_v14  ;;  %vm1128_vm5 = vweird.f32 %v4055_v31  ;;  %v1131_v47 = vand.u32 2147483647, %v5987_v14  ;;  %v1133_v52 = vand.u32 2147483648, %v5987_v14 }
 0x368   : > { %v2743_v60 = vmul.f32 %v2711_v63, %v1367_v21  ;;  %v6018_v6 = vadd.f32 %v4895_v13, %v1168_v19  ;;  %v2098_v32 = vmul.f32 %v6026_v11, %v6026_v11  ;;  %v2138_v48 = vmul.f32 %v6029_v2, %v6029_v2 }
 0x369   : > { %v1124_v8 = vsub.f32 1.0, %v1123_v4  ;;  %v6039_v3 = vmul.f32 0.70710677, %v6021_v29  ;;  %v2024_v35 = vmul.f32 %v2023_v49, %v5978_v57  ;;  %vm1127_vm6 = vweird.f32 %v5987_v14 }
 0x36a   : > { %7267 = vst [vmem:[#allocation35_spill] sm:$0xff] %v6018_v6  ;;  %2894 = vmatmul.f32.gmra.mxu0 %v2743_v60  ;;  %1282 = vmatmul.f32.gmra.mxu1 %v6018_v6  ;;  %v6044_v7 = vadd.f32 %v1271_v56, %v5078_v26  ;;  %v6046_v42 = vmin.f32 %v2098_v32, 16.0  ;;  %v6048_v17 = vmin.f32 %v2138_v48, 16.0  ;;  %v1985_v45 = vadd.f32 0.05243302, %v1984_v50  ;;  %vm1129_vm7 = vmor %vm1127_vm6, %vm1128_vm5 }
 0x36b   : > { %1347 = vmatmul.f32.gmra.mxu2 %v6018_v6  ;;  %v1125_v54 = vmul.f32 %v4055_v31, %v1124_v8  ;;  %v2178_v16 = vmul.f32 %v6039_v3, %v6039_v3  ;;  %vm1132_vm8 = vcmp.eq.f32.partialorder %v1131_v47, 8.507059e+37  ;;  %v1134_v30 = vor.u32 1.1754944e-38, %v1133_v52  ;;  %v1339_v8 = vpop.f32.mrf.mxu2 }
 0x36c   : > { %v6054_v28 = vmul.f32 0.70710677, %v6044_v7  ;;  %v2062_v14 = vmul.f32 %v2061_v62, %v6003_v20  ;;  %v2100_v53 = vmul.f32 2.1237322e-06, %v6046_v42  ;;  %v2140_v1 = vmul.f32 2.1237322e-06, %v6048_v17 }
 0x36d   : > { %v1126_v9 = vadd.f32 %v4055_v31, %v1125_v54  ;;  %v6058_v25 = vmin.f32 %v2178_v16, 16.0  ;;  %v6064_v34 = vadd.f32 %v1336_v10, %v7262_v15  ;;  %v2025_v0 = vadd.f32 0.05243302, %v2024_v35 }
 0x36e   : > { %v2218_v44 = vmul.f32 %v6054_v28, %v6054_v28  ;;  %v2101_v33 = vadd.f32 0.00028619796, %v2100_v53  ;;  %v1986_v21 = vmul.f32 %v1985_v45, %v5945_v5  ;;  %v2063_v27 = vadd.f32 0.0036580483, %v2062_v14 }
 0x36f   : > { %v1130_v22 = vsel %vm1129_vm7, %v4055_v31, %v1126_v9  ;;  %v2180_v38 = vmul.f32 2.1237322e-06, %v6058_v25  ;;  %v1274_v31 = vpop.f32.mrf.mxu1  ;;  %v2141_v63 = vadd.f32 0.00028619796, %v2140_v1  ;;  %v6074_v36 = vmul.f32 0.70710677, %v6064_v34 }
 0x370   : > { %v1135_v23 = vsel %vm1132_vm8, %v1134_v30, %v1130_v22  ;;  %v6068_v43 = vmin.f32 %v2218_v44, 16.0  ;;  %v6077_v4 = vadd.f32 %v1274_v31, %v5078_v26  ;;  %v2026_v60 = vmul.f32 %v2025_v0, %v5978_v57 }
 0x371   : > { %v1152_v51 = vmul.f32 %v1135_v23, %v7268_v61  ;;  %v2181_v50 = vadd.f32 0.00028619796, %v2180_v38  ;;  %v2102_v62 = vmul.f32 %v2101_v33, %v6046_v42  ;;  %v2258_v47 = vmul.f32 %v6074_v36, %v6074_v36 }
 0x372   : > { %v2220_v19 = vmul.f32 2.1237322e-06, %v6068_v43  ;;  %v1987_v52 = vadd.f32 0.18741608, %v1986_v21  ;;  %v2064_v54 = vmul.f32 %v2063_v27, %v6003_v20  ;;  %v6090_v32 = vmul.f32 0.70710677, %v6077_v4 }
 0x373   : > { %v1169_v24 = vmul.f32 %v4874_v46, %v1152_v51  ;;  %v6093_v48 = vmin.f32 %v2258_v47, 16.0  ;;  %v6096_v56 = vadd.f32 %v1339_v8, %v7262_v15  ;;  %v2027_v10 = vadd.f32 0.18741608, %v2026_v60 }
 0x374   : > { %v2221_v46 = vadd.f32 0.00028619796, %v2220_v19  ;;  %v2182_v35 = vmul.f32 %v2181_v50, %v6058_v25  ;;  %v2298_v9 = vmul.f32 %v6090_v32, %v6090_v32  ;;  %v6102_v16 = vmul.f32 0.5, %v5904_v18 }
 0x375   : > { %v6081_v49 = vadd.f32 %v4895_v13, %v1169_v24  ;;  %v2142_v13 = vmul.f32 %v2141_v63, %v6048_v17  ;;  %v2103_v45 = vadd.f32 0.0036580483, %v2102_v62  ;;  %v2260_v14 = vmul.f32 2.1237322e-06, %v6093_v48 }
 0x376   : > { %v2222_v30 = vmul.f32 %v2221_v46, %v6068_v43  ;;  %v1988_v22 = vmul.f32 %v1987_v52, %v5945_v5  ;;  %v6108_v53 = vmul.f32 0.5, %v5950_v41  ;;  %v2065_v23 = vadd.f32 0.05243302, %v2064_v54 }
 0x377   : > { %7269 = vst [vmem:[#allocation36_spill] sm:$0xff] %v6081_v49  ;;  %1285 = vmatmul.f32.gmra.mxu1 %v6081_v49  ;;  %1350 = vmatmul.f32.gmra.mxu2 %v6081_v49  ;;  %v6110_v1 = vmin.f32 %v2298_v9, 16.0  ;;  %v1277_v44 = vpop.f32.mrf.mxu1  ;;  %v2143_v0 = vadd.f32 0.0036580483, %v2142_v13  ;;  %v2261_v61 = vadd.f32 0.00028619796, %v2260_v14  ;;  %v2028_v38 = vmul.f32 %v2027_v10, %v5978_v57 }
 0x378   : > { %v6113_v51 = vmul.f32 0.70710677, %v6096_v56  ;;  %v6116_v18 = vadd.f32 %v1277_v44, %v5078_v26  ;;  %v6120_v33 = vmul.f32 0.5, %v5969_v40  ;;  %v2183_v21 = vadd.f32 0.0036580483, %v2182_v35  ;;  %v1342_v40 = vpop.f32.mrf.mxu2 }
 0x379   : > { %v2300_v41 = vmul.f32 2.1237322e-06, %v6110_v1  ;;  %v2104_v27 = vmul.f32 %v2103_v45, %v6046_v42  ;;  %v2223_v24 = vadd.f32 0.0036580483, %v2222_v30  ;;  %v2262_v31 = vmul.f32 %v2261_v61, %v6093_v48 }
 0x37a   : > { %7270 = vst [vmem:[#allocation37_spill] sm:$0xff] %v6116_v18  ;;  %v2338_v63 = vmul.f32 %v6113_v51, %v6113_v51  ;;  %v1989_v19 = vadd.f32 1.1283791, %v1988_v22  ;;  %v2066_v60 = vmul.f32 %v2065_v23, %v6003_v20  ;;  %v6129_v50 = vmul.f32 0.5, %v6010_v58 }
 0x37b   : > { %v2301_v8 = vadd.f32 0.00028619796, %v2300_v41  ;;  %v6132_v62 = vmul.f32 0.5, %v6013_v12  ;;  %v2144_v46 = vmul.f32 %v2143_v0, %v6048_v17  ;;  %v6138_v52 = vmul.f32 0.70710677, %v6116_v18 }
 0x37c   : > { %v6135_v47 = vmin.f32 %v2338_v63, 16.0  ;;  %v2029_v54 = vadd.f32 1.1283791, %v2028_v38  ;;  %v2184_v13 = vmul.f32 %v2183_v21, %v6058_v25  ;;  %v2263_v10 = vadd.f32 0.0036580483, %v2262_v31 }
 0x37d   : > { %v2302_v35 = vmul.f32 %v2301_v8, %v6110_v1  ;;  %v2105_v58 = vadd.f32 0.05243302, %v2104_v27  ;;  %v2224_v9 = vmul.f32 %v2223_v24, %v6068_v43  ;;  %v2378_v12 = vmul.f32 %v6138_v52, %v6138_v52 }
 0x37e   : > { %v2340_v45 = vmul.f32 2.1237322e-06, %v6135_v47  ;;  %v6147_v30 = vmul.f32 %v1989_v19, %v5913_v37  ;;  %v2067_v14 = vadd.f32 0.18741608, %v2066_v60  ;;  %v1991_v44 = vmul.f32 3.8918573e-05, %v5945_v5 }
 0x37f   : > { %v2303_v22 = vadd.f32 0.0036580483, %v2302_v35  ;;  %v2145_v0 = vadd.f32 0.05243302, %v2144_v46  ;;  %v6151_v61 = vmul.f32 0.5, %v6021_v29  ;;  %v6153_v21 = vmin.f32 %v2378_v12, 16.0 }
 0x380   : > { %v2341_v38 = vadd.f32 0.00028619796, %v2340_v45  ;;  %v2185_v41 = vadd.f32 0.05243302, %v2184_v13  ;;  %v2264_v27 = vmul.f32 %v2263_v10, %v6093_v48  ;;  %v6157_v24 = vadd.f32 %v1342_v40, %v7262_v15 }
 0x381   : > { %v1280_v23 = vpop.f32.mrf.mxu1  ;;  %v2106_v31 = vmul.f32 %v2105_v58, %v6046_v42  ;;  %v2225_v63 = vadd.f32 0.05243302, %v2224_v9  ;;  %v2380_v29 = vmul.f32 2.1237322e-06, %v6153_v21  ;;  %v6166_v60 = vmul.f32 %v2029_v54, %v5966_v55 }
 0x382   : > { %7271 = vst [vmem:[#allocation38_spill] sm:$0xff] %v6157_v24  ;;  %v6160_v37 = vadd.f32 %v1280_v23, %v5078_v26  ;;  %v2342_v19 = vmul.f32 %v2341_v38, %v6135_v47  ;;  %v6169_v8 = vmul.f32 0.5, %v6044_v7  ;;  %v2304_v46 = vmul.f32 %v2303_v22, %v6110_v1 }
 0x383   : > { %v6173_v40 = vmul.f32 0.70710677, %v6157_v24  ;;  %v2068_v13 = vmul.f32 %v2067_v14, %v6003_v20  ;;  %v2146_v10 = vmul.f32 %v2145_v0, %v6048_v17  ;;  %v2381_v58 = vadd.f32 0.00028619796, %v2380_v29 }
 0x384   : > { %7272 = vst [vmem:[#allocation40_spill] sm:$0xff] %v6160_v37  ;;  %v2343_v35 = vadd.f32 0.0036580483, %v2342_v19  ;;  %v2186_v9 = vmul.f32 %v2185_v41, %v6058_v25  ;;  %v2265_v45 = vadd.f32 0.05243302, %v2264_v27  ;;  %v2226_v22 = vmul.f32 %v2225_v63, %v6068_v43 }
 0x385   : > { %v2418_v55 = vmul.f32 %v6173_v40, %v6173_v40  ;;  %v6181_v7 = vmul.f32 0.70710677, %v6160_v37  ;;  %v2107_v12 = vadd.f32 0.18741608, %v2106_v31  ;;  %v1992_v14 = vadd.f32 0.001143296, %v1991_v44 }
 0x386   : > { %v2344_v23 = vmul.f32 %v2343_v35, %v6135_v47  ;;  %v2305_v38 = vadd.f32 0.05243302, %v2304_v46  ;;  %v2382_v0 = vmul.f32 %v2381_v58, %v6153_v21  ;;  %v2069_v27 = vadd.f32 1.1283791, %v2068_v13 }
 0x387   : > { %7273 = vst [vmem:[#allocation41_spill] sm:$0xff] %v6181_v7  ;;  %v1345_v54 = vpop.f32.mrf.mxu2  ;;  %v6186_v19 = vmin.f32 %v2418_v55, 16.0  ;;  %v2458_v41 = vmul.f32 %v6181_v7, %v6181_v7  ;;  %v6191_v29 = vmul.f32 0.5, %v6064_v34  ;;  %v1993_v31 = vmul.f32 %v1992_v14, %v5945_v5 }
 0x388   : > { %v6194_v49 = vadd.f32 %v1345_v54, %v7262_v15  ;;  %v2147_v63 = vadd.f32 0.18741608, %v2146_v10  ;;  %v2187_v35 = vadd.f32 0.18741608, %v2186_v9  ;;  %v2266_v44 = vmul.f32 %v2265_v45, %v6093_v48 }
 0x389   : > { %v2420_v46 = vmul.f32 2.1237322e-06, %v6186_v19  ;;  %v2108_v58 = vmul.f32 %v2107_v12, %v6046_v42  ;;  %v6201_v55 = vmul.f32 0.5, %v6077_v4  ;;  %v2345_v13 = vadd.f32 0.05243302, %v2344_v23 }
 0x38a   : > { %7274 = vst [vmem:[#allocation42_spill] sm:$0xff] %v6194_v49  ;;  %v1994_v6 = vadd.f32 0.014752088, %v1993_v31  ;;  %v2227_v34 = vadd.f32 0.18741608, %v2226_v22  ;;  %v2306_v39 = vmul.f32 %v2305_v38, %v6110_v1  ;;  %v6204_v37 = vmin.f32 %v2458_v41, 16.0 }
 0x38b   : > { %v2383_v54 = vadd.f32 0.0036580483, %v2382_v0  ;;  %v6207_v10 = vmul.f32 0.5, %v6096_v56  ;;  %v6210_v9 = vmul.f32 0.70710677, %v6194_v49  ;;  %v2148_v4 = vmul.f32 %v2147_v63, %v6048_v17 }
 0x38c   : > { %v1995_v45 = vmul.f32 %v1994_v6, %v5945_v5  ;;  %v2031_v12 = vmul.f32 3.8918573e-05, %v5978_v57  ;;  %v2188_v23 = vmul.f32 %v2187_v35, %v6058_v25  ;;  %v2267_v22 = vadd.f32 0.18741608, %v2266_v44 }
 0x38d   : > { %7275 = vst [vmem:[#allocation29_spill] sm:$0xff] %v6210_v9  ;;  %v2421_v14 = vadd.f32 0.00028619796, %v2420_v46  ;;  %v2109_v38 = vadd.f32 1.1283791, %v2108_v58  ;;  %v2346_v0 = vmul.f32 %v2345_v13, %v6135_v47  ;;  %v2228_v56 = vmul.f32 %v2227_v34, %v6068_v43 }
 0x38e   : > { %v1996_v41 = vadd.f32 0.112945676, %v1995_v45  ;;  %v2032_v31 = vadd.f32 0.001143296, %v2031_v12  ;;  %v2307_v7 = vadd.f32 0.18741608, %v2306_v39  ;;  %v2384_v49 = vmul.f32 %v2383_v54, %v6153_v21 }
 0x38f   : > { %v2460_v6 = vmul.f32 2.1237322e-06, %v6204_v37  ;;  %v2498_v15 = vmul.f32 %v6210_v9, %v6210_v9  ;;  %v2071_v44 = vmul.f32 3.8918573e-05, %v6003_v20  ;;  %v2149_v46 = vadd.f32 1.1283791, %v2148_v4 }
 0x390   : > { %v1997_v63 = vmul.f32 %v1996_v41, %v5945_v5  ;;  %v2033_v35 = vmul.f32 %v2032_v31, %v5978_v57  ;;  %v2189_v58 = vadd.f32 1.1283791, %v2188_v23  ;;  %v2268_v13 = vmul.f32 %v2267_v22, %v6093_v48 }
 0x391   : > { %v2422_v34 = vmul.f32 %v2421_v14, %v6186_v19  ;;  %v6228_v39 = vmul.f32 %v2069_v27, %v5981_v59  ;;  %v2347_v54 = vadd.f32 0.18741608, %v2346_v0  ;;  %v2229_v24 = vadd.f32 1.1283791, %v2228_v56  ;;  %v4156_v0 = vld [vmem:[#allocation11] sm:$0xff] }
 0x392   : > { %v1998_v45 = vadd.f32 0.4994258, %v1997_v63  ;;  %v2034_v12 = vadd.f32 0.014752088, %v2033_v35  ;;  %v2308_v9 = vmul.f32 %v2307_v7, %v6110_v1  ;;  %v2385_v41 = vadd.f32 0.05243302, %v2384_v49  ;;  %v2812_v49 = vpop.f32.mrf.mxu3 }
 0x393   : > { %v2461_v18 = vadd.f32 0.00028619796, %v2460_v6  ;;  %v6231_v31 = vmin.f32 %v2498_v15, 16.0  ;;  %v2072_v22 = vadd.f32 0.001143296, %v2071_v44  ;;  %v6236_v14 = vmul.f32 %v2109_v38, %v6026_v11 }
 0x394   : > { %v1999_v4 = vmul.f32 %v1998_v45, %v5945_v5  ;;  %v2035_v23 = vmul.f32 %v2034_v12, %v5978_v57  ;;  %v2269_v59 = vadd.f32 1.1283791, %v2268_v13  ;;  %v2423_v27 = vadd.f32 0.0036580483, %v2422_v34 }
 0x395   : > { %v6238_v63 = vperm.slane %v4156_v0, 3  ;;  %v2348_v56 = vmul.f32 %v2347_v54, %v6135_v47  ;;  %v2073_v6 = vmul.f32 %v2072_v22, %v6003_v20  ;;  %v2309_v5 = vadd.f32 1.1283791, %v2308_v9 }
 0x396   : > { %v6241_v7 = vadd.f32 1.0, %v1999_v4  ;;  %v2036_v15 = vadd.f32 0.112945676, %v2035_v23  ;;  %v2386_v35 = vmul.f32 %v2385_v41, %v6153_v21  ;;  %v2462_v44 = vmul.f32 %v2461_v18, %v6204_v37 }
 0x397   : > { %v2111_v11 = vmul.f32 3.8918573e-05, %v6046_v42  ;;  %v6248_v38 = vmul.f32 %v2149_v46, %v6029_v2  ;;  %v6251_v13 = vmul.f32 %v2189_v58, %v6039_v3  ;;  %v2500_v34 = vmul.f32 2.1237322e-06, %v6231_v31  ;;  %v2877_v46 = vpop.f32.mrf.mxu0 }
 0x398   : > { %4056 = vrcp.f32 %v6241_v7  ;;  %v6256_v54 = vmul.f32 %v2229_v24, %v6054_v28  ;;  %v2424_v9 = vmul.f32 %v2423_v27, %v6186_v19  ;;  %v2813_v45 = vadd.f32 %v2812_v49, %v6238_v63 }
 0x399   : > { %v2037_v18 = vmul.f32 %v2036_v15, %v5978_v57  ;;  %v6262_v12 = vmul.f32 %v2269_v59, %v6074_v36  ;;  %v2349_v2 = vadd.f32 1.1283791, %v2348_v56  ;;  %v2074_v3 = vadd.f32 0.014752088, %v2073_v6 }
 0x39a   : > { %v2112_v58 = vadd.f32 0.001143296, %v2111_v11  ;;  %v6265_v41 = vmul.f32 %v2309_v5, %v6090_v32  ;;  %v2387_v4 = vadd.f32 0.18741608, %v2386_v35  ;;  %v2463_v23 = vadd.f32 0.0036580483, %v2462_v44 }
 0x39b   : > { %v2038_v28 = vadd.f32 0.4994258, %v2037_v18  ;;  %v2501_v24 = vadd.f32 0.00028619796, %v2500_v34  ;;  %v2075_v22 = vmul.f32 %v2074_v3, %v6003_v20  ;;  %v2151_v0 = vmul.f32 3.8918573e-05, %v6048_v17 }
 0x39c   : > { %v2113_v27 = vmul.f32 %v2112_v58, %v6046_v42  ;;  %v2425_v49 = vadd.f32 0.05243302, %v2424_v9  ;;  %v2878_v36 = vadd.f32 %v2877_v46, %v2813_v45  ;;  %v2191_v56 = vmul.f32 3.8918573e-05, %v6058_v25  ;;  %v7276_v3 = vld [vmem:[#allocation22_spill] sm:$0xff] }
 0x39d   : > { %v2039_v59 = vmul.f32 %v2038_v28, %v5978_v57  ;;  %v6273_v32 = vmul.f32 %v2349_v2, %v6113_v51  ;;  %v2076_v6 = vadd.f32 0.112945676, %v2075_v22  ;;  %v2152_v35 = vadd.f32 0.001143296, %v2151_v0 }
 0x39e   : > { %v4057_v15 = vpop.eup %4056  ;;  %v2114_v5 = vadd.f32 0.014752088, %v2113_v27  ;;  %v6276_v44 = vmul.f32 %v2387_v4, %v6153_v21  ;;  %v2010_v34 = vand.u32 2147483647, %v6241_v7  ;;  %v2012_v9 = vand.u32 2147483648, %v6241_v7 }
 0x39f   : > { %v2002_v11 = vmul.f32 %v4057_v15, %v6241_v7  ;;  %v6281_v45 = vadd.f32 1.0, %v2039_v59  ;;  %v2077_v57 = vmul.f32 %v2076_v6, %v6003_v20  ;;  %v2153_v51 = vmul.f32 %v2152_v35, %v6048_v17 }
 0x3a0   : > { %v2115_v18 = vmul.f32 %v2114_v5, %v6046_v42  ;;  %v2464_v2 = vmul.f32 %v2463_v23, %v6204_v37  ;;  %v6288_v58 = vadd.f32 %v2878_v36, %v7276_v3  ;;  %v2192_v4 = vadd.f32 0.001143296, %v2191_v56  ;;  %v2880_v56 = vpop.f32.mrf.mxu0 }
 0x3a1   : > { %v2003_v46 = vsub.f32 1.0, %v2002_v11  ;;  %v6291_v28 = vmul.f32 %v2425_v49, %v6186_v19  ;;  %v6294_v22 = vmul.f32 %v2501_v24, %v6231_v31  ;;  %vm2006_vm9 = vweird.f32 %v6241_v7 }
 0x3a2   : > { %4058 = vrcp.f32 %v6281_v45  ;;  %vm2007_vm10 = vweird.f32 %v4057_v15  ;;  %v2078_v59 = vadd.f32 0.4994258, %v2077_v57  ;;  %2941 = vadd.xlane.f32.xlu2 %v6288_v58  ;;  %vm6300_vm11 = vcmp.eq.f32.partialorder %v2010_v34, 8.507059e+37 }
 0x3a3   : > { %v2004_v0 = vmul.f32 %v4057_v15, %v2003_v46  ;;  %v2013_v49 = vor.u32 1.1754944e-38, %v2012_v9  ;;  %v2116_v24 = vadd.f32 0.112945676, %v2115_v18  ;;  %v2154_v6 = vadd.f32 0.014752088, %v2153_v51  ;;  %vm2008_vm12 = vmor %vm2006_vm9, %vm2007_vm10 }
 0x3a4   : > { %v2079_v35 = vmul.f32 %v2078_v59, %v6003_v20  ;;  %v2193_v46 = vmul.f32 %v2192_v4, %v6058_v25  ;;  %v2050_v57 = vand.u32 2147483647, %v6281_v45  ;;  %v2231_v9 = vmul.f32 3.8918573e-05, %v6068_v43  ;;  %v7279_v20 = vld [vmem:[#allocation23_spill] sm:$0xff] }
 0x3a5   : > { %v2815_v27 = vpop.f32.mrf.mxu3  ;;  %v2005_v5 = vadd.f32 %v4057_v15, %v2004_v0  ;;  %v2117_v34 = vmul.f32 %v2116_v24, %v6046_v42  ;;  %v2155_v3 = vmul.f32 %v2154_v6, %v6048_v17  ;;  %v2052_v18 = vand.u32 2147483648, %v6281_v45 }
 0x3a6   : > { %v2816_v23 = vadd.f32 %v2815_v27, %v6238_v63  ;;  %v6313_v51 = vadd.f32 1.0, %v2079_v35  ;;  %vm2046_vm13 = vweird.f32 %v6281_v45  ;;  %vm6327_vm14 = vcmp.eq.f32.partialorder %v2050_v57, 8.507059e+37 }
 0x3a7   : > { %v2009_v27 = vsel %vm2008_vm12, %v4057_v15, %v2005_v5  ;;  %v2118_v59 = vadd.f32 0.4994258, %v2117_v34  ;;  %v2232_v15 = vadd.f32 0.001143296, %v2231_v9  ;;  %v6324_v5 = vadd.f32 0.05243302, %v2464_v2 }
 0x3a8   : > { %v2881_v11 = vadd.f32 %v2880_v56, %v2816_v23  ;;  %v4059_v4 = vpop.eup %4058  ;;  %v2014_v7 = vsel %vm6300_vm11, %v2013_v49, %v2009_v27  ;;  %v2156_v23 = vadd.f32 0.112945676, %v2155_v3  ;;  %v2194_v56 = vadd.f32 0.014752088, %v2193_v46 }
 0x3a9   : > { %v2015_v24 = vmul.f32 %v2014_v7, %v6147_v30  ;;  %v2042_v6 = vmul.f32 %v4059_v4, %v6281_v45  ;;  %4060 = vrcp.f32 %v6313_v51  ;;  %v2119_v36 = vmul.f32 %v2118_v59, %v6046_v42 }
 0x3aa   : > { %v6316_v0 = vadd.f32 %v2881_v11, %v7279_v20  ;;  %v2053_v30 = vor.u32 1.1754944e-38, %v2052_v18  ;;  %v2157_v46 = vmul.f32 %v2156_v23, %v6048_v17  ;;  %vm2047_vm15 = vweird.f32 %v4059_v4 }
 0x3ab   : > { %v3779_v49 = vclamps-f32 %v2015_v24, 1.0  ;;  %v2043_v11 = vsub.f32 1.0, %v2042_v6  ;;  %v2090_v34 = vand.u32 2147483647, %v6313_v51  ;;  %v6334_v3 = vadd.f32 1.0, %v2119_v36  ;;  %vm2048_vm1 = vmor %vm2046_vm13, %vm2047_vm15 }
 0x3ac   : > { %7280 = vst [vmem:[#allocation44_spill] sm:$0xff] %v6316_v0  ;;  %2943 = vadd.xlane.f32.xlu0 %v6316_v0  ;;  %v2195_v9 = vmul.f32 %v2194_v56, %v6058_v25  ;;  %v2158_v20 = vadd.f32 0.4994258, %v2157_v46  ;;  %v2233_v7 = vmul.f32 %v2232_v15, %v6068_v43  ;;  %v2092_v42 = vand.u32 2147483648, %v6313_v51 }
 0x3ad   : > { %v2818_v2 = vpop.f32.mrf.mxu3  ;;  %v2712_v27 = vadd.f32 1.0, %v3779_v49  ;;  %v2044_v57 = vmul.f32 %v4059_v4, %v2043_v11  ;;  %4062 = vrcp.f32 %v6334_v3  ;;  %v2271_v59 = vmul.f32 3.8918573e-05, %v6093_v48 }
 0x3ae   : > { %v2819_v18 = vadd.f32 %v2818_v2, %v6238_v63  ;;  %vm2086_vm0 = vweird.f32 %v6313_v51  ;;  %v2159_v56 = vmul.f32 %v2158_v20, %v6048_v17  ;;  %vm6349_vm2 = vcmp.eq.f32.partialorder %v2090_v34, 8.507059e+37  ;;  %v2883_v2 = vpop.f32.mrf.mxu0 }
 0x3af   : > { %v4061_v23 = vpop.eup %4060  ;;  %v2744_v24 = vmul.f32 %v2712_v27, %v6102_v16  ;;  %v2045_v6 = vadd.f32 %v4059_v4, %v2044_v57  ;;  %v2130_v49 = vand.u32 2147483647, %v6334_v3  ;;  %v2132_v11 = vand.u32 2147483648, %v6334_v3 }
 0x3b0   : > { %v2082_v15 = vmul.f32 %v4061_v23, %v6313_v51  ;;  %v6355_v46 = vadd.f32 1.0, %v2159_v56  ;;  %v2196_v17 = vadd.f32 0.112945676, %v2195_v9  ;;  %v2234_v27 = vadd.f32 0.014752088, %v2233_v7 }
 0x3b1   : > { %2832 = vmatmul.f32.gmra.mxu3 %v2744_v24  ;;  %v2049_v16 = vsel %vm2048_vm1, %v4059_v4, %v2045_v6  ;;  %v2093_v20 = vor.u32 1.1754944e-38, %v2092_v42  ;;  %v2884_v34 = vadd.f32 %v2883_v2, %v2819_v18  ;;  %vm2087_vm3 = vweird.f32 %v4061_v23 }
 0x3b2   : > { %v2054_v45 = vsel %vm6327_vm14, %v2053_v30, %v2049_v16  ;;  %v2083_v57 = vsub.f32 1.0, %v2082_v15  ;;  %vm2126_vm4 = vweird.f32 %v6334_v3  ;;  %4064 = vrcp.f32 %v6355_v46  ;;  %v7287_v15 = vld [vmem:[#allocation24_spill] sm:$0xff]  ;;  %vm2088_vm6 = vmor %vm2086_vm0, %vm2087_vm3 }
 0x3b3   : > { %v2055_v0 = vmul.f32 %v2054_v45, %v6166_v60  ;;  %v4063_v24 = vpop.eup %4062  ;;  %v2197_v6 = vmul.f32 %v2196_v17, %v6058_v25  ;;  %v2235_v9 = vmul.f32 %v2234_v27, %v6068_v43  ;;  %v2272_v7 = vadd.f32 0.001143296, %v2271_v59 }
 0x3b4   : > { %v2084_v4 = vmul.f32 %v4061_v23, %v2083_v57  ;;  %v2122_v35 = vmul.f32 %v4063_v24, %v6334_v3  ;;  %vm6365_vm5 = vcmp.eq.f32.partialorder %v2130_v49, 8.507059e+37  ;;  %v2133_v60 = vor.u32 1.1754944e-38, %v2132_v11 }
 0x3b5   : > { %v3780_v56 = vclamps-f32 %v2055_v0, 1.0  ;;  %v2198_v18 = vadd.f32 0.4994258, %v2197_v6  ;;  %v6370_v16 = vadd.f32 %v2884_v34, %v7287_v15  ;;  %v2311_v2 = vmul.f32 3.8918573e-05, %v6110_v1 }
 0x3b6   : > { %v2085_v42 = vadd.f32 %v4061_v23, %v2084_v4  ;;  %v2123_v0 = vsub.f32 1.0, %v2122_v35  ;;  %v2170_v59 = vand.u32 2147483647, %v6355_v46  ;;  %v2236_v49 = vadd.f32 0.112945676, %v2235_v9  ;;  %v2821_v9 = vpop.f32.mrf.mxu3 }
 0x3b7   : > { %v2713_v45 = vadd.f32 1.0, %v3780_v56  ;;  %vm2127_vm7 = vweird.f32 %v4063_v24  ;;  %v2199_v11 = vmul.f32 %v2198_v18, %v6058_v25  ;;  %2945 = vadd.xlane.f32.xlu1 %v6370_v16  ;;  %v2273_v27 = vmul.f32 %v2272_v7, %v6093_v48 }
 0x3b8   : > { %v2089_v17 = vsel %vm2088_vm6, %v4061_v23, %v2085_v42  ;;  %v4065_v57 = vpop.eup %4064  ;;  %v2124_v51 = vmul.f32 %v4063_v24, %v2123_v0  ;;  %v2237_v6 = vmul.f32 %v2236_v49, %v6068_v43  ;;  %vm2166_vm8 = vweird.f32 %v6355_v46  ;;  %vm2128_vm9 = vmor %vm2126_vm4, %vm2127_vm7 }
 0x3b9   : > { %v2745_v34 = vmul.f32 %v2713_v45, %v6108_v53  ;;  %v2094_v4 = vsel %vm6349_vm2, %v2093_v20, %v2089_v17  ;;  %v2162_v23 = vmul.f32 %v4065_v57, %v6355_v46  ;;  %v6387_v25 = vadd.f32 1.0, %v2199_v11 }
 0x3ba   : > { %v2095_v56 = vmul.f32 %v2094_v4, %v6228_v39  ;;  %v2125_v7 = vadd.f32 %v4063_v24, %v2124_v51  ;;  %v2172_v35 = vand.u32 2147483648, %v6355_v46  ;;  %v2238_v53 = vadd.f32 0.4994258, %v2237_v6  ;;  %v2886_v4 = vpop.f32.mrf.mxu0 }
 0x3bb   : > { %2897 = vmatmul.f32.gmra.mxu0 %v2745_v34  ;;  %v2312_v42 = vadd.f32 0.001143296, %v2311_v2  ;;  %v2163_v20 = vsub.f32 1.0, %v2162_v23  ;;  %4066 = vrcp.f32 %v6387_v25  ;;  %v2274_v39 = vadd.f32 0.014752088, %v2273_v27 }
 0x3bc   : > { %v3781_v36 = vclamps-f32 %v2095_v56, 1.0  ;;  %v2129_v18 = vsel %vm2128_vm9, %v4063_v24, %v2125_v7  ;;  %vm6394_vm10 = vcmp.eq.f32.partialorder %v2170_v59, 8.507059e+37  ;;  %v2239_v45 = vmul.f32 %v2238_v53, %v6068_v43 }
 0x3bd   : > { %v2822_v0 = vadd.f32 %v2821_v9, %v6238_v63  ;;  %v2134_v2 = vsel %vm6365_vm5, %v2133_v60, %v2129_v18  ;;  %v2164_v17 = vmul.f32 %v4065_v57, %v2163_v20  ;;  %vm2167_vm11 = vweird.f32 %v4065_v57  ;;  %v7292_v18 = vld [vmem:[#allocation25_spill] sm:$0xff] }
 0x3be   : > { %v2714_v49 = vadd.f32 1.0, %v3781_v36  ;;  %v2135_v3 = vmul.f32 %v2134_v2, %v6236_v14  ;;  %v2173_v11 = vor.u32 1.1754944e-38, %v2172_v35  ;;  %v2210_v27 = vand.u32 2147483647, %v6387_v25  ;;  %vm2168_vm12 = vmor %vm2166_vm8, %vm2167_vm11 }
 0x3bf   : > { %v6404_v24 = vadd.f32 1.0, %v2239_v45  ;;  %v2165_v34 = vadd.f32 %v4065_v57, %v2164_v17  ;;  %v2275_v43 = vmul.f32 %v2274_v39, %v6093_v48  ;;  %v2313_v51 = vmul.f32 %v2312_v42, %v6110_v1 }
 0x3c0   : > { %v2746_v59 = vmul.f32 %v2714_v49, %v6120_v33  ;;  %v3782_v6 = vclamps-f32 %v2135_v3, 1.0  ;;  %v2887_v14 = vadd.f32 %v2886_v4, %v2822_v0  ;;  %v2351_v30 = vmul.f32 3.8918573e-05, %v6135_v47 }
 0x3c1   : > { %4068 = vrcp.f32 %v6404_v24  ;;  %v4067_v60 = vpop.eup %4066  ;;  %v2169_v56 = vsel %vm2168_vm12, %v4065_v57, %v2165_v34  ;;  %v2212_v33 = vand.u32 2147483648, %v6387_v25  ;;  %v2276_v23 = vadd.f32 0.112945676, %v2275_v43 }
 0x3c2   : > { %2835 = vmatmul.f32.gmra.mxu3 %v2746_v59  ;;  %v2314_v9 = vadd.f32 0.014752088, %v2313_v51  ;;  %v2715_v7 = vadd.f32 1.0, %v3782_v6  ;;  %v2174_v35 = vsel %vm6394_vm10, %v2173_v11, %v2169_v56  ;;  %v2202_v53 = vmul.f32 %v4067_v60, %v6387_v25 }
 0x3c3   : > { %vm2206_vm13 = vweird.f32 %v6387_v25  ;;  %v2175_v46 = vmul.f32 %v2174_v35, %v6248_v38  ;;  %vm6419_vm14 = vcmp.eq.f32.partialorder %v2210_v27, 8.507059e+37  ;;  %v2250_v57 = vand.u32 2147483647, %v6404_v24 }
 0x3c4   : > { %v2277_v36 = vmul.f32 %v2276_v23, %v6093_v48  ;;  %v2747_v20 = vmul.f32 %v2715_v7, %v6129_v50  ;;  %v2203_v39 = vsub.f32 1.0, %v2202_v53  ;;  %v6427_v15 = vadd.f32 %v2887_v14, %v7292_v18  ;;  %v2824_v23 = vpop.f32.mrf.mxu3 }
 0x3c5   : > { %v2315_v45 = vmul.f32 %v2314_v9, %v6110_v1  ;;  %v3783_v0 = vclamps-f32 %v2175_v46, 1.0  ;;  %v2213_v49 = vor.u32 1.1754944e-38, %v2212_v33  ;;  %v2352_v38 = vadd.f32 0.001143296, %v2351_v30 }
 0x3c6   : > { %v2278_v2 = vadd.f32 0.4994258, %v2277_v36  ;;  %2900 = vmatmul.f32.gmra.mxu0 %v2747_v20  ;;  %v2204_v3 = vmul.f32 %v4067_v60, %v2203_v39  ;;  %vm2207_vm15 = vweird.f32 %v4067_v60  ;;  %2947 = vadd.xlane.f32.xlu2 %v6427_v15  ;;  %v2391_v27 = vmul.f32 3.8918573e-05, %v6153_v21 }
 0x3c7   : > { %v4069_v17 = vpop.eup %4068  ;;  %v2316_v11 = vadd.f32 0.112945676, %v2315_v45  ;;  %v2716_v50 = vadd.f32 1.0, %v3783_v0  ;;  %v2252_v34 = vand.u32 2147483648, %v6404_v24  ;;  %v2353_v6 = vmul.f32 %v2352_v38, %v6135_v47  ;;  %vm2208_vm0 = vmor %vm2206_vm13, %vm2207_vm15 }
 0x3c8   : > { %v2242_v59 = vmul.f32 %v4069_v17, %v6404_v24  ;;  %v2279_v4 = vmul.f32 %v2278_v2, %v6093_v48  ;;  %v2205_v43 = vadd.f32 %v4067_v60, %v2204_v3  ;;  %v2431_v14 = vmul.f32 3.8918573e-05, %v6186_v19 }
 0x3c9   : > { %v2317_v51 = vmul.f32 %v2316_v11, %v6110_v1  ;;  %v2748_v30 = vmul.f32 %v2716_v50, %v6132_v62  ;;  %v2392_v9 = vadd.f32 0.001143296, %v2391_v27  ;;  %v2825_v48 = vadd.f32 %v2824_v23, %v6238_v63 }
 0x3ca   : > { %v2243_v56 = vsub.f32 1.0, %v2242_v59  ;;  %v6441_v33 = vadd.f32 1.0, %v2279_v4  ;;  %v2209_v7 = vsel %vm2208_vm0, %v4067_v60, %v2205_v43  ;;  %v2354_v53 = vadd.f32 0.014752088, %v2353_v6  ;;  %v7293_v6 = vld [vmem:[#allocation26_spill] sm:$0xff] }
 0x3cb   : > { %v2318_v35 = vadd.f32 0.4994258, %v2317_v51  ;;  %2838 = vmatmul.f32.gmra.mxu3 %v2748_v30  ;;  %v2214_v46 = vsel %vm6419_vm14, %v2213_v49, %v2209_v7  ;;  %vm2247_vm1 = vweird.f32 %v4069_v17  ;;  %vm2246_vm2 = vweird.f32 %v6404_v24 }
 0x3cc   : > { %v2244_v36 = vmul.f32 %v4069_v17, %v2243_v56  ;;  %4070 = vrcp.f32 %v6441_v33  ;;  %v2215_v62 = vmul.f32 %v2214_v46, %v6251_v13  ;;  %v2432_v20 = vadd.f32 0.001143296, %v2431_v14  ;;  %vm2248_vm4 = vmor %vm2246_vm2, %vm2247_vm1 }
 0x3cd   : > { %v2319_v25 = vmul.f32 %v2318_v35, %v6110_v1  ;;  %vm2251_vm3 = vcmp.eq.f32.partialorder %v2250_v57, 8.507059e+37  ;;  %v2355_v18 = vmul.f32 %v2354_v53, %v6135_v47  ;;  %v2393_v45 = vmul.f32 %v2392_v9, %v6153_v21 }
 0x3ce   : > { %v2245_v60 = vadd.f32 %v4069_v17, %v2244_v36  ;;  %v2889_v39 = vpop.f32.mrf.mxu0  ;;  %v3784_v42 = vclamps-f32 %v2215_v62, 1.0  ;;  %v2253_v0 = vor.u32 1.1754944e-38, %v2252_v34  ;;  %v2290_v13 = vand.u32 2147483647, %v6441_v33 }
 0x3cf   : > { %v6452_v49 = vadd.f32 1.0, %v2319_v25  ;;  %v2890_v2 = vadd.f32 %v2889_v39, %v2825_v48  ;;  %v2356_v24 = vadd.f32 0.112945676, %v2355_v18  ;;  %v2394_v3 = vadd.f32 0.014752088, %v2393_v45 }
 0x3d0   : > { %v2249_v38 = vsel %vm2248_vm4, %v4069_v17, %v2245_v60  ;;  %v2717_v1 = vadd.f32 1.0, %v3784_v42  ;;  %v2433_v57 = vmul.f32 %v2432_v20, %v6186_v19  ;;  %v6458_v50 = vadd.f32 0.0036580483, %v6294_v22 }
 0x3d1   : > { %v2254_v11 = vsel %vm2251_vm3, %v2253_v0, %v2249_v38  ;;  %4072 = vrcp.f32 %v6452_v49  ;;  %v2292_v34 = vand.u32 2147483648, %v6441_v33  ;;  %v2357_v17 = vmul.f32 %v2356_v24, %v6135_v47 }
 0x3d2   : > { %v4071_v27 = vpop.eup %4070  ;;  %v2255_v59 = vmul.f32 %v2254_v11, %v6256_v54  ;;  %v6464_v4 = vadd.f32 0.18741608, %v6291_v28  ;;  %v2749_v43 = vmul.f32 %v2717_v1, %v6151_v61  ;;  %v6469_v14 = vadd.f32 %v2890_v2, %v7293_v6 }
 0x3d3   : > { %v2282_v51 = vmul.f32 %v4071_v27, %v6441_v33  ;;  %vm2286_vm5 = vweird.f32 %v6441_v33  ;;  %vm6472_vm6 = vcmp.eq.f32.partialorder %v2290_v13, 8.507059e+37  ;;  %v2358_v54 = vadd.f32 0.4994258, %v2357_v17 }
 0x3d4   : > { %v3785_v30 = vclamps-f32 %v2255_v59, 1.0  ;;  %2903 = vmatmul.f32.gmra.mxu0 %v2749_v43  ;;  %2949 = vadd.xlane.f32.xlu0 %v6469_v14  ;;  %v2395_v28 = vmul.f32 %v2394_v3, %v6153_v21  ;;  %v2434_v61 = vadd.f32 0.014752088, %v2433_v57  ;;  %v2471_v23 = vmul.f32 3.8918573e-05, %v6204_v37 }
 0x3d5   : > { %v2283_v56 = vsub.f32 1.0, %v2282_v51  ;;  %vm2287_vm7 = vweird.f32 %v4071_v27  ;;  %v2293_v7 = vor.u32 1.1754944e-38, %v2292_v34  ;;  %v2359_v35 = vmul.f32 %v2358_v54, %v6135_v47 }
 0x3d6   : > { %v2718_v9 = vadd.f32 1.0, %v3785_v30  ;;  %v2396_v46 = vadd.f32 0.112945676, %v2395_v28  ;;  %v2435_v36 = vmul.f32 %v2434_v61, %v6186_v19  ;;  %v2472_v62 = vadd.f32 0.001143296, %v2471_v23  ;;  %vm2288_vm9 = vmor %vm2286_vm5, %vm2287_vm7  ;;  %v7298_v23 = vld [vmem:[#allocation27_spill] sm:$0xff] }
 0x3d7   : > { %v4073_v48 = vpop.eup %4072  ;;  %v2284_v53 = vmul.f32 %v4071_v27, %v2283_v56  ;;  %vm2326_vm8 = vweird.f32 %v6452_v49  ;;  %v6484_v60 = vadd.f32 1.0, %v2359_v35  ;;  %v2330_v18 = vand.u32 2147483647, %v6452_v49 }
 0x3d8   : > { %v2750_v25 = vmul.f32 %v2718_v9, %v6169_v8  ;;  %v2322_v20 = vmul.f32 %v4073_v48, %v6452_v49  ;;  %v2397_v45 = vmul.f32 %v2396_v46, %v6153_v21  ;;  %v2436_v47 = vadd.f32 0.112945676, %v2435_v36 }
 0x3d9   : > { %v2285_v39 = vadd.f32 %v4071_v27, %v2284_v53  ;;  %4074 = vrcp.f32 %v6484_v60  ;;  %v2473_v8 = vmul.f32 %v2472_v62, %v6204_v37  ;;  %v2511_v0 = vmul.f32 3.8918573e-05, %v6231_v31 }
 0x3da   : > { %2841 = vmatmul.f32.gmra.mxu3 %v2750_v25  ;;  %v2323_v42 = vsub.f32 1.0, %v2322_v20  ;;  %v2332_v38 = vand.u32 2147483648, %v6452_v49  ;;  %v2398_v13 = vadd.f32 0.4994258, %v2397_v45  ;;  %v2827_v24 = vpop.f32.mrf.mxu3  ;;  %v2437_v3 = vmul.f32 %v2436_v47, %v6186_v19  ;;  %v2892_v34 = vpop.f32.mrf.mxu0 }
 0x3db   : > { %v2289_v2 = vsel %vm2288_vm9, %v4071_v27, %v2285_v39  ;;  %vm2327_vm10 = vweird.f32 %v4073_v48  ;;  %v2828_v33 = vadd.f32 %v2827_v24, %v6238_v63  ;;  %vm6500_vm11 = vcmp.eq.f32.partialorder %v2330_v18, 8.507059e+37 }
 0x3dc   : > { %v2294_v1 = vsel %vm6472_vm6, %v2293_v7, %v2289_v2  ;;  %v2324_v11 = vmul.f32 %v4073_v48, %v2323_v42  ;;  %v2399_v27 = vmul.f32 %v2398_v13, %v6153_v21  ;;  %v2438_v17 = vadd.f32 0.4994258, %v2437_v3  ;;  %vm2328_vm12 = vmor %vm2326_vm8, %vm2327_vm10 }
 0x3dd   : > { %v2295_v57 = vmul.f32 %v2294_v1, %v6262_v12  ;;  %v2893_v51 = vadd.f32 %v2892_v34, %v2828_v33  ;;  %v2474_v6 = vadd.f32 0.014752088, %v2473_v8  ;;  %v2512_v30 = vadd.f32 0.001143296, %v2511_v0 }
 0x3de   : > { %v2325_v43 = vadd.f32 %v4073_v48, %v2324_v11  ;;  %v2333_v54 = vor.u32 1.1754944e-38, %v2332_v38  ;;  %v6507_v56 = vadd.f32 1.0, %v2399_v27  ;;  %v2439_v12 = vmul.f32 %v2438_v17, %v6186_v19 }
 0x3df   : > { %v3786_v22 = vclamps-f32 %v2295_v57, 1.0  ;;  %v4075_v28 = vpop.eup %4074  ;;  %v6511_v9 = vadd.f32 %v2893_v51, %v7298_v23  ;;  %v2475_v21 = vmul.f32 %v2474_v6, %v6204_v37  ;;  %v2513_v7 = vmul.f32 %v2512_v30, %v6231_v31 }
 0x3e0   : > { %v2329_v61 = vsel %vm2328_vm12, %v4073_v48, %v2325_v43  ;;  %v2389_v35 = vadd.f32 1.1283791, %v6276_v44  ;;  %v2362_v46 = vmul.f32 %v4075_v28, %v6484_v60  ;;  %v2466_v36 = vmul.f32 %v6324_v5, %v6204_v37 }
 0x3e1   : > { %v2719_v53 = vadd.f32 1.0, %v3786_v22  ;;  %v2334_v49 = vsel %vm6500_vm11, %v2333_v54, %v2329_v61  ;;  %v2504_v48 = vmul.f32 %v6458_v50, %v6231_v31  ;;  %4076 = vrcp.f32 %v6507_v56  ;;  %2951 = vadd.xlane.f32.xlu1 %v6511_v9 }
 0x3e2   : > { %v2335_v62 = vmul.f32 %v2334_v49, %v6265_v41  ;;  %v2428_v44 = vmul.f32 %v6464_v4, %v6186_v19  ;;  %v2363_v20 = vsub.f32 1.0, %v2362_v46  ;;  %v6529_v39 = vadd.f32 1.0, %v2439_v12 }
 0x3e3   : > { %v2751_v25 = vmul.f32 %v2719_v53, %v6191_v29  ;;  %v2372_v5 = vand.u32 2147483648, %v6484_v60  ;;  %v2476_v45 = vadd.f32 0.112945676, %v2475_v21  ;;  %v2514_v47 = vadd.f32 0.014752088, %v2513_v7 }
 0x3e4   : > { %v3787_v18 = vclamps-f32 %v2335_v62, 1.0  ;;  %v2364_v50 = vmul.f32 %v4075_v28, %v2363_v20  ;;  %vm2367_vm13 = vweird.f32 %v4075_v28  ;;  %v2370_v41 = vand.u32 2147483647, %v6484_v60 }
 0x3e5   : > { %2906 = vmatmul.f32.gmra.mxu0 %v2751_v25  ;;  %4078 = vrcp.f32 %v6529_v39  ;;  %v6535_v42 = vmul.f32 %v2389_v35, %v6138_v52  ;;  %v2467_v19 = vadd.f32 0.18741608, %v2466_v36  ;;  %v2477_v4 = vmul.f32 %v2476_v45, %v6204_v37 }
 0x3e6   : > { %v2720_v29 = vadd.f32 1.0, %v3787_v18  ;;  %v2505_v8 = vadd.f32 0.05243302, %v2504_v48  ;;  %v2365_v0 = vadd.f32 %v4075_v28, %v2364_v50  ;;  %vm2366_vm14 = vweird.f32 %v6484_v60  ;;  %v7299_v48 = vld [vmem:[#allocation28_spill] sm:$0xff] }
 0x3e7   : > { %v2830_v2 = vpop.f32.mrf.mxu3  ;;  %v2515_v38 = vmul.f32 %v2514_v47, %v6231_v31  ;;  %v4077_v13 = vpop.eup %4076  ;;  %v2429_v24 = vadd.f32 1.1283791, %v2428_v44  ;;  %vm2368_vm15 = vmor %vm2366_vm14, %vm2367_vm13  ;;  %v2373_v1 = vor.u32 1.1754944e-38, %v2372_v5  ;;  %v2478_v52 = vadd.f32 0.4994258, %v2477_v4 }
 0x3e8   : > { %v2752_v3 = vmul.f32 %v2720_v29, %v6201_v55  ;;  %v2369_v11 = vsel %vm2368_vm15, %v4075_v28, %v2365_v0  ;;  %vm2371_vm0 = vcmp.eq.f32.partialorder %v2370_v41, 8.507059e+37  ;;  %v2402_v33 = vmul.f32 %v4077_v13, %v6507_v56  ;;  %v2895_v6 = vpop.f32.mrf.mxu0  ;;  %v1283_v46 = vpop.f32.mrf.mxu1 }
 0x3e9   : > { %v2831_v57 = vadd.f32 %v2830_v2, %v6238_v63  ;;  %v2374_v59 = vsel %vm2371_vm0, %v2373_v1, %v2369_v11  ;;  %v2412_v60 = vand.u32 2147483648, %v6507_v56  ;;  %v2479_v27 = vmul.f32 %v2478_v52, %v6204_v37 }
 0x3ea   : > { %2844 = vmatmul.f32.gmra.mxu3 %v2752_v3  ;;  %v2516_v34 = vadd.f32 0.112945676, %v2515_v38  ;;  %v2468_v55 = vmul.f32 %v2467_v19, %v6204_v37  ;;  %v2375_v43 = vmul.f32 %v2374_v59, %v6273_v32  ;;  %v2403_v51 = vsub.f32 1.0, %v2402_v33  ;;  %v7300_v38 = vld [vmem:[#allocation37_spill] sm:$0xff] }
 0x3eb   : > { %v4079_v17 = vpop.eup %4078  ;;  %vm2406_vm1 = vweird.f32 %v6507_v56  ;;  %v6550_v22 = vadd.f32 1.0, %v2479_v27  ;;  %v2896_v54 = vadd.f32 %v2895_v6, %v2831_v57  ;;  %vm2407_vm2 = vweird.f32 %v4077_v13 }
 0x3ec   : > { %v2442_v30 = vmul.f32 %v4079_v17, %v6529_v39  ;;  %v2517_v12 = vmul.f32 %v2516_v34, %v6231_v31  ;;  %v3788_v28 = vclamps-f32 %v2375_v43, 1.0  ;;  %v2404_v61 = vmul.f32 %v4077_v13, %v2403_v51  ;;  %vm2408_vm3 = vmor %vm2406_vm1, %vm2407_vm2 }
 0x3ed   : > { %v2410_v23 = vand.u32 2147483647, %v6507_v56  ;;  %v2413_v21 = vor.u32 1.1754944e-38, %v2412_v60  ;;  %v2450_v32 = vand.u32 2147483647, %v6529_v39  ;;  %4080 = vrcp.f32 %v6550_v22 }
 0x3ee   : > { %v2443_v37 = vsub.f32 1.0, %v2442_v30  ;;  %v2721_v7 = vadd.f32 1.0, %v3788_v28  ;;  %v2405_v35 = vadd.f32 %v4077_v13, %v2404_v61  ;;  %v2452_v53 = vand.u32 2147483648, %v6529_v39  ;;  %v1348_v59 = vpop.f32.mrf.mxu2 }
 0x3ef   : > { %v2518_v49 = vadd.f32 0.4994258, %v2517_v12  ;;  %vm2447_vm4 = vweird.f32 %v4079_v17  ;;  %v6560_v62 = vadd.f32 %v2896_v54, %v7299_v48  ;;  %v6563_v44 = vadd.f32 %v1283_v46, %v5078_v26 }
 0x3f0   : > { %v2444_v36 = vmul.f32 %v4079_v17, %v2443_v37  ;;  %v2753_v25 = vmul.f32 %v2721_v7, %v6207_v10  ;;  %v2409_v20 = vsel %vm2408_vm3, %v4077_v13, %v2405_v35  ;;  %vm2411_vm5 = vcmp.eq.f32.partialorder %v2410_v23, 8.507059e+37 }
 0x3f1   : > { %v2519_v18 = vmul.f32 %v2518_v49, %v6231_v31  ;;  %v2414_v5 = vsel %vm2411_vm5, %v2413_v21, %v2409_v20  ;;  %vm2446_vm6 = vweird.f32 %v6529_v39  ;;  %2953 = vadd.xlane.f32.xlu2 %v6560_v62  ;;  %v6570_v56 = vmul.f32 0.70710677, %v6563_v44 }
 0x3f2   : > { %v2445_v45 = vadd.f32 %v4079_v17, %v2444_v36  ;;  %v2506_v47 = vmul.f32 %v2505_v8, %v6231_v31  ;;  %2909 = vmatmul.f32.gmra.mxu0 %v2753_v25  ;;  %v2415_v50 = vmul.f32 %v2414_v5, %v6535_v42  ;;  %vm2448_vm7 = vmor %vm2446_vm6, %vm2447_vm4  ;;  %v2453_v10 = vor.u32 1.1754944e-38, %v2452_v53 }
 0x3f3   : > { %v6575_v41 = vadd.f32 1.0, %v2519_v18  ;;  %v4081_v19 = vpop.eup %4080  ;;  %v2430_v29 = vmul.f32 %v2429_v24, %v6173_v40  ;;  %vm2451_vm8 = vcmp.eq.f32.partialorder %v2450_v32, 8.507059e+37  ;;  %v2538_v39 = vmul.f32 %v6570_v56, %v6570_v56  ;;  %v7303_v32 = vld [vmem:[#allocation41_spill] sm:$0xff] }
 0x3f4   : > { %v2449_v4 = vsel %vm2448_vm7, %v4079_v17, %v2445_v45  ;;  %v3789_v0 = vclamps-f32 %v2415_v50, 1.0  ;;  %v2482_v8 = vmul.f32 %v4081_v19, %v6550_v22  ;;  %v1378_v13 = vmul.f32 0.5, %v7300_v38  ;;  %v7301_v17 = vld [vmem:[#allocation38_spill] sm:$0xff]  ;;  %v1286_v21 = vpop.f32.mrf.mxu1  ;;  %v7304_v50 = vld [vmem:[#allocation40_spill] sm:$0xff] }
 0x3f5   : > { %v2454_v2 = vsel %vm2451_vm8, %v2453_v10, %v2449_v4  ;;  %4082 = vrcp.f32 %v6575_v41  ;;  %v2507_v3 = vadd.f32 0.18741608, %v2506_v47  ;;  %v6583_v11 = vmin.f32 %v2538_v39, 16.0 }
 0x3f6   : > { %v2455_v42 = vmul.f32 %v2454_v2, %v2430_v29  ;;  %v2722_v1 = vadd.f32 1.0, %v3789_v0  ;;  %v2483_v52 = vsub.f32 1.0, %v2482_v8  ;;  %v2469_v40 = vadd.f32 1.1283791, %v2468_v55  ;;  %v7302_v55 = vld [vmem:[#allocation31_spill] sm:$0xff] }
 0x3f7   : > { %v2490_v33 = vand.u32 2147483647, %v6550_v22  ;;  %v2492_v57 = vand.u32 2147483648, %v6550_v22  ;;  %vm2487_vm9 = vweird.f32 %v4081_v19  ;;  %v2540_v34 = vmul.f32 2.1237322e-06, %v6583_v11 }
 0x3f8   : > { %v3790_v24 = vclamps-f32 %v2455_v42, 1.0  ;;  %v2754_v60 = vmul.f32 %v2722_v1, %v1378_v13  ;;  %v2484_v27 = vmul.f32 %v4081_v19, %v2483_v52  ;;  %v1379_v43 = vmul.f32 0.5, %v7301_v17  ;;  %v7305_v13 = vld [vmem:[#allocation29_spill] sm:$0xff] }
 0x3f9   : > { %v2508_v6 = vmul.f32 %v2507_v3, %v6231_v31  ;;  %vm2486_vm10 = vweird.f32 %v6550_v22  ;;  %v6592_v54 = vadd.f32 %v1348_v59, %v7302_v55  ;;  %v2493_v61 = vor.u32 1.1754944e-38, %v2492_v57 }
 0x3fa   : > { %v2723_v51 = vadd.f32 1.0, %v3790_v24  ;;  %2847 = vmatmul.f32.gmra.mxu3 %v2754_v60  ;;  %v2485_v30 = vadd.f32 %v4081_v19, %v2484_v27  ;;  %vm2488_vm11 = vmor %vm2486_vm10, %vm2487_vm9  ;;  %v2541_v23 = vadd.f32 0.00028619796, %v2540_v34  ;;  %v2551_v37 = vmul.f32 3.8918573e-05, %v6583_v11  ;;  %v1351_v0 = vpop.f32.mrf.mxu2 }
 0x3fb   : > { %v4083_v12 = vpop.eup %4082  ;;  %v2470_v7 = vmul.f32 %v2469_v40, %v7303_v32  ;;  %vm2491_vm12 = vcmp.eq.f32.partialorder %v2490_v33, 8.507059e+37  ;;  %v6598_v46 = vmul.f32 0.70710677, %v6592_v54  ;;  %v6601_v36 = vadd.f32 %v1286_v21, %v5078_v26 }
 0x3fc   : > { %v2755_v28 = vmul.f32 %v2723_v51, %v1379_v43  ;;  %v2489_v35 = vsel %vm2488_vm11, %v4081_v19, %v2485_v30  ;;  %v2522_v31 = vmul.f32 %v4083_v12, %v6575_v41  ;;  %v2509_v48 = vadd.f32 1.1283791, %v2508_v6  ;;  %v7306_v43 = vld [vmem:[#allocation42_spill] sm:$0xff] }
 0x3fd   : > { %v2494_v53 = vsel %vm2491_vm12, %v2493_v61, %v2489_v35  ;;  %v2532_v25 = vand.u32 2147483648, %v6575_v41  ;;  %v2542_v20 = vmul.f32 %v2541_v23, %v6583_v11  ;;  %v2552_v18 = vadd.f32 0.001143296, %v2551_v37 }
 0x3fe   : > { %2912 = vmatmul.f32.gmra.mxu0 %v2755_v28  ;;  %v2495_v22 = vmul.f32 %v2494_v53, %v2470_v7  ;;  %v2523_v49 = vsub.f32 1.0, %v2522_v31  ;;  %vm2527_vm13 = vweird.f32 %v4083_v12  ;;  %v2530_v47 = vand.u32 2147483647, %v6575_v41 }
 0x3ff   : > { %v1380_v10 = vmul.f32 0.5, %v7304_v50  ;;  %vm2526_vm14 = vweird.f32 %v6575_v41  ;;  %v2553_v19 = vmul.f32 %v2552_v18, %v6583_v11  ;;  %v2578_v4 = vmul.f32 %v6598_v46, %v6598_v46 }
 0x400   : > { %v3791_v5 = vclamps-f32 %v2495_v22, 1.0  ;;  %v2524_v45 = vmul.f32 %v4083_v12, %v2523_v49  ;;  %v6612_v39 = vmul.f32 0.70710677, %v6601_v36  ;;  %vm2528_vm15 = vmor %vm2526_vm14, %vm2527_vm13  ;;  %v2533_v2 = vor.u32 1.1754944e-38, %v2532_v25 }
 0x401   : > { %v2543_v8 = vadd.f32 0.0036580483, %v2542_v20  ;;  %v2554_v38 = vadd.f32 0.014752088, %v2553_v19  ;;  %v2510_v42 = vmul.f32 %v2509_v48, %v7305_v13  ;;  %vm2531_vm0 = vcmp.eq.f32.partialorder %v2530_v47, 8.507059e+37 }
 0x402   : > { %v2724_v29 = vadd.f32 1.0, %v3791_v5  ;;  %v2525_v26 = vadd.f32 %v4083_v12, %v2524_v45  ;;  %v6616_v52 = vadd.f32 %v1351_v0, %v7302_v55  ;;  %v6619_v33 = vmin.f32 %v2578_v4, 16.0 }
 0x403   : > { %v2555_v40 = vmul.f32 %v2554_v38, %v6583_v11  ;;  %v2618_v57 = vmul.f32 %v6612_v39, %v6612_v39  ;;  %v2544_v59 = vmul.f32 %v2543_v8, %v6583_v11  ;;  %v1381_v51 = vmul.f32 0.5, %v7306_v43 }
 0x404   : > { %v2756_v3 = vmul.f32 %v2724_v29, %v1380_v10  ;;  %v2529_v1 = vsel %vm2528_vm15, %v4083_v12, %v2525_v26  ;;  %v6625_v34 = vmul.f32 0.70710677, %v6616_v52  ;;  %v2580_v30 = vmul.f32 2.1237322e-06, %v6619_v33 }
 0x405   : > { %v2534_v41 = vsel %vm2531_vm0, %v2533_v2, %v2529_v1  ;;  %v2556_v60 = vadd.f32 0.112945676, %v2555_v40  ;;  %v6630_v55 = vmin.f32 %v2618_v57, 16.0  ;;  %v2545_v12 = vadd.f32 0.05243302, %v2544_v59 }
 0x406   : > { %2850 = vmatmul.f32.gmra.mxu3 %v2756_v3  ;;  %v2535_v24 = vmul.f32 %v2534_v41, %v2510_v42  ;;  %v2658_v23 = vmul.f32 %v6625_v34, %v6625_v34  ;;  %v2581_v37 = vadd.f32 0.00028619796, %v2580_v30  ;;  %v2591_v48 = vmul.f32 3.8918573e-05, %v6619_v33 }
 0x407   : > { %v2557_v17 = vmul.f32 %v2556_v60, %v6583_v11  ;;  %v2620_v32 = vmul.f32 2.1237322e-06, %v6630_v55  ;;  %v2546_v7 = vmul.f32 %v2545_v12, %v6583_v11  ;;  %v2631_v45 = vmul.f32 3.8918573e-05, %v6630_v55 }
 0x408   : > { %v3792_v27 = vclamps-f32 %v2535_v24, 1.0  ;;  %v6637_v31 = vmin.f32 %v2658_v23, 16.0  ;;  %v2582_v53 = vmul.f32 %v2581_v37, %v6619_v33  ;;  %v2592_v5 = vadd.f32 0.001143296, %v2591_v48 }
 0x409   : > { %v2558_v28 = vadd.f32 0.4994258, %v2557_v17  ;;  %v2621_v22 = vadd.f32 0.00028619796, %v2620_v32  ;;  %v2547_v49 = vadd.f32 0.18741608, %v2546_v7 }
 0x40a   : > { %v2725_v6 = vadd.f32 1.0, %v3792_v27  ;;  %v2660_v25 = vmul.f32 2.1237322e-06, %v6637_v31  ;;  %v2583_v20 = vadd.f32 0.0036580483, %v2582_v53  ;;  %v2593_v29 = vmul.f32 %v2592_v5, %v6619_v33 }
 0x40b   : > { %v2559_v21 = vmul.f32 %v2558_v28, %v6583_v11  ;;  %v2622_v18 = vmul.f32 %v2621_v22, %v6630_v55  ;;  %v2548_v50 = vmul.f32 %v2547_v49, %v6583_v11  ;;  %v2632_v26 = vadd.f32 0.001143296, %v2631_v45 }
 0x40c   : > { %v2757_v61 = vmul.f32 %v2725_v6, %v1381_v51  ;;  %v2661_v19 = vadd.f32 0.00028619796, %v2660_v25  ;;  %v2584_v4 = vmul.f32 %v2583_v20, %v6619_v33  ;;  %v2594_v13 = vadd.f32 0.014752088, %v2593_v29 }
 0x40d   : > { %v2560_v35 = vadd.f32 1.0, %v2559_v21  ;;  %v2623_v0 = vadd.f32 0.0036580483, %v2622_v18  ;;  %v2549_v8 = vadd.f32 1.1283791, %v2548_v50  ;;  %v2633_v42 = vmul.f32 %v2632_v26, %v6630_v55 }
 0x40e   : > { %2915 = vmatmul.f32.gmra.mxu0 %v2757_v61  ;;  %v2671_v41 = vmul.f32 3.8918573e-05, %v6637_v31  ;;  %v2662_v11 = vmul.f32 %v2661_v19, %v6637_v31  ;;  %v2595_v40 = vmul.f32 %v2594_v13, %v6619_v33  ;;  %v2585_v27 = vadd.f32 0.05243302, %v2584_v4 }
 0x40f   : > { %4084 = vrcp.f32 %v2560_v35  ;;  %v2572_v38 = vand.u32 2147483648, %v2560_v35  ;;  %v2570_v1 = vand.u32 2147483647, %v2560_v35  ;;  %v2634_v24 = vadd.f32 0.014752088, %v2633_v42 }
 0x410   : > { %v2624_v57 = vmul.f32 %v2623_v0, %v6630_v55  ;;  %vm2566_vm2 = vweird.f32 %v2560_v35  ;;  %v2672_v60 = vadd.f32 0.001143296, %v2671_v41  ;;  %v2596_v43 = vadd.f32 0.112945676, %v2595_v40 }
 0x411   : > { %v2573_v17 = vor.u32 1.1754944e-38, %v2572_v38  ;;  %v2635_v51 = vmul.f32 %v2634_v24, %v6630_v55  ;;  %v2550_v6 = vmul.f32 %v2549_v8, %v6570_v56  ;;  %vm2571_vm4 = vcmp.eq.f32.partialorder %v2570_v1, 8.507059e+37 }
 0x412   : > { %v2673_v12 = vmul.f32 %v2672_v60, %v6637_v31  ;;  %v2663_v28 = vadd.f32 0.0036580483, %v2662_v11  ;;  %v2597_v23 = vmul.f32 %v2596_v43, %v6619_v33  ;;  %v2625_v37 = vadd.f32 0.05243302, %v2624_v57 }
 0x413   : > { %v2636_v21 = vadd.f32 0.112945676, %v2635_v51  ;;  %v2586_v56 = vmul.f32 %v2585_v27, %v6619_v33  ;;  %v1382_v18 = vmul.f32 0.5, %v6563_v44 }
 0x414   : > { %v2674_v7 = vadd.f32 0.014752088, %v2673_v12  ;;  %v2664_v48 = vmul.f32 %v2663_v28, %v6637_v31  ;;  %v2626_v5 = vmul.f32 %v2625_v37, %v6630_v55 }
 0x415   : > { %v4085_v47 = vpop.eup %4084  ;;  %v2637_v53 = vmul.f32 %v2636_v21, %v6630_v55  ;;  %v2587_v26 = vadd.f32 0.18741608, %v2586_v56  ;;  %v7307_v56 = vld [vmem:[#allocation32_spill] sm:$0xff] }
 0x416   : > { %v2562_v10 = vmul.f32 %v4085_v47, %v2560_v35  ;;  %vm2567_vm1 = vweird.f32 %v4085_v47  ;;  %v2598_v35 = vadd.f32 0.4994258, %v2597_v23  ;;  %v2675_v49 = vmul.f32 %v2674_v7, %v6637_v31 }
 0x417   : > { %vm2568_vm3 = vmor %vm2566_vm2, %vm2567_vm1  ;;  %v2638_v20 = vadd.f32 0.4994258, %v2637_v53  ;;  %v2665_v4 = vadd.f32 0.05243302, %v2664_v48  ;;  %v2627_v0 = vadd.f32 0.18741608, %v2626_v5  ;;  %v2588_v44 = vmul.f32 %v2587_v26, %v6619_v33 }
 0x418   : > { %v2563_v2 = vsub.f32 1.0, %v2562_v10  ;;  %v2599_v25 = vmul.f32 %v2598_v35, %v6619_v33 }
 0x419   : > { %v2639_v10 = vmul.f32 %v2638_v20, %v6630_v55  ;;  %v2666_v38 = vmul.f32 %v2665_v4, %v6637_v31  ;;  %v2628_v42 = vmul.f32 %v2627_v0, %v6630_v55  ;;  %v2589_v11 = vadd.f32 1.1283791, %v2588_v44 }
 0x41a   : > { %v2564_v3 = vmul.f32 %v4085_v47, %v2563_v2  ;;  %v2600_v50 = vadd.f32 1.0, %v2599_v25 }
 0x41b   : > { %v2640_v2 = vadd.f32 1.0, %v2639_v10  ;;  %v2667_v40 = vadd.f32 0.18741608, %v2666_v38  ;;  %v2629_v57 = vadd.f32 1.1283791, %v2628_v42  ;;  %v2590_v55 = vmul.f32 %v2589_v11, %v6598_v46 }
 0x41c   : > { %v2565_v59 = vadd.f32 %v4085_v47, %v2564_v3  ;;  %4086 = vrcp.f32 %v2600_v50  ;;  %v2612_v27 = vand.u32 2147483648, %v2600_v50  ;;  %v2610_v51 = vand.u32 2147483647, %v2600_v50 }
 0x41d   : > { %4088 = vrcp.f32 %v2640_v2  ;;  %v2630_v12 = vmul.f32 %v2629_v57, %v6612_v39  ;;  %vm2606_vm6 = vweird.f32 %v2600_v50  ;;  %v2650_v7 = vand.u32 2147483647, %v2640_v2 }
 0x41e   : > { %v2569_v30 = vsel %vm2568_vm3, %v4085_v47, %v2565_v59  ;;  %v2676_v47 = vadd.f32 0.112945676, %v2675_v49  ;;  %v2613_v37 = vor.u32 1.1754944e-38, %v2612_v27  ;;  %vm2611_vm9 = vcmp.eq.f32.partialorder %v2610_v51, 8.507059e+37  ;;  %v7308_v27 = vld [vmem:[#allocation33_spill] sm:$0xff] }
 0x41f   : > { %v2574_v61 = vsel %vm2571_vm4, %v2573_v17, %v2569_v30  ;;  %vm2646_vm10 = vweird.f32 %v2640_v2  ;;  %vm2651_vm12 = vcmp.eq.f32.partialorder %v2650_v7, 8.507059e+37 }
 0x420   : > { %v2575_v32 = vmul.f32 %v2574_v61, %v2550_v6  ;;  %v2677_v29 = vmul.f32 %v2676_v47, %v6637_v31  ;;  %v2668_v6 = vmul.f32 %v2667_v40, %v6637_v31  ;;  %v2652_v61 = vand.u32 2147483648, %v2640_v2 }
 0x422   : > { %v3793_v22 = vclamps-f32 %v2575_v32, 1.0  ;;  %v2678_v8 = vadd.f32 0.4994258, %v2677_v29  ;;  %v4087_v3 = vpop.eup %4086  ;;  %v2653_v25 = vor.u32 1.1754944e-38, %v2652_v61  ;;  %v1383_v29 = vmul.f32 0.5, %v6592_v54  ;;  %v7310_v61 = vld [vmem:[#allocation39_spill] sm:$0xff] }
 0x423   : > { %v2602_v41 = vmul.f32 %v4087_v3, %v2600_v50  ;;  %v4089_v24 = vpop.eup %4088  ;;  %vm2607_vm5 = vweird.f32 %v4087_v3 }
 0x424   : > { %v2726_v45 = vadd.f32 1.0, %v3793_v22  ;;  %v2679_v13 = vmul.f32 %v2678_v8, %v6637_v31  ;;  %v2642_v33 = vmul.f32 %v4089_v24, %v2640_v2  ;;  %vm2608_vm7 = vmor %vm2606_vm6, %vm2607_vm5  ;;  %vm2647_vm8 = vweird.f32 %v4089_v24 }
 0x425   : > { %v2603_v59 = vsub.f32 1.0, %v2602_v41  ;;  %v2669_v22 = vadd.f32 1.1283791, %v2668_v6  ;;  %vm2648_vm11 = vmor %vm2646_vm10, %vm2647_vm8 }
 0x426   : > { %v2758_v19 = vmul.f32 %v2726_v45, %v1382_v18  ;;  %v6669_v1 = vadd.f32 1.0, %v2679_v13  ;;  %v2643_v30 = vsub.f32 1.0, %v2642_v33  ;;  %v1384_v13 = vmul.f32 0.5, %v6601_v36 }
 0x427   : > { %v2604_v43 = vmul.f32 %v4087_v3, %v2603_v59  ;;  %v2670_v8 = vmul.f32 %v2669_v22, %v6625_v34 }
 0x428   : > { %2853 = vmatmul.f32.gmra.mxu3 %v2758_v19  ;;  %4090 = vrcp.f32 %v6669_v1  ;;  %v2644_v32 = vmul.f32 %v4089_v24, %v2643_v30  ;;  %v2690_v5 = vand.u32 2147483647, %v6669_v1  ;;  %v2692_v45 = vand.u32 2147483648, %v6669_v1 }
 0x429   : > { %v2605_v28 = vadd.f32 %v4087_v3, %v2604_v43  ;;  %vm2686_vm14 = vweird.f32 %v6669_v1 }
 0x42a   : > { %v2645_v49 = vadd.f32 %v4089_v24, %v2644_v32  ;;  %v2693_v2 = vor.u32 1.1754944e-38, %v2692_v45  ;;  %vm2691_vm0 = vcmp.eq.f32.partialorder %v2690_v5, 8.507059e+37 }
 0x42b   : > { %v2609_v53 = vsel %vm2608_vm7, %v4087_v3, %v2605_v28 }
 0x42c   : > { %v2614_v31 = vsel %vm2611_vm9, %v2613_v37, %v2609_v53  ;;  %v2649_v18 = vsel %vm2648_vm11, %v4089_v24, %v2645_v49  ;;  %v1385_v24 = vmul.f32 0.5, %v6616_v52 }
 0x42d   : > { %v2615_v39 = vmul.f32 %v2614_v31, %v2590_v55  ;;  %v2654_v50 = vsel %vm2651_vm12, %v2653_v25, %v2649_v18  ;;  %v7309_v55 = vld [vmem:[#allocation34_spill] sm:$0xff]  ;;  %v2942_v18 = vpop.xlane.xlu2 %2941 }
 0x42e   : > { %v4091_v23 = vpop.eup %4090  ;;  %v2655_v19 = vmul.f32 %v2654_v50, %v2630_v12 }
 0x42f   : > { %v2682_v46 = vmul.f32 %v4091_v23, %v6669_v1  ;;  %v3794_v47 = vclamps-f32 %v2615_v39, 1.0  ;;  %vm2687_vm13 = vweird.f32 %v4091_v23  ;;  %v7312_v39 = vld [vmem:[#allocation45_spill] sm:$0xff] }
 0x430   : > { %v3795_v0 = vclamps-f32 %v2655_v19, 1.0  ;;  %vm2688_vm15 = vmor %vm2686_vm14, %vm2687_vm13 }
 0x431   : > { %v2683_v20 = vsub.f32 1.0, %v2682_v46  ;;  %v2727_v26 = vadd.f32 1.0, %v3794_v47  ;;  %v7313_v47 = vld [vmem:[#allocation21_spill] sm:$0xff] }
 0x432   : > { %v2728_v42 = vadd.f32 1.0, %v3795_v0  ;;  %v2973_v50 = vmul.f32 %v2942_v18, %v7313_v47 }
 0x433   : > { %v2684_v10 = vmul.f32 %v4091_v23, %v2683_v20  ;;  %v2759_v44 = vmul.f32 %v2727_v26, %v1383_v29 }
 0x434   : > { %v2833_v60 = vpop.f32.mrf.mxu3  ;;  %v2760_v11 = vmul.f32 %v2728_v42, %v1384_v13  ;;  %v6717_v29 = vsub.f32 %v6288_v58, %v2973_v50 }
 0x435   : > { %v2834_v17 = vadd.f32 %v2833_v60, %v6238_v63  ;;  %v2685_v4 = vadd.f32 %v4091_v23, %v2684_v10  ;;  %2918 = vmatmul.f32.gmra.mxu0 %v2759_v44  ;;  %v7314_v10 = vld [vmem:[#allocation46_spill] sm:$0xff] }
 0x436   : > { %2856 = vmatmul.f32.gmra.mxu3 %v2760_v11  ;;  %v3005_v0 = vmul.f32 %v6717_v29, %v6717_v29 }
 0x437   : > { %v2689_v38 = vsel %vm2688_vm15, %v4091_v23, %v2685_v4 }
 0x438   : > { %v2898_v21 = vpop.f32.mrf.mxu0  ;;  %v2694_v3 = vsel %vm2691_vm0, %v2693_v2, %v2689_v38 }
 0x439   : > { %v2899_v35 = vadd.f32 %v2898_v21, %v2834_v17  ;;  %v2695_v41 = vmul.f32 %v2694_v3, %v2670_v8  ;;  %v2948_v26 = vpop.xlane.xlu2 %2947 }
 0x43a   : > { %v2976_v4 = vmul.f32 %v2948_v26, %v7313_v47 }
 0x43b   : > { %v6678_v48 = vadd.f32 %v2899_v35, %v7307_v56  ;;  %v3796_v40 = vclamps-f32 %v2695_v41, 1.0  ;;  %v7311_v35 = vld [vmem:[#allocation43_spill] sm:$0xff]  ;;  %v2944_v41 = vpop.xlane.xlu0 %2943 }
 0x43c   : > { %v6723_v2 = vsub.f32 %v6427_v15, %v2976_v4 }
 0x43d   : > { %2955 = vadd.xlane.f32.xlu0 %v6678_v48  ;;  %v2729_v59 = vadd.f32 1.0, %v3796_v40  ;;  %v7315_v40 = vld [vmem:[#allocation35_spill] sm:$0xff] }
 0x43e   : > { %v3008_v38 = vmul.f32 %v6723_v2, %v6723_v2 }
 0x43f   : > { %v2761_v60 = vmul.f32 %v2729_v59, %v1385_v24  ;;  %v7316_v24 = vld [vmem:[#allocation44_spill] sm:$0xff] }
 0x441   : > { %2921 = vmatmul.f32.gmra.mxu0 %v2761_v60 }
 0x443   : > { %v2901_v57 = vpop.f32.mrf.mxu0 }
 0x445   : > { %v2836_v54 = vpop.f32.mrf.mxu3 }
 0x446   : > { %v2837_v1 = vadd.f32 %v2836_v54, %v6238_v63  ;;  %v2974_v54 = vmul.f32 %v2944_v41, %v7313_v47 }
 0x448   : > { %v2902_v34 = vadd.f32 %v2901_v57, %v2837_v1  ;;  %v2950_v57 = vpop.xlane.xlu0 %2949 }
 0x44a   : > { %v6690_v33 = vadd.f32 %v2902_v34, %v7308_v27  ;;  %v2946_v27 = vpop.xlane.xlu1 %2945 }
 0x44c   : > { %2957 = vadd.xlane.f32.xlu1 %v6690_v33 }
 0x44e   : > { %v2839_v36 = vpop.f32.mrf.mxu3 }
 0x44f   : > { %v2840_v17 = vadd.f32 %v2839_v36, %v6238_v63  ;;  %v2977_v36 = vmul.f32 %v2950_v57, %v7313_v47 }
 0x451   : > { %v2904_v43 = vpop.f32.mrf.mxu0 }
 0x452   : > { %v2905_v51 = vadd.f32 %v2904_v43, %v2840_v17 }
 0x454   : > { %v2934_v6 = vadd.f32 %v2905_v51, %v7309_v55 }
 0x456   : > { %2959 = vadd.xlane.f32.xlu2 %v2934_v6 }
 0x45d   : > { %v2842_v30 = vpop.f32.mrf.mxu3 }
 0x45e   : > { %v2843_v52 = vadd.f32 %v2842_v30, %v6238_v63 }
 0x462   : > { %v2907_v12 = vpop.f32.mrf.mxu0 }
 0x463   : > { %v2908_v28 = vadd.f32 %v2907_v12, %v2843_v52  ;;  %v2975_v52 = vmul.f32 %v2946_v27, %v7313_v47  ;;  %v7317_v12 = vld [vmem:[#allocation36_spill] sm:$0xff] }
 0x464   : > { %v2954_v8 = vpop.xlane.xlu2 %2953 }
 0x465   : > { %v6697_v23 = vadd.f32 %v2908_v28, %v7310_v61  ;;  %v2979_v44 = vmul.f32 %v2954_v8, %v7313_v47 }
 0x467   : > { %2961 = vadd.xlane.f32.xlu0 %v6697_v23  ;;  %v6729_v58 = vsub.f32 %v6560_v62, %v2979_v44  ;;  %v6740_v62 = vsub.f32 %v7316_v24, %v2974_v54 }
 0x469   : > { %v3011_v13 = vmul.f32 %v6729_v58, %v6729_v58  ;;  %v3006_v51 = vmul.f32 %v6740_v62, %v6740_v62 }
 0x46d   : > { %v2845_v21 = vpop.f32.mrf.mxu3 }
 0x46e   : > { %v2846_v37 = vadd.f32 %v2845_v21, %v6238_v63 }
 0x46f   : > { %v2910_v32 = vpop.f32.mrf.mxu0 }
 0x470   : > { %v2911_v7 = vadd.f32 %v2910_v32, %v2846_v37  ;;  %v6760_v37 = vsub.f32 %v6370_v16, %v2975_v52 }
 0x472   : > { %v6702_v53 = vadd.f32 %v2911_v7, %v7311_v35  ;;  %v3007_v35 = vmul.f32 %v6760_v37, %v6760_v37 }
 0x474   : > { %2963 = vadd.xlane.f32.xlu1 %v6702_v53 }
 0x47b   : > { %v2913_v31 = vpop.f32.mrf.mxu0 }
 0x47d   : > { %v2848_v46 = vpop.f32.mrf.mxu3 }
 0x47e   : > { %v2849_v22 = vadd.f32 %v2848_v46, %v6238_v63 }
 0x480   : > { %v2914_v49 = vadd.f32 %v2913_v31, %v2849_v22 }
 0x482   : > { %v6707_v56 = vadd.f32 %v2914_v49, %v7312_v39 }
 0x484   : > { %2965 = vadd.xlane.f32.xlu2 %v6707_v56 }
 0x489   : > { %v2851_v25 = vpop.f32.mrf.mxu3 }
 0x48a   : > { %v2852_v20 = vadd.f32 %v2851_v25, %v6238_v63 }
 0x48b   : > { %v2916_v5 = vpop.f32.mrf.mxu0 }
 0x48c   : > { %v2917_v45 = vadd.f32 %v2916_v5, %v2852_v20 }
 0x48e   : > { %v6713_v19 = vadd.f32 %v2917_v45, %v7314_v10 }
 0x490   : > { %2967 = vadd.xlane.f32.xlu0 %v6713_v19 }
 0x498   : > { %3021 = vadd.xlane.f32.xlu0 %v3005_v0 }
 0x4a0   : > { %3027 = vadd.xlane.f32.xlu0 %v3008_v38 }
 0x4a8   : > { %3033 = vadd.xlane.f32.xlu0 %v3011_v13 }
 0x4ab   : > { %v2854_v42 = vpop.f32.mrf.mxu3 }
 0x4ac   : > { %v2855_v3 = vadd.f32 %v2854_v42, %v6238_v63 }
 0x4b0   : > { %v2956_v21 = vpop.xlane.xlu0 %2955 }
 0x4b1   : > { %v2980_v32 = vmul.f32 %v2956_v21, %v7313_v47 }
 0x4b2   : > { %v2919_v15 = vpop.f32.mrf.mxu0 }
 0x4b3   : > { %v2920_v11 = vadd.f32 %v2919_v15, %v2855_v3  ;;  %v6769_v46 = vsub.f32 %v6678_v48, %v2980_v32 }
 0x4b5   : > { %v6736_v1 = vadd.f32 %v2920_v11, %v7315_v40  ;;  %v3012_v39 = vmul.f32 %v6769_v46, %v6769_v46 }
 0x4b7   : > { %2969 = vadd.xlane.f32.xlu1 %v6736_v1 }
 0x4b9   : > { %v2857_v59 = vpop.f32.mrf.mxu3 }
 0x4ba   : > { %v2858_v60 = vadd.f32 %v2857_v59, %v6238_v63  ;;  %v6754_v63 = vsub.f32 %v6469_v14, %v2977_v36 }
 0x4bc   : > { %v3009_v7 = vmul.f32 %v6754_v63, %v6754_v63 }
 0x4be   : > { %v2922_v43 = vpop.f32.mrf.mxu0 }
 0x4bf   : > { %v2923_v55 = vadd.f32 %v2922_v43, %v2858_v60  ;;  %3023 = vadd.xlane.f32.xlu1 %v3006_v51 }
 0x4c1   : > { %v6751_v28 = vadd.f32 %v2923_v55, %v7317_v12 }
 0x4c3   : > { %2971 = vadd.xlane.f32.xlu2 %v6751_v28 }
 0x4c7   : > { %3029 = vadd.xlane.f32.xlu1 %v3009_v7 }
 0x4c9   : > { %v2960_v34 = vpop.xlane.xlu2 %2959 }
 0x4ca   : > { %v2982_v17 = vmul.f32 %v2960_v34, %v7313_v47 }
 0x4cb   : > { %3025 = vadd.xlane.f32.xlu2 %v3007_v35 }
 0x4cc   : > { %v6747_v30 = vsub.f32 %v2934_v6, %v2982_v17  ;;  %v2952_v6 = vpop.xlane.xlu1 %2951 }
 0x4cd   : > { %v2978_v14 = vmul.f32 %v2952_v6, %v7313_v47 }
 0x4ce   : > { %v3014_v61 = vmul.f32 %v6747_v30, %v6747_v30 }
 0x4cf   : > { %v6772_v22 = vsub.f32 %v6511_v9, %v2978_v14  ;;  %3035 = vadd.xlane.f32.xlu1 %v3012_v39 }
 0x4d0   : > { %3039 = vadd.xlane.f32.xlu0 %v3014_v61 }
 0x4d1   : > { %v3010_v20 = vmul.f32 %v6772_v22, %v6772_v22 }
 0x4d3   : > { %3031 = vadd.xlane.f32.xlu2 %v3010_v20 }
 0x4d4   : > { %v2958_v31 = vpop.xlane.xlu1 %2957 }
 0x4d5   : > { %v2981_v25 = vmul.f32 %v2958_v31, %v7313_v47 }
 0x4d7   : > { %v6784_v9 = vsub.f32 %v6690_v33, %v2981_v25 }
 0x4d9   : > { %v3013_v5 = vmul.f32 %v6784_v9, %v6784_v9 }
 0x4da   : > { %v2962_v16 = vpop.xlane.xlu0 %2961 }
 0x4db   : > { %v2983_v49 = vmul.f32 %v2962_v16, %v7313_v47  ;;  %3037 = vadd.xlane.f32.xlu2 %v3013_v5 }
 0x4dd   : > { %v6781_v48 = vsub.f32 %v6697_v23, %v2983_v49 }
 0x4df   : > { %v3015_v18 = vmul.f32 %v6781_v48, %v6781_v48 }
 0x4e1   : > { %3041 = vadd.xlane.f32.xlu1 %v3015_v18 }
 0x4e7   : > { %v2964_v45 = vpop.xlane.xlu1 %2963 }
 0x4e8   : > { %v2984_v50 = vmul.f32 %v2964_v45, %v7313_v47 }
 0x4ea   : > { %v6792_v10 = vsub.f32 %v6702_v53, %v2984_v50 }
 0x4ec   : > { %v3016_v23 = vmul.f32 %v6792_v10, %v6792_v10 }
 0x4ee   : > { %3043 = vadd.xlane.f32.xlu2 %v3016_v23 }
 0x4f7   : > { %v2966_v33 = vpop.xlane.xlu2 %2965 }
 0x4f8   : > { %v2985_v26 = vmul.f32 %v2966_v33, %v7313_v47 }
 0x4fa   : > { %v6798_v4 = vsub.f32 %v6707_v56, %v2985_v26 }
 0x4fc   : > { %v3017_v0 = vmul.f32 %v6798_v4, %v6798_v4 }
 0x4fe   : > { %3045 = vadd.xlane.f32.xlu0 %v3017_v0 }
 0x503   : > { %v2968_v8 = vpop.xlane.xlu0 %2967 }
 0x504   : > { %v2986_v44 = vmul.f32 %v2968_v8, %v7313_v47 }
 0x506   : > { %v6804_v53 = vsub.f32 %v6713_v19, %v2986_v44 }
 0x508   : > { %v3018_v38 = vmul.f32 %v6804_v53, %v6804_v53 }
 0x50a   : > { %3047 = vadd.xlane.f32.xlu1 %v3018_v38  ;;  %v4157_v38 = vld [vmem:[#allocation11] sm:$0xff] }
 0x50b   : > { %v3022_v13 = vpop.xlane.xlu0 %3021 }
 0x50c   : > { %v3053_v42 = vmul.f32 0.007874016, %v3022_v13  ;;  %v6808_v13 = vperm.slane %v4157_v38, 4 }
 0x50e   : > { %4092 = vrsqrt.f32 %v3053_v42  ;;  %vm3076_vm1 = vcmp.eq.f32.partialorder %v3053_v42, inf  ;;  %v3079_v36 = vand.u32 2147483648, %v3053_v42  ;;  %vm3078_vm2 = vcmp.eq.f32.partialorder %v3053_v42, 0.0 }
 0x513   : > { %v3028_v3 = vpop.xlane.xlu0 %3027 }
 0x514   : > { %v4093_v56 = vpop.eup %4092  ;;  %v3056_v41 = vmul.f32 0.007874016, %v3028_v3 }
 0x515   : > { %v3070_v15 = vmul.f32 %v4093_v56, %v3053_v42 }
 0x516   : > { %4094 = vrsqrt.f32 %v3056_v41  ;;  %vm3112_vm3 = vcmp.eq.f32.partialorder %v3056_v41, inf  ;;  %v3115_v7 = vand.u32 2147483648, %v3056_v41  ;;  %vm3114_vm4 = vcmp.eq.f32.partialorder %v3056_v41, 0.0 }
 0x517   : > { %v3071_v11 = vmul.f32 %v4093_v56, %v3070_v15 }
 0x519   : > { %v3072_v54 = vmul.f32 0.5, %v3071_v11  ;;  %v6810_v11 = vperm.slane %v4157_v38, 5 }
 0x51b   : > { %v3073_v40 = vsub.f32 1.5, %v3072_v54  ;;  %v3034_v24 = vpop.xlane.xlu0 %3033 }
 0x51c   : > { %v4095_v57 = vpop.eup %4094  ;;  %v3059_v59 = vmul.f32 0.007874016, %v3034_v24 }
 0x51d   : > { %v3074_v19 = vmul.f32 %v4093_v56, %v3073_v40  ;;  %v3106_v34 = vmul.f32 %v4095_v57, %v3056_v41 }
 0x51e   : > { %4096 = vrsqrt.f32 %v3059_v59  ;;  %vm3148_vm7 = vcmp.eq.f32.partialorder %v3059_v59, inf  ;;  %v3151_v26 = vand.u32 2147483648, %v3059_v59  ;;  %vm3150_vm9 = vcmp.eq.f32.partialorder %v3059_v59, 0.0 }
 0x51f   : > { %v3075_v60 = vmul.f32 %v3074_v19, %v3053_v42  ;;  %v3107_v27 = vmul.f32 %v4095_v57, %v3106_v34 }
 0x521   : > { %v3077_v17 = vsel %vm3076_vm1, %v3053_v42, %v3075_v60  ;;  %v3108_v43 = vmul.f32 0.5, %v3107_v27 }
 0x522   : > { %v3080_v51 = vsel %vm3078_vm2, %v3079_v36, %v3077_v17 }
 0x523   : > { %v3261_v55 = vadd.f32 1e-06, %v3080_v51  ;;  %v3109_v52 = vsub.f32 1.5, %v3108_v43 }
 0x524   : > { %v4097_v12 = vpop.eup %4096 }
 0x525   : > { %4098 = vrcp.f32 %v3261_v55  ;;  %v3110_v61 = vmul.f32 %v4095_v57, %v3109_v52  ;;  %v3142_v21 = vmul.f32 %v4097_v12, %v3059_v59  ;;  %v3288_v18 = vand.u32 2147483648, %v3261_v55 }
 0x526   : > { %v3286_v50 = vand.u32 2147483647, %v3261_v55  ;;  %vm3282_vm6 = vweird.f32 %v3261_v55 }
 0x527   : > { %v3111_v6 = vmul.f32 %v3110_v61, %v3056_v41  ;;  %v3143_v32 = vmul.f32 %v4097_v12, %v3142_v21  ;;  %v3289_v0 = vor.u32 1.1754944e-38, %v3288_v18 }
 0x528   : > { %vm3287_vm10 = vcmp.eq.f32.partialorder %v3286_v50, 8.507059e+37 }
 0x529   : > { %v3113_v14 = vsel %vm3112_vm3, %v3056_v41, %v3111_v6  ;;  %v3144_v35 = vmul.f32 0.5, %v3143_v32 }
 0x52a   : > { %v3116_v31 = vsel %vm3114_vm4, %v3115_v7, %v3113_v14  ;;  %v2970_v24 = vpop.xlane.xlu1 %2969 }
 0x52b   : > { %v4099_v16 = vpop.eup %4098  ;;  %v3264_v39 = vadd.f32 1e-06, %v3116_v31  ;;  %v3145_v25 = vsub.f32 1.5, %v3144_v35  ;;  %v2987_v19 = vmul.f32 %v2970_v24, %v7313_v47 }
 0x52c   : > { %v3278_v49 = vmul.f32 %v4099_v16, %v3261_v55  ;;  %vm3283_vm5 = vweird.f32 %v4099_v16 }
 0x52d   : > { %4100 = vrcp.f32 %v3264_v39  ;;  %v3146_v5 = vmul.f32 %v4097_v12, %v3145_v25  ;;  %vm3284_vm8 = vmor %vm3282_vm6, %vm3283_vm5  ;;  %v3331_v60 = vand.u32 2147483647, %v3264_v39  ;;  %v6817_v36 = vsub.f32 %v6736_v1, %v2987_v19 }
 0x52e   : > { %v3279_v20 = vsub.f32 1.0, %v3278_v49  ;;  %vm3327_vm12 = vweird.f32 %v3264_v39 }
 0x52f   : > { %v3147_v23 = vmul.f32 %v3146_v5, %v3059_v59  ;;  %v3019_v43 = vmul.f32 %v6817_v36, %v6817_v36  ;;  %vm3332_vm14 = vcmp.eq.f32.partialorder %v3331_v60, 8.507059e+37 }
 0x530   : > { %v3280_v45 = vmul.f32 %v4099_v16, %v3279_v20 }
 0x531   : > { %v3149_v8 = vsel %vm3148_vm7, %v3059_v59, %v3147_v23  ;;  %v3333_v59 = vand.u32 2147483648, %v3264_v39  ;;  %3049 = vadd.xlane.f32.xlu2 %v3019_v43 }
 0x532   : > { %v3281_v33 = vadd.f32 %v4099_v16, %v3280_v45  ;;  %v3152_v3 = vsel %vm3150_vm9, %v3151_v26, %v3149_v8  ;;  %v3024_v61 = vpop.xlane.xlu1 %3023 }
 0x533   : > { %v4101_v44 = vpop.eup %4100  ;;  %v3267_v15 = vadd.f32 1e-06, %v3152_v3  ;;  %v6826_v6 = vmul.f32 0.007874016, %v3024_v61 }
 0x534   : > { %v3285_v42 = vsel %vm3284_vm8, %v4099_v16, %v3281_v33  ;;  %v3323_v41 = vmul.f32 %v4101_v44, %v3264_v39  ;;  %vm3328_vm11 = vweird.f32 %v4101_v44 }
 0x535   : > { %v3290_v56 = vsel %vm3287_vm10, %v3289_v0, %v3285_v42  ;;  %4102 = vrcp.f32 %v3267_v15  ;;  %vm3329_vm13 = vmor %vm3327_vm12, %vm3328_vm11  ;;  %v3378_v7 = vand.u32 2147483648, %v3267_v15  ;;  %v3376_v35 = vand.u32 2147483647, %v3267_v15 }
 0x536   : > { %v3517_v54 = vmul.f32 %v3290_v56, %v6717_v29  ;;  %v3324_v40 = vsub.f32 1.0, %v3323_v41  ;;  %v3334_v29 = vor.u32 1.1754944e-38, %v3333_v59  ;;  %v2972_v16 = vpop.xlane.xlu2 %2971  ;;  %4104 = vrsqrt.f32 %v6826_v6 }
 0x537   : > { %v2988_v49 = vmul.f32 %v2972_v16, %v7313_v47  ;;  %vm3372_vm0 = vweird.f32 %v3267_v15  ;;  %v3379_v20 = vor.u32 1.1754944e-38, %v3378_v7  ;;  %vm3377_vm2 = vcmp.eq.f32.partialorder %v3376_v35, 8.507059e+37 }
 0x538   : > { %v3534_v57 = vmul.f32 %v6808_v13, %v3517_v54  ;;  %v3325_v34 = vmul.f32 %v4101_v44, %v3324_v40  ;;  %vm3088_vm3 = vcmp.eq.f32.partialorder %v6826_v6, inf  ;;  %v3091_v43 = vand.u32 2147483648, %v6826_v6 }
 0x539   : > { %v6836_v18 = vsub.f32 %v6751_v28, %v2988_v49  ;;  %vm3090_vm4 = vcmp.eq.f32.partialorder %v6826_v6, 0.0 }
 0x53a   : > { %v3551_v27 = vadd.f32 %v6810_v11, %v3534_v57  ;;  %v3326_v17 = vadd.f32 %v4101_v44, %v3325_v34  ;;  %v3030_v33 = vpop.xlane.xlu1 %3029 }
 0x53b   : > { %v4103_v51 = vpop.eup %4102  ;;  %v3020_v50 = vmul.f32 %v6836_v18, %v6836_v18  ;;  %v6843_v0 = vmul.f32 0.007874016, %v3030_v33 }
 0x53c   : > { %3567 = vst [vmem:[%s6820_s15] sm:$0xff] %v3551_v27  ;;  %v3330_v55 = vsel %vm3329_vm13, %v4101_v44, %v3326_v17  ;;  %v3368_v12 = vmul.f32 %v4103_v51, %v3267_v15  ;;  %vm3373_vm15 = vweird.f32 %v4103_v51  ;;  %v4105_v47 = vpop.eup %4104 }
 0x53d   : > { %v3335_v52 = vsel %vm3332_vm14, %v3334_v29, %v3330_v55  ;;  %vm3374_vm1 = vmor %vm3372_vm0, %vm3373_vm15  ;;  %v3082_v26 = vmul.f32 %v4105_v47, %v6826_v6  ;;  %3051 = vadd.xlane.f32.xlu0 %v3020_v50  ;;  %vm3124_vm7 = vcmp.eq.f32.partialorder %v6843_v0, inf  ;;  %vm3126_vm8 = vcmp.eq.f32.partialorder %v6843_v0, 0.0 }
 0x53e   : > { %v3520_v1 = vmul.f32 %v3335_v52, %v6723_v2  ;;  %v3369_v21 = vsub.f32 1.0, %v3368_v12  ;;  %v3026_v8 = vpop.xlane.xlu2 %3025 }
 0x53f   : > { %v3083_v44 = vmul.f32 %v4105_v47, %v3082_v26  ;;  %v6846_v38 = vmul.f32 0.007874016, %v3026_v8  ;;  %v3127_v26 = vand.u32 2147483648, %v6843_v0 }
 0x540   : > { %v3537_v32 = vmul.f32 %v6808_v13, %v3520_v1  ;;  %v3370_v14 = vmul.f32 %v4103_v51, %v3369_v21 }
 0x541   : > { %v3084_v56 = vmul.f32 0.5, %v3083_v44  ;;  %vm3100_vm9 = vcmp.eq.f32.partialorder %v6846_v38, inf  ;;  %vm3102_vm10 = vcmp.eq.f32.partialorder %v6846_v38, 0.0  ;;  %v3103_v8 = vand.u32 2147483648, %v6846_v38 }
 0x542   : > { %v3554_v31 = vadd.f32 %v6810_v11, %v3537_v32  ;;  %v3371_v2 = vadd.f32 %v4103_v51, %v3370_v14  ;;  %v3036_v54 = vpop.xlane.xlu1 %3035 }
 0x543   : > { %v3040_v39 = vpop.xlane.xlu0 %3039  ;;  %v3085_v41 = vsub.f32 1.5, %v3084_v56  ;;  %v6853_v59 = vmul.f32 0.007874016, %v3036_v54 }
 0x544   : > { %v6832_v25 = vmul.f32 0.007874016, %v3040_v39  ;;  %3570 = vst [vmem:[%s6820_s15 + $0x18] sm:$0xff] %v3554_v31  ;;  %v3375_v5 = vsel %vm3374_vm1, %v4103_v51, %v3371_v2 }
 0x545   : > { %v3380_v45 = vsel %vm3377_vm2, %v3379_v20, %v3375_v5  ;;  %v3086_v24 = vmul.f32 %v4105_v47, %v3085_v41  ;;  %vm3160_vm11 = vcmp.eq.f32.partialorder %v6853_v59, inf  ;;  %vm3162_vm0 = vcmp.eq.f32.partialorder %v6853_v59, 0.0 }
 0x546   : > { %4106 = vrsqrt.f32 %v6832_v25  ;;  %v3523_v23 = vmul.f32 %v3380_v45, %v6729_v58  ;;  %v3032_v34 = vpop.xlane.xlu2 %3031  ;;  %vm3184_vm5 = vcmp.eq.f32.partialorder %v6832_v25, inf  ;;  %vm3186_vm6 = vcmp.eq.f32.partialorder %v6832_v25, 0.0 }
 0x547   : > { %4108 = vrsqrt.f32 %v6843_v0  ;;  %v3087_v27 = vmul.f32 %v3086_v24, %v6826_v6  ;;  %v6857_v29 = vmul.f32 0.007874016, %v3032_v34 }
 0x548   : > { %v3540_v28 = vmul.f32 %v6808_v13, %v3523_v23  ;;  %4110 = vrsqrt.f32 %v6846_v38 }
 0x549   : > { %4112 = vrsqrt.f32 %v6853_v59  ;;  %v3089_v52 = vsel %vm3088_vm3, %v6826_v6, %v3087_v27  ;;  %v3187_v6 = vand.u32 2147483648, %v6832_v25  ;;  %v3139_v44 = vand.u32 2147483648, %v6857_v29 }
 0x54a   : > { %v3557_v3 = vadd.f32 %v6810_v11, %v3540_v28  ;;  %4114 = vrsqrt.f32 %v6857_v29  ;;  %v3092_v1 = vsel %vm3090_vm4, %v3091_v43, %v3089_v52  ;;  %vm3136_vm12 = vcmp.eq.f32.partialorder %v6857_v29, inf }
 0x54b   : > { %v6866_v32 = vadd.f32 1e-06, %v3092_v1  ;;  %vm3138_vm13 = vcmp.eq.f32.partialorder %v6857_v29, 0.0  ;;  %v3163_v1 = vand.u32 2147483648, %v6853_v59 }
 0x54c   : > { %v4107_v42 = vpop.eup %4106  ;;  %3573 = vst [vmem:[%s6820_s15 + $0x30] sm:$0xff] %v3557_v3 }
 0x54d   : > { %v3178_v58 = vmul.f32 %v4107_v42, %v6832_v25  ;;  %v4109_v40 = vpop.eup %4108  ;;  %4116 = vrcp.f32 %v6866_v32  ;;  %v3301_v54 = vand.u32 2147483647, %v6866_v32  ;;  %vm3297_vm14 = vweird.f32 %v6866_v32 }
 0x54e   : > { %v3118_v19 = vmul.f32 %v4109_v40, %v6843_v0  ;;  %v4111_v60 = vpop.eup %4110  ;;  %v3038_v20 = vpop.xlane.xlu2 %3037 }
 0x54f   : > { %v3179_v15 = vmul.f32 %v4107_v42, %v3178_v58  ;;  %v3094_v51 = vmul.f32 %v4111_v60, %v6846_v38  ;;  %v4113_v16 = vpop.eup %4112  ;;  %v6877_v50 = vmul.f32 0.007874016, %v3038_v20  ;;  %vm6919_vm1 = vcmp.eq.f32.partialorder %v3301_v54, 8.507059e+37 }
 0x550   : > { %v3119_v55 = vmul.f32 %v4109_v40, %v3118_v19  ;;  %v3154_v2 = vmul.f32 %v4113_v16, %v6853_v59  ;;  %v4115_v5 = vpop.eup %4114 }
 0x551   : > { %v3180_v57 = vmul.f32 0.5, %v3179_v15  ;;  %v3095_v61 = vmul.f32 %v4111_v60, %v3094_v51  ;;  %4118 = vrsqrt.f32 %v6877_v50 }
 0x552   : > { %v3120_v21 = vmul.f32 0.5, %v3119_v55  ;;  %v3155_v28 = vmul.f32 %v4113_v16, %v3154_v2 }
 0x553   : > { %v3181_v17 = vsub.f32 1.5, %v3180_v57  ;;  %v3096_v14 = vmul.f32 0.5, %v3095_v61 }
 0x554   : > { %v3121_v35 = vsub.f32 1.5, %v3120_v21  ;;  %v3156_v41 = vmul.f32 0.5, %v3155_v28 }
 0x555   : > { %v3182_v12 = vmul.f32 %v4107_v42, %v3181_v17  ;;  %v3097_v49 = vsub.f32 1.5, %v3096_v14  ;;  %v4117_v42 = vpop.eup %4116 }
 0x556   : > { %v3122_v39 = vmul.f32 %v4109_v40, %v3121_v35  ;;  %v3293_v15 = vmul.f32 %v4117_v42, %v6866_v32  ;;  %v3303_v40 = vand.u32 2147483648, %v6866_v32  ;;  %vm3298_vm15 = vweird.f32 %v4117_v42 }
 0x557   : > { %v3183_v7 = vmul.f32 %v3182_v12, %v6832_v25  ;;  %v3098_v23 = vmul.f32 %v4111_v60, %v3097_v49  ;;  %v3157_v60 = vsub.f32 1.5, %v3156_v41  ;;  %v6910_v55 = vpop.eup %4118  ;;  %vm3299_vm4 = vmor %vm3297_vm14, %vm3298_vm15  ;;  %vm3172_vm14 = vcmp.eq.f32.partialorder %v6877_v50, inf }
 0x558   : > { %v3123_v33 = vmul.f32 %v3122_v39, %v6843_v0  ;;  %v3294_v27 = vsub.f32 1.0, %v3293_v15  ;;  %v3304_v14 = vor.u32 1.1754944e-38, %v3303_v40 }
 0x559   : > { %v3185_v31 = vsel %vm3184_vm5, %v6832_v25, %v3183_v7  ;;  %v3130_v25 = vmul.f32 %v4115_v5, %v6857_v29  ;;  %v3099_v3 = vmul.f32 %v3098_v23, %v6846_v38  ;;  %v3158_v12 = vmul.f32 %v4113_v16, %v3157_v60 }
 0x55a   : > { %v3188_v45 = vsel %vm3186_vm6, %v3187_v6, %v3185_v31  ;;  %v3125_v56 = vsel %vm3124_vm7, %v6843_v0, %v3123_v33  ;;  %v3295_v21 = vmul.f32 %v4117_v42, %v3294_v27  ;;  %v3166_v23 = vmul.f32 %v6910_v55, %v6877_v50 }
 0x55b   : > { %v6879_v47 = vadd.f32 1e-06, %v3188_v45  ;;  %v3131_v58 = vmul.f32 %v4115_v5, %v3130_v25  ;;  %v3101_v57 = vsel %vm3100_vm9, %v6846_v38, %v3099_v3  ;;  %v3128_v19 = vsel %vm3126_vm8, %v3127_v26, %v3125_v56  ;;  %v3042_v38 = vpop.xlane.xlu1 %3041 }
 0x55c   : > { %v3104_v43 = vsel %vm3102_vm10, %v3103_v8, %v3101_v57  ;;  %v6907_v51 = vadd.f32 1e-06, %v3128_v19  ;;  %v3296_v16 = vadd.f32 %v4117_v42, %v3295_v21  ;;  %v3159_v39 = vmul.f32 %v3158_v12, %v6853_v59 }
 0x55d   : > { %4120 = vrcp.f32 %v6879_v47  ;;  %v3421_v24 = vand.u32 2147483647, %v6879_v47  ;;  %v3132_v34 = vmul.f32 0.5, %v3131_v58  ;;  %v3423_v17 = vand.u32 2147483648, %v6879_v47 }
 0x55e   : > { %v6912_v52 = vadd.f32 1e-06, %v3104_v43  ;;  %4122 = vrcp.f32 %v6907_v51  ;;  %vm3417_vm2 = vweird.f32 %v6879_v47  ;;  %v6931_v2 = vmul.f32 0.007874016, %v3042_v38 }
 0x55f   : > { %v3133_v0 = vsub.f32 1.5, %v3132_v34  ;;  %vm6926_vm3 = vcmp.eq.f32.partialorder %v3421_v24, 8.507059e+37  ;;  %v3424_v6 = vor.u32 1.1754944e-38, %v3423_v17  ;;  %v3300_v20 = vsel %vm3299_vm4, %v4117_v42, %v3296_v16 }
 0x560   : > { %4124 = vrcp.f32 %v6912_v52  ;;  %v3346_v45 = vand.u32 2147483647, %v6907_v51  ;;  %v3305_v33 = vsel %vm6919_vm1, %v3304_v14, %v3300_v20  ;;  %v3316_v26 = vand.u32 2147483647, %v6912_v52 }
 0x561   : > { %v3134_v49 = vmul.f32 %v4115_v5, %v3133_v0  ;;  %v3518_v8 = vmul.f32 %v3305_v33, %v6740_v62  ;;  %v3318_v3 = vand.u32 2147483648, %v6912_v52  ;;  %v3348_v42 = vand.u32 2147483648, %v6907_v51 }
 0x562   : > { %v3161_v56 = vsel %vm3160_vm11, %v6853_v59, %v3159_v39  ;;  %4126 = vrsqrt.f32 %v6931_v2  ;;  %v3167_v57 = vmul.f32 %v6910_v55, %v3166_v23  ;;  %v3175_v59 = vand.u32 2147483648, %v6877_v50 }
 0x563   : > { %v4121_v61 = vpop.eup %4120  ;;  %v3135_v28 = vmul.f32 %v3134_v49, %v6857_v29  ;;  %v3535_v62 = vmul.f32 %v6808_v13, %v3518_v8  ;;  %v3164_v27 = vsel %vm3162_vm0, %v3163_v1, %v3161_v56  ;;  %vm3312_vm9 = vweird.f32 %v6912_v52 }
 0x564   : > { %v3413_v35 = vmul.f32 %v4121_v61, %v6879_v47  ;;  %vm3418_vm5 = vweird.f32 %v4121_v61  ;;  %v4123_v5 = vpop.eup %4122  ;;  %v6968_v0 = vadd.f32 1e-06, %v3164_v27  ;;  %vm3342_vm10 = vweird.f32 %v6907_v51 }
 0x565   : > { %v3338_v15 = vmul.f32 %v4123_v5, %v6907_v51  ;;  %v3137_v54 = vsel %vm3136_vm12, %v6857_v29, %v3135_v28  ;;  %vm3419_vm6 = vmor %vm3417_vm2, %vm3418_vm5  ;;  %v3552_v47 = vadd.f32 %v6810_v11, %v3535_v62  ;;  %vm3343_vm7 = vweird.f32 %v4123_v5 }
 0x566   : > { %v3414_v31 = vsub.f32 1.0, %v3413_v35  ;;  %v4125_v58 = vpop.eup %4124  ;;  %v3140_v24 = vsel %vm3138_vm13, %v3139_v44, %v3137_v54  ;;  %vm6978_vm11 = vcmp.eq.f32.partialorder %v3316_v26, 8.507059e+37  ;;  %vm3344_vm12 = vmor %vm3342_vm10, %vm3343_vm7  ;;  %vm3347_vm13 = vcmp.eq.f32.partialorder %v3346_v45, 8.507059e+37 }
 0x567   : > { %v3308_v40 = vmul.f32 %v4125_v58, %v6912_v52  ;;  %v3339_v34 = vsub.f32 1.0, %v3338_v15  ;;  %v6961_v60 = vadd.f32 1e-06, %v3140_v24  ;;  %3568 = vst [vmem:[%s6820_s15 + $0x8] sm:$0xff] %v3552_v47  ;;  %vm3313_vm8 = vweird.f32 %v4125_v58  ;;  %v3044_v15 = vpop.xlane.xlu2 %3043 }
 0x568   : > { %v3415_v25 = vmul.f32 %v4121_v61, %v3414_v31  ;;  %v4127_v1 = vpop.eup %4126  ;;  %v3349_v7 = vor.u32 1.1754944e-38, %v3348_v42  ;;  %vm3314_vm15 = vmor %vm3312_vm9, %vm3313_vm8  ;;  %v3319_v35 = vor.u32 1.1754944e-38, %v3318_v3  ;;  %v3168_v16 = vmul.f32 0.5, %v3167_v57 }
 0x569   : > { %v3309_v43 = vsub.f32 1.0, %v3308_v40  ;;  %v3340_v44 = vmul.f32 %v4123_v5, %v3339_v34  ;;  %4128 = vrcp.f32 %v6961_v60  ;;  %vm3174_vm0 = vcmp.eq.f32.partialorder %v6877_v50, 0.0 }
 0x56a   : > { %v3416_v41 = vadd.f32 %v4121_v61, %v3415_v25  ;;  %4130 = vrcp.f32 %v6968_v0  ;;  %vm3357_vm1 = vweird.f32 %v6961_v60  ;;  %v3190_v31 = vmul.f32 %v4127_v1, %v6931_v2 }
 0x56b   : > { %v3310_v12 = vmul.f32 %v4125_v58, %v3309_v43  ;;  %v3341_v21 = vadd.f32 %v4123_v5, %v3340_v44  ;;  %v3363_v45 = vand.u32 2147483648, %v6961_v60  ;;  %v3169_v23 = vsub.f32 1.5, %v3168_v16 }
 0x56c   : > { %v3420_v19 = vsel %vm3419_vm6, %v4121_v61, %v3416_v41  ;;  %vm3387_vm2 = vweird.f32 %v6968_v0  ;;  %v3191_v28 = vmul.f32 %v4127_v1, %v3190_v31  ;;  %v3391_v3 = vand.u32 2147483647, %v6968_v0 }
 0x56d   : > { %v3425_v17 = vsel %vm6926_vm3, %v3424_v6, %v3420_v19  ;;  %v3345_v52 = vsel %vm3344_vm12, %v4123_v5, %v3341_v21  ;;  %v3361_v6 = vand.u32 2147483647, %v6961_v60  ;;  %v7012_v47 = vmul.f32 0.007874016, %v3044_v15 }
 0x56e   : > { %v3526_v29 = vmul.f32 %v3425_v17, %v6747_v30  ;;  %v3311_v30 = vadd.f32 %v4125_v58, %v3310_v12  ;;  %v3350_v32 = vsel %vm3347_vm13, %v3349_v7, %v3345_v52  ;;  %v3192_v41 = vmul.f32 0.5, %v3191_v28 }
 0x56f   : > { %v4129_v49 = vpop.eup %4128  ;;  %v3521_v20 = vmul.f32 %v3350_v32, %v6754_v63  ;;  %v3170_v63 = vmul.f32 %v6910_v55, %v3169_v23  ;;  %vm3362_vm6 = vcmp.eq.f32.partialorder %v3361_v6, 8.507059e+37  ;;  %v3364_v44 = vor.u32 1.1754944e-38, %v3363_v45 }
 0x570   : > { %v3543_v61 = vmul.f32 %v6808_v13, %v3526_v29  ;;  %v3315_v51 = vsel %vm3314_vm15, %v4125_v58, %v3311_v30  ;;  %v4131_v33 = vpop.eup %4130  ;;  %v3353_v26 = vmul.f32 %v4129_v49, %v6961_v60  ;;  %vm3358_vm3 = vweird.f32 %v4129_v49 }
 0x571   : > { %v3320_v39 = vsel %vm6978_vm11, %v3319_v35, %v3315_v51  ;;  %v3538_v5 = vmul.f32 %v6808_v13, %v3521_v20  ;;  %v3383_v8 = vmul.f32 %v4131_v33, %v6968_v0  ;;  %v3046_v42 = vpop.xlane.xlu0 %3045  ;;  %v3171_v40 = vmul.f32 %v3170_v63, %v6877_v50  ;;  %vm3359_vm5 = vmor %vm3357_vm1, %vm3358_vm3 }
 0x572   : > { %v3560_v14 = vadd.f32 %v6810_v11, %v3543_v61  ;;  %v3519_v25 = vmul.f32 %v3320_v39, %v6760_v37  ;;  %v3354_v58 = vsub.f32 1.0, %v3353_v26  ;;  %v3393_v37 = vand.u32 2147483648, %v6968_v0 }
 0x573   : > { %v3555_v54 = vadd.f32 %v6810_v11, %v3538_v5  ;;  %v3384_v62 = vsub.f32 1.0, %v3383_v8  ;;  %v3193_v19 = vsub.f32 1.5, %v3192_v41  ;;  %v7006_v55 = vmul.f32 0.007874016, %v3046_v42 }
 0x574   : > { %3576 = vst [vmem:[%s6820_s15 + $0x48] sm:$0xff] %v3560_v14  ;;  %v3536_v56 = vmul.f32 %v6808_v13, %v3519_v25  ;;  %v3355_v57 = vmul.f32 %v4129_v49, %v3354_v58  ;;  %vm3388_vm4 = vweird.f32 %v4131_v33  ;;  %v3173_v27 = vsel %vm3172_vm14, %v6877_v50, %v3171_v40 }
 0x575   : > { %3571 = vst [vmem:[%s6820_s15 + $0x20] sm:$0xff] %v3555_v54  ;;  %v3385_v34 = vmul.f32 %v4131_v33, %v3384_v62  ;;  %v3176_v43 = vsel %vm3174_vm0, %v3175_v59, %v3173_v27  ;;  %v3194_v29 = vmul.f32 %v4127_v1, %v3193_v19  ;;  %4132 = vrsqrt.f32 %v7006_v55  ;;  %vm3389_vm7 = vmor %vm3387_vm2, %vm3388_vm4 }
 0x576   : > { %v3553_v24 = vadd.f32 %v6810_v11, %v3536_v56  ;;  %v3356_v17 = vadd.f32 %v4129_v49, %v3355_v57  ;;  %v3269_v61 = vadd.f32 1e-06, %v3176_v43  ;;  %v3394_v30 = vor.u32 1.1754944e-38, %v3393_v37 }
 0x577   : > { %v3386_v12 = vadd.f32 %v4131_v33, %v3385_v34  ;;  %v3195_v38 = vmul.f32 %v3194_v29, %v6931_v2  ;;  %4134 = vrsqrt.f32 %v7012_v47  ;;  %vm3392_vm8 = vcmp.eq.f32.partialorder %v3391_v3, 8.507059e+37 }
 0x578   : > { %3569 = vst [vmem:[%s6820_s15 + $0x10] sm:$0xff] %v3553_v24  ;;  %v3360_v21 = vsel %vm3359_vm5, %v4129_v49, %v3356_v17  ;;  %4136 = vrcp.f32 %v3269_v61  ;;  %vm3196_vm9 = vcmp.eq.f32.partialorder %v6931_v2, inf  ;;  %v3199_v7 = vand.u32 2147483648, %v6931_v2 }
 0x579   : > { %v3365_v50 = vsel %vm3362_vm6, %v3364_v44, %v3360_v21  ;;  %v3390_v59 = vsel %vm3389_vm7, %v4131_v33, %v3386_v12  ;;  %v3197_v0 = vsel %vm3196_vm9, %v6931_v2, %v3195_v38  ;;  %vm3198_vm10 = vcmp.eq.f32.partialorder %v6931_v2, 0.0 }
 0x57a   : > { %v3522_v60 = vmul.f32 %v3365_v50, %v6772_v22  ;;  %v3395_v1 = vsel %vm3392_vm8, %v3394_v30, %v3390_v59  ;;  %v3200_v51 = vsel %vm3198_vm10, %v3199_v7, %v3197_v0  ;;  %v3406_v26 = vand.u32 2147483647, %v3269_v61 }
 0x57b   : > { %v3524_v14 = vmul.f32 %v3395_v1, %v6769_v46  ;;  %v4133_v52 = vpop.eup %4132  ;;  %v7033_v32 = vadd.f32 1e-06, %v3200_v51  ;;  %v3408_v28 = vand.u32 2147483648, %v3269_v61  ;;  %vm3220_vm12 = vcmp.eq.f32.partialorder %v7006_v55, inf }
 0x57c   : > { %v3539_v16 = vmul.f32 %v6808_v13, %v3522_v60  ;;  %v3214_v6 = vmul.f32 %v4133_v52, %v7006_v55  ;;  %vm3222_vm13 = vcmp.eq.f32.partialorder %v7006_v55, 0.0  ;;  %v3223_v42 = vand.u32 2147483648, %v7006_v55 }
 0x57d   : > { %v3048_v35 = vpop.xlane.xlu1 %3047  ;;  %v3541_v22 = vmul.f32 %v6808_v13, %v3524_v14  ;;  %v4135_v31 = vpop.eup %4134  ;;  %4138 = vrcp.f32 %v7033_v32  ;;  %vm3402_vm14 = vweird.f32 %v3269_v61  ;;  %vm3407_vm0 = vcmp.eq.f32.partialorder %v3406_v26, 8.507059e+37 }
 0x57e   : > { %v3556_v46 = vadd.f32 %v6810_v11, %v3539_v16  ;;  %v7037_v49 = vmul.f32 0.007874016, %v3048_v35  ;;  %v4137_v39 = vpop.eup %4136  ;;  %v3215_v45 = vmul.f32 %v4133_v52, %v3214_v6  ;;  %v3202_v23 = vmul.f32 %v4135_v31, %v7012_v47 }
 0x57f   : > { %v3558_v2 = vadd.f32 %v6810_v11, %v3541_v22  ;;  %v3398_v20 = vmul.f32 %v4137_v39, %v3269_v61  ;;  %vm3403_vm11 = vweird.f32 %v4137_v39  ;;  %v3409_v54 = vor.u32 1.1754944e-38, %v3408_v28 }
 0x580   : > { %3572 = vst [vmem:[%s6820_s15 + $0x28] sm:$0xff] %v3556_v46  ;;  %4140 = vrsqrt.f32 %v7037_v49  ;;  %v3216_v25 = vmul.f32 0.5, %v3215_v45  ;;  %v3203_v5 = vmul.f32 %v4135_v31, %v3202_v23  ;;  %vm3404_vm15 = vmor %vm3402_vm14, %vm3403_vm11  ;;  %v3436_v62 = vand.u32 2147483647, %v7033_v32 }
 0x581   : > { %3574 = vst [vmem:[%s6820_s15 + $0x38] sm:$0xff] %v3558_v2  ;;  %v3399_v33 = vsub.f32 1.0, %v3398_v20  ;;  %v3438_v17 = vand.u32 2147483648, %v7033_v32  ;;  %vm3432_vm2 = vweird.f32 %v7033_v32  ;;  %vm3208_vm3 = vcmp.eq.f32.partialorder %v7012_v47, inf }
 0x582   : > { %v3217_v3 = vsub.f32 1.5, %v3216_v25  ;;  %v3204_v56 = vmul.f32 0.5, %v3203_v5  ;;  %vm3210_vm5 = vcmp.eq.f32.partialorder %v7012_v47, 0.0  ;;  %vm3437_vm6 = vcmp.eq.f32.partialorder %v3436_v62, 8.507059e+37 }
 0x583   : > { %v3400_v8 = vmul.f32 %v4137_v39, %v3399_v33  ;;  %v4139_v63 = vpop.eup %4138  ;;  %v3439_v60 = vor.u32 1.1754944e-38, %v3438_v17  ;;  %vm3232_vm7 = vcmp.eq.f32.partialorder %v7037_v49, inf  ;;  %vm3234_vm8 = vcmp.eq.f32.partialorder %v7037_v49, 0.0 }
 0x584   : > { %v3428_v37 = vmul.f32 %v4139_v63, %v7033_v32  ;;  %v3218_v41 = vmul.f32 %v4133_v52, %v3217_v3  ;;  %v3205_v40 = vsub.f32 1.5, %v3204_v56  ;;  %vm3433_vm1 = vweird.f32 %v4139_v63 }
 0x585   : > { %v3401_v58 = vadd.f32 %v4137_v39, %v3400_v8  ;;  %vm3434_vm4 = vmor %vm3432_vm2, %vm3433_vm1 }
 0x586   : > { %v4141_v15 = vpop.eup %4140  ;;  %v3429_v57 = vsub.f32 1.0, %v3428_v37  ;;  %v3219_v19 = vmul.f32 %v3218_v41, %v7006_v55  ;;  %v3206_v43 = vmul.f32 %v4135_v31, %v3205_v40 }
 0x587   : > { %v3405_v24 = vsel %vm3404_vm15, %v4137_v39, %v3401_v58  ;;  %v3226_v34 = vmul.f32 %v4141_v15, %v7037_v49  ;;  %v3235_v39 = vand.u32 2147483648, %v7037_v49 }
 0x588   : > { %v3410_v27 = vsel %vm3407_vm0, %v3409_v54, %v3405_v24  ;;  %v3430_v44 = vmul.f32 %v4139_v63, %v3429_v57  ;;  %v3221_v12 = vsel %vm3220_vm12, %v7006_v55, %v3219_v19  ;;  %v3207_v30 = vmul.f32 %v3206_v43, %v7012_v47 }
 0x589   : > { %v3525_v29 = vmul.f32 %v3410_v27, %v6784_v9  ;;  %v3227_v61 = vmul.f32 %v4141_v15, %v3226_v34  ;;  %v3224_v21 = vsel %vm3222_vm13, %v3223_v42, %v3221_v12  ;;  %v3211_v55 = vand.u32 2147483648, %v7012_v47 }
 0x58a   : > { %v3431_v50 = vadd.f32 %v4139_v63, %v3430_v44  ;;  %v3273_v9 = vadd.f32 1e-06, %v3224_v21  ;;  %v3209_v1 = vsel %vm3208_vm3, %v7012_v47, %v3207_v30 }
 0x58b   : > { %v3542_v38 = vmul.f32 %v6808_v13, %v3525_v29  ;;  %v3228_v59 = vmul.f32 0.5, %v3227_v61  ;;  %v3212_v35 = vsel %vm3210_vm5, %v3211_v55, %v3209_v1 }
 0x58c   : > { %v3435_v14 = vsel %vm3434_vm4, %v4139_v63, %v3431_v50  ;;  %4142 = vrcp.f32 %v3273_v9  ;;  %v3272_v16 = vadd.f32 1e-06, %v3212_v35  ;;  %v3466_v45 = vand.u32 2147483647, %v3273_v9 }
 0x58d   : > { %v3559_v7 = vadd.f32 %v6810_v11, %v3542_v38  ;;  %v3440_v0 = vsel %vm3437_vm6, %v3439_v60, %v3435_v14  ;;  %v3229_v51 = vsub.f32 1.5, %v3228_v59  ;;  %v3468_v23 = vand.u32 2147483648, %v3273_v9 }
 0x58e   : > { %v3527_v52 = vmul.f32 %v3440_v0, %v6781_v48  ;;  %4144 = vrcp.f32 %v3272_v16  ;;  %vm3462_vm10 = vweird.f32 %v3273_v9  ;;  %vm3467_vm12 = vcmp.eq.f32.partialorder %v3466_v45, 8.507059e+37 }
 0x58f   : > { %3575 = vst [vmem:[%s6820_s15 + $0x40] sm:$0xff] %v3559_v7  ;;  %v3230_v32 = vmul.f32 %v4141_v15, %v3229_v51  ;;  %v3469_v3 = vor.u32 1.1754944e-38, %v3468_v23  ;;  %v3453_v63 = vand.u32 2147483648, %v3272_v16  ;;  %vm3447_vm14 = vweird.f32 %v3272_v16 }
 0x590   : > { %v3544_v22 = vmul.f32 %v6808_v13, %v3527_v52 }
 0x591   : > { %v3231_v46 = vmul.f32 %v3230_v32, %v7037_v49  ;;  %v3454_v15 = vor.u32 1.1754944e-38, %v3453_v63 }
 0x592   : > { %v4143_v6 = vpop.eup %4142  ;;  %v3561_v47 = vadd.f32 %v6810_v11, %v3544_v22 }
 0x593   : > { %v3458_v31 = vmul.f32 %v4143_v6, %v3273_v9  ;;  %v3233_v48 = vsel %vm3232_vm7, %v7037_v49, %v3231_v46  ;;  %vm3463_vm9 = vweird.f32 %v4143_v6  ;;  %v3451_v49 = vand.u32 2147483647, %v3272_v16 }
 0x594   : > { %3577 = vst [vmem:[%s6820_s15 + $0x50] sm:$0xff] %v3561_v47  ;;  %v4145_v20 = vpop.eup %4144  ;;  %v3236_v33 = vsel %vm3234_vm8, %v3235_v39, %v3233_v48  ;;  %vm3464_vm11 = vmor %vm3462_vm10, %vm3463_vm9 }
 0x595   : > { %v3459_v2 = vsub.f32 1.0, %v3458_v31  ;;  %v3443_v26 = vmul.f32 %v4145_v20, %v3272_v16  ;;  %v3274_v28 = vadd.f32 1e-06, %v3236_v33  ;;  %vm3448_vm13 = vweird.f32 %v4145_v20 }
 0x596   : > { %vm3449_vm15 = vmor %vm3447_vm14, %vm3448_vm13  ;;  %vm3452_vm0 = vcmp.eq.f32.partialorder %v3451_v49, 8.507059e+37 }
 0x597   : > { %v3460_v25 = vmul.f32 %v4143_v6, %v3459_v2  ;;  %v3444_v8 = vsub.f32 1.0, %v3443_v26  ;;  %4146 = vrcp.f32 %v3274_v28  ;;  %v3483_v17 = vand.u32 2147483648, %v3274_v28 }
 0x598   : > { %v3481_v29 = vand.u32 2147483647, %v3274_v28  ;;  %vm3477_vm2 = vweird.f32 %v3274_v28 }
 0x599   : > { %v3461_v5 = vadd.f32 %v4143_v6, %v3460_v25  ;;  %v3445_v56 = vmul.f32 %v4145_v20, %v3444_v8  ;;  %v3484_v61 = vor.u32 1.1754944e-38, %v3483_v17 }
 0x59a   : > { %vm3482_vm4 = vcmp.eq.f32.partialorder %v3481_v29, 8.507059e+37 }
 0x59b   : > { %v3465_v42 = vsel %vm3464_vm11, %v4143_v6, %v3461_v5  ;;  %v3446_v41 = vadd.f32 %v4145_v20, %v3445_v56 }
 0x59c   : > { %v3470_v58 = vsel %vm3467_vm12, %v3469_v3, %v3465_v42 }
 0x59d   : > { %v3529_v37 = vmul.f32 %v3470_v58, %v6798_v4  ;;  %v4147_v54 = vpop.eup %4146  ;;  %v3450_v40 = vsel %vm3449_vm15, %v4145_v20, %v3446_v41 }
 0x59e   : > { %v3455_v24 = vsel %vm3452_vm0, %v3454_v15, %v3450_v40  ;;  %v3473_v57 = vmul.f32 %v4147_v54, %v3274_v28  ;;  %vm3478_vm1 = vweird.f32 %v4147_v54 }
 0x59f   : > { %v3546_v62 = vmul.f32 %v6808_v13, %v3529_v37  ;;  %v3528_v34 = vmul.f32 %v3455_v24, %v6792_v10  ;;  %vm3479_vm3 = vmor %vm3477_vm2, %vm3478_vm1 }
 0x5a0   : > { %v3474_v27 = vsub.f32 1.0, %v3473_v57 }
 0x5a1   : > { %v3563_v19 = vadd.f32 %v6810_v11, %v3546_v62  ;;  %v3545_v4 = vmul.f32 %v6808_v13, %v3528_v34 }
 0x5a2   : > { %v3475_v43 = vmul.f32 %v4147_v54, %v3474_v27 }
 0x5a3   : > { %3579 = vst [vmem:[%s6820_s15 + $0x60] sm:$0xff] %v3563_v19  ;;  %v3562_v44 = vadd.f32 %v6810_v11, %v3545_v4 }
 0x5a4   : > { %v3476_v12 = vadd.f32 %v4147_v54, %v3475_v43  ;;  %v3050_v10 = vpop.xlane.xlu2 %3049 }
 0x5a5   : > { %3578 = vst [vmem:[%s6820_s15 + $0x58] sm:$0xff] %v3562_v44  ;;  %v3067_v50 = vmul.f32 0.007874016, %v3050_v10 }
 0x5a6   : > { %v3480_v21 = vsel %vm3479_vm3, %v4147_v54, %v3476_v12 }
 0x5a7   : > { %v3485_v30 = vsel %vm3482_vm4, %v3484_v61, %v3480_v21  ;;  %4148 = vrsqrt.f32 %v3067_v50  ;;  %vm3244_vm5 = vcmp.eq.f32.partialorder %v3067_v50, inf  ;;  %v3247_v51 = vand.u32 2147483648, %v3067_v50 }
 0x5a8   : > { %v3530_v38 = vmul.f32 %v3485_v30, %v6804_v53  ;;  %vm3246_vm6 = vcmp.eq.f32.partialorder %v3067_v50, 0.0 }
 0x5aa   : > { %v3547_v9 = vmul.f32 %v6808_v13, %v3530_v38 }
 0x5ac   : > { %v3564_v59 = vadd.f32 %v6810_v11, %v3547_v9 }
 0x5ad   : > { %v4149_v60 = vpop.eup %4148 }
 0x5ae   : > { %3580 = vst [vmem:[%s6820_s15 + $0x68] sm:$0xff] %v3564_v59  ;;  %v3238_v1 = vmul.f32 %v4149_v60, %v3067_v50 }
 0x5b0   : > { %v3239_v55 = vmul.f32 %v4149_v60, %v3238_v1  ;;  %v3052_v0 = vpop.xlane.xlu0 %3051 }
 0x5b1   : > { %v3068_v52 = vmul.f32 0.007874016, %v3052_v0 }
 0x5b2   : > { %v3240_v7 = vmul.f32 0.5, %v3239_v55 }
 0x5b3   : > { %4150 = vrsqrt.f32 %v3068_v52  ;;  %vm3256_vm8 = vcmp.eq.f32.partialorder %v3068_v52, inf  ;;  %v3259_v28 = vand.u32 2147483648, %v3068_v52  ;;  %vm3258_vm10 = vcmp.eq.f32.partialorder %v3068_v52, 0.0 }
 0x5b4   : > { %v3241_v14 = vsub.f32 1.5, %v3240_v7 }
 0x5b6   : > { %v3242_v35 = vmul.f32 %v4149_v60, %v3241_v14 }
 0x5b8   : > { %v3243_v16 = vmul.f32 %v3242_v35, %v3067_v50 }
 0x5b9   : > { %v4151_v6 = vpop.eup %4150 }
 0x5ba   : > { %v3245_v53 = vsel %vm3244_vm5, %v3067_v50, %v3243_v16  ;;  %v3250_v47 = vmul.f32 %v4151_v6, %v3068_v52 }
 0x5bb   : > { %v3248_v22 = vsel %vm3246_vm6, %v3247_v51, %v3245_v53 }
 0x5bc   : > { %v3275_v32 = vadd.f32 1e-06, %v3248_v22  ;;  %v3251_v31 = vmul.f32 %v4151_v6, %v3250_v47 }
 0x5be   : > { %4152 = vrcp.f32 %v3275_v32  ;;  %v3252_v46 = vmul.f32 0.5, %v3251_v31  ;;  %v3498_v23 = vand.u32 2147483648, %v3275_v32  ;;  %v3496_v25 = vand.u32 2147483647, %v3275_v32 }
 0x5bf   : > { %vm3492_vm9 = vweird.f32 %v3275_v32 }
 0x5c0   : > { %v3253_v48 = vsub.f32 1.5, %v3252_v46  ;;  %v3499_v3 = vor.u32 1.1754944e-38, %v3498_v23  ;;  %vm3497_vm12 = vcmp.eq.f32.partialorder %v3496_v25, 8.507059e+37 }
 0x5c2   : > { %v3254_v45 = vmul.f32 %v4151_v6, %v3253_v48 }
 0x5c4   : > { %v4153_v39 = vpop.eup %4152  ;;  %v3255_v26 = vmul.f32 %v3254_v45, %v3068_v52 }
 0x5c5   : > { %v3488_v2 = vmul.f32 %v4153_v39, %v3275_v32  ;;  %vm3493_vm7 = vweird.f32 %v4153_v39 }
 0x5c6   : > { %v3257_v8 = vsel %vm3256_vm8, %v3068_v52, %v3255_v26  ;;  %vm3494_vm11 = vmor %vm3492_vm9, %vm3493_vm7 }
 0x5c7   : > { %v3489_v20 = vsub.f32 1.0, %v3488_v2  ;;  %v3260_v63 = vsel %vm3258_vm10, %v3259_v28, %v3257_v8 }
 0x5c8   : > { %v3276_v56 = vadd.f32 1e-06, %v3260_v63 }
 0x5c9   : > { %v3490_v33 = vmul.f32 %v4153_v39, %v3489_v20 }
 0x5ca   : > { %4154 = vrcp.f32 %v3276_v56  ;;  %v3513_v40 = vand.u32 2147483648, %v3276_v56  ;;  %v3511_v57 = vand.u32 2147483647, %v3276_v56  ;;  %vm3507_vm14 = vweird.f32 %v3276_v56 }
 0x5cb   : > { %v3491_v5 = vadd.f32 %v4153_v39, %v3490_v33 }
 0x5cc   : > { %vm3512_vm0 = vcmp.eq.f32.partialorder %v3511_v57, 8.507059e+37 }
 0x5cd   : > { %v3495_v42 = vsel %vm3494_vm11, %v4153_v39, %v3491_v5 }
 0x5ce   : > { %v3500_v49 = vsel %vm3497_vm12, %v3499_v3, %v3495_v42 }
 0x5cf   : > { %v3531_v58 = vmul.f32 %v3500_v49, %v6817_v36  ;;  %v3514_v36 = vor.u32 1.1754944e-38, %v3513_v40 }
 0x5d0   : > { %v4155_v15 = vpop.eup %4154 }
 0x5d1   : > { %v3548_v37 = vmul.f32 %v6808_v13, %v3531_v58  ;;  %v3503_v54 = vmul.f32 %v4155_v15, %v3276_v56  ;;  %vm3508_vm13 = vweird.f32 %v4155_v15 }
 0x5d2   : > { %vm3509_vm15 = vmor %vm3507_vm14, %vm3508_vm13 }
 0x5d3   : > { %v3565_v41 = vadd.f32 %v6810_v11, %v3548_v37  ;;  %v3504_v62 = vsub.f32 1.0, %v3503_v54 }
 0x5d5   : > { %3581 = vst [vmem:[%s6820_s15 + $0x70] sm:$0xff] %v3565_v41  ;;  %v3505_v24 = vmul.f32 %v4155_v15, %v3504_v62 }
 0x5d7   : > { %v3506_v19 = vadd.f32 %v4155_v15, %v3505_v24 }
 0x5d9   : > { %v3510_v34 = vsel %vm3509_vm15, %v4155_v15, %v3506_v19 }
 0x5da   : > { %v3515_v27 = vsel %vm3512_vm0, %v3514_v36, %v3510_v34 }
 0x5db   : > { %v3532_v4 = vmul.f32 %v3515_v27, %v6836_v18 }
 0x5dd   : > { %v3549_v17 = vmul.f32 %v6808_v13, %v3532_v4 }
 0x5df   : > { %v3566_v43 = vadd.f32 %v6810_v11, %v3549_v17 }
 0x5e1   : > { %3582 = vst [vmem:[%s6820_s15 + $0x78] sm:$0xff] %v3566_v43 }
 0x5e2   : > { %4395 = shalt.err (!%p4392_p5)
}
 0x5e3   : > { %s4462_s18 = smov 128   ;;  %s4463_s21 = smov 8  }
 0x5e4   : > { %3877 = dma.vmem_to_hbm [thread:$0]  (%p4600_p0), %s3597_s13, 2048, %s3599_s2, %s3584_s8, %s4462_s18, %s4462_s18, %s4463_s21  }
 0x5e5 PF: > { %s3613_s5 = sand.u32 1, %s4438_s24   ;;  %p7324_p10 = scmp.ge.s32.totalorder %s4450_s27, 2 }
 0x5e6   : > { %s3614_s9 = scalar_lea.sflag [#allocation4], %s3613_s5 }
 0x5e7   : > { %p3903_p11 = pnand %p7324_p10, %p4606_p6 }
 0x5e9   : > { %p3904_p12 = pneg %p3903_p11 }
 0x5eb   : > { %4433 = dma.done.wait (%p3904_p12), %s3614_s9, 2048  }
 0x5ec   : > { %4435 = vsyncadd (%p3904_p12), %s3614_s9, 4294965248  ;;  %p25_p2 = scmp.ge.s32.totalorder %s4576_s28, 4   ;;  %s7325_s24 = smov %s4442_s25 }
 0x5ed   : > { %s7326_s25 = smov %s4446_s26  ;;  %s7327_s26 = smov %s4588_s12 }
 0x5ee   : > { %s7328_s27 = smov %s4576_s28  ;;  %27 = sbr.rel (!%p25_p2) target bundleno = 15 (0xf), region = 126 }
 0x5f3   :  { %3620 = vsyncpa [#allocation3], 1 }
 0x5f4   :  { %3622 = vsyncpa [#allocation3 + $0x1], 1 }
 0x5f5   :  { %3623 = vsyncpa [#allocation6], 1 }
 0x5f6   :  { %3625 = vsyncpa [#allocation6 + $0x1], 1 }
 0x5f7   :  { %3626 = vsyncpa [#allocation9], 1 }
 0x5f8   :  { %3627 = vsyncpa [#allocation12], 1 }
 0x5f9   :  { %3628 = vsyncpa [#allocation4], 1 }
 0x5fa   :  { %3630 = vsyncpa [#allocation4 + $0x1], 1 }

</bundles_post_ra>
